<compile_context>
chip_gen: v7x
topology: tpu7x:2x2x1
jax: 0.10.0
libtpu: 0.0.40
codegen_flags: <defaults>
</compile_context>

<pallas_src>
import functools
import math

import numpy as np
import jax
import jax.numpy as jnp
from jax import lax
from jax.experimental import pallas as pl
from jax.experimental.pallas import tpu as pltpu


# ----------------------------------------------------------------------------
# In-kernel helpers
# ----------------------------------------------------------------------------

def _ln(x, g, b, eps):
    mu = jnp.mean(x, axis=-1, keepdims=True)
    var = jnp.mean(jnp.square(x - mu), axis=-1, keepdims=True)
    return (x - mu) * lax.rsqrt(var + eps) * g + b


def _mh_attention(qf, kf, vf, bias, wo, bo, *, h, dk, dv, scale):
    """softmax((q k^T)*scale + bias) v  followed by fc_o.

    qf: (nq, h*dk) f32, kf: (nk, h*dk) f32, vf: (nk, h*dv) f32,
    bias: additive mask broadcastable to (nq, nk) f32,
    wo: (h*dv, dm) bf16, bo: (1, dm) f32.

    Per-head QK^T / PV matmuls are unavoidable; fc_o is folded over all heads
    with a single K = h*dv matmul (review item).
    """
    vf16 = vf.astype(jnp.bfloat16)
    outs = []
    for hh in range(h):                              # fully unrolled, h small
        qh = qf[:, hh * dk:(hh + 1) * dk]            # (nq, dk)
        kh = kf[:, hh * dk:(hh + 1) * dk]            # (nk, dk)
        vh = vf16[:, hh * dv:(hh + 1) * dv]          # (nk, dv)
        s = jnp.einsum("qd,kd->qk", qh, kh,
                       preferred_element_type=jnp.float32) * scale + bias
        s = s - jnp.max(s, axis=-1, keepdims=True)
        p = jnp.exp(s)
        p = p * pl.reciprocal(jnp.sum(p, axis=-1, keepdims=True), approx=True)
        outs.append(jnp.dot(p.astype(jnp.bfloat16), vh,
                            preferred_element_type=jnp.float32))
    o = jnp.concatenate(outs, axis=-1)               # (nq, h*dv)
    return jnp.dot(o.astype(jnp.bfloat16), wo,
                   preferred_element_type=jnp.float32) + bo


# ----------------------------------------------------------------------------
# Fused decoder-layer kernel (one grid step per batch element)
# ----------------------------------------------------------------------------

def _decoder_layer_kernel(
        # per-batch inputs
        x_ref, enc_ref, box_ref, pad_ref, msa_ref, mea_ref,
        # self-attention weights
        wqkv_s_ref, bqkv_s_ref, wo_s_ref, bo_s_ref, gms_ref, bms_ref,
        g1_ref, b1_ref,
        # cross-attention weights
        wq_e_ref, bq_e_ref, wkv_e_ref, bkv_e_ref, wo_e_ref, bo_e_ref,
        gme_ref, bme_ref, g2_ref, b2_ref,
        # position-wise feed-forward weights
        w1_ref, bf1_ref, w2_ref, bf2_ref, gff_ref, bff_ref,
        # output
        o_ref,
        *, h, dk, dv, scale, eps):
    x = x_ref[0]                                     # (nq, dm) f32
    pad = pad_ref[0]                                 # (nq, 1)  f32
    Dq = h * dk
    Dv = h * dv

    # ------------------------- self attention -------------------------
    # TODO(synk): can_be_stateful running-keys cache (beam search) not modeled.
    qkv = jnp.dot(x.astype(jnp.bfloat16), wqkv_s_ref[...],
                  preferred_element_type=jnp.float32) + bqkv_s_ref[...]
    # NOTE: -1e30 keeps fully-masked rows NaN-free (uniform softmax) instead
    # of torch's NaN from masked_fill(-inf); not hit in this test.
    bias_self = jnp.where(msa_ref[0] != 0,
                          jnp.float32(-1e30), jnp.float32(0.0))       # (nq,nq)
    att = _mh_attention(qkv[:, :Dq], qkv[:, Dq:2 * Dq],
                        qkv[:, 2 * Dq:2 * Dq + Dv], bias_self,
                        wo_s_ref[...], bo_s_ref[...],
                        h=h, dk=dk, dv=dv, scale=scale)
    t = _ln(x + att, gms_ref[...], bms_ref[...], eps)       # MHA-internal LN
    sa = _ln(x + t, g1_ref[...], b1_ref[...], eps) * pad    # lnorm1 * mask_pad

    # --------------- cross attention over [enc_output ; box] ---------------
    cross = jnp.concatenate([enc_ref[0], box_ref[0]], axis=0)        # (nk, dm)
    q2 = jnp.dot(sa.astype(jnp.bfloat16), wq_e_ref[...],
                 preferred_element_type=jnp.float32) + bq_e_ref[...]
    kv2 = jnp.dot(cross.astype(jnp.bfloat16), wkv_e_ref[...],
                  preferred_element_type=jnp.float32) + bkv_e_ref[...]
    bias_enc = jnp.where(mea_ref[0] != 0,
                         jnp.float32(-1e30), jnp.float32(0.0))        # (1, nk)
    att2 = _mh_attention(q2, kv2[:, :Dq], kv2[:, Dq:], bias_enc,
                         wo_e_ref[...], bo_e_ref[...],
                         h=h, dk=dk, dv=dv, scale=scale)
    t2 = _ln(sa + att2, gme_ref[...], bme_ref[...], eps)    # MHA-internal LN
    ea = _ln(sa + t2, g2_ref[...], b2_ref[...], eps) * pad  # lnorm2 * mask_pad

    # ------------------ position-wise feed forward ------------------
    h1 = jnp.dot(ea.astype(jnp.bfloat16), w1_ref[...],
                 preferred_element_type=jnp.float32) + bf1_ref[...]
    h1 = jnp.maximum(h1, 0.0)
    ff = jnp.dot(h1.astype(jnp.bfloat16), w2_ref[...],
                 preferred_element_type=jnp.float32) + bf2_ref[...]
    out = _ln(ea + ff, gff_ref[...], bff_ref[...], eps) * pad
    o_ref[0] = out.astype(o_ref.dtype)                      # one wide store


# ----------------------------------------------------------------------------
# Wrapper
# ----------------------------------------------------------------------------

def decoder_layer_caption(params, cfg, inp, enc_output, box_lastlayer,
                          mask_pad, mask_self_att, mask_enc_att):
    bs, nq, dm = inp.shape
    n_enc = enc_output.shape[1]
    nb = box_lastlayer.shape[1]
    nk = n_enc + nb
    h, dk, dv = cfg["h"], cfg["d_k"], cfg["d_v"]
    scale = 1.0 / math.sqrt(dk)

    # Tiny int32 masks; additive 0/-1e30 biases are built in-kernel.
    msa = mask_self_att[:, 0].astype(jnp.int32)                     # (bs,nq,nq)
    box_mask = (jnp.sum(box_lastlayer, axis=-1) == 0)[:, None, :]   # (bs,1,nb)
    mea = jnp.concatenate([mask_enc_att[:, 0, :, :], box_mask],
                          axis=-1).astype(jnp.int32)                # (bs,1,nk)

    ps, pe, pf = params["self_att"], params["enc_att"], params["pwff"]
    bf16 = jnp.bfloat16
    row = lambda a: a.reshape(1, -1).astype(jnp.float32)

    weights = (
        ps["w_qkv"].astype(bf16), row(ps["b_qkv"]),
        ps["w_o"].astype(bf16), row(ps["b_o"]),
        row(ps["ln"]["g"]), row(ps["ln"]["b"]),
        row(params["lnorm1"]["g"]), row(params["lnorm1"]["b"]),
        pe["w_q"].astype(bf16), row(pe["b_q"]),
        pe["w_kv"].astype(bf16), row(pe["b_kv"]),
        pe["w_o"].astype(bf16), row(pe["b_o"]),
        row(pe["ln"]["g"]), row(pe["ln"]["b"]),
        row(params["lnorm2"]["g"]), row(params["lnorm2"]["b"]),
        pf["fc1"]["w"].astype(bf16), row(pf["fc1"]["b"]),
        pf["fc2"]["w"].astype(bf16), row(pf["fc2"]["b"]),
        row(pf["ln"]["g"]), row(pf["ln"]["b"]),
    )

    def batch3(s1, s2):
        return pl.BlockSpec((1, s1, s2), lambda i: (i, 0, 0))

    def const2(s1, s2):
        return pl.BlockSpec((s1, s2), lambda i: (0, 0))

    in_specs = [
        batch3(nq, dm),        # input
        batch3(n_enc, dm),     # enc_output
        batch3(nb, dm),        # box_lastlayer
        batch3(nq, 1),         # mask_pad
        batch3(nq, nq),        # self-attention mask (int32)
        batch3(1, nk),         # enc-attention mask incl. box mask (int32)
    ] + [const2(*w.shape) for w in weights]

    kernel = functools.partial(_decoder_layer_kernel, h=h, dk=dk, dv=dv,
                               scale=scale, eps=1e-5)
    return pl.pallas_call(
        kernel,
        out_shape=jax.ShapeDtypeStruct((bs, nq, dm), jnp.float32),
        grid=(bs,),
        in_specs=in_specs,
        out_specs=pl.BlockSpec((1, nq, dm), lambda i: (i, 0, 0)),
        compiler_params=pltpu.CompilerParams(
            dimension_semantics=("parallel",)),   # v7x: shard batch over TCs
    )(inp, enc_output, box_lastlayer, mask_pad, msa, mea, *weights)


# ----------------------------------------------------------------------------
# Deterministic parameter construction
# ----------------------------------------------------------------------------

def init_linear(key, d_in, d_out, scale=0.02):
    w = jax.random.normal(key, (d_in, d_out), jnp.float32) * scale
    return {"w": w, "b": jnp.zeros((d_out,), jnp.float32)}


def init_ln(d):
    return {"g": jnp.ones((d,), jnp.float32), "b": jnp.zeros((d,), jnp.float32)}


def init_mha_self(key, dm, dk, dv, h, scale=0.02):
    ks = jax.random.split(key, 4)
    wq = jax.random.normal(ks[0], (dm, h * dk), jnp.float32) * scale
    wk = jax.random.normal(ks[1], (dm, h * dk), jnp.float32) * scale
    wv = jax.random.normal(ks[2], (dm, h * dv), jnp.float32) * scale
    wo = jax.random.normal(ks[3], (h * dv, dm), jnp.float32) * scale
    return {"w_qkv": jnp.concatenate([wq, wk, wv], axis=1),
            "b_qkv": jnp.zeros((2 * h * dk + h * dv,), jnp.float32),
            "w_o": wo, "b_o": jnp.zeros((dm,), jnp.float32),
            "ln": init_ln(dm)}


def init_mha_cross(key, dm, dk, dv, h, scale=0.02):
    ks = jax.random.split(key, 4)
    wq = jax.random.normal(ks[0], (dm, h * dk), jnp.float32) * scale
    wk = jax.random.normal(ks[1], (dm, h * dk), jnp.float32) * scale
    wv = jax.random.normal(ks[2], (dm, h * dv), jnp.float32) * scale
    wo = jax.random.normal(ks[3], (h * dv, dm), jnp.float32) * scale
    return {"w_q": wq, "b_q": jnp.zeros((h * dk,), jnp.float32),
            "w_kv": jnp.concatenate([wk, wv], axis=1),
            "b_kv": jnp.zeros((h * dk + h * dv,), jnp.float32),
            "w_o": wo, "b_o": jnp.zeros((dm,), jnp.float32),
            "ln": init_ln(dm)}


def init_params(key, cfg):
    dm, dk, dv, h, dff = (cfg["d_model"], cfg["d_k"], cfg["d_v"],
                          cfg["h"], cfg["d_ff"])
    k1, k2, k3, k4 = jax.random.split(key, 4)
    return {
        "self_att": init_mha_self(k1, dm, dk, dv, h),
        "enc_att": init_mha_cross(k2, dm, dk, dv, h),
        "lnorm1": init_ln(dm),
        "lnorm2": init_ln(dm),
        "pwff": {"fc1": init_linear(k3, dm, dff),
                 "fc2": init_linear(k4, dff, dm),
                 "ln": init_ln(dm)},
    }


# ----------------------------------------------------------------------------
# main
# ----------------------------------------------------------------------------

if __name__ == "__main__":
    cfg = dict(d_model=64, d_k=8, d_v=8, h=8, d_ff=128)
    bs, seq, n_enc, nb = 2, 16, 24, 8

    root = jax.random.PRNGKey(0)
    kp, k1, k2, k3 = jax.random.split(root, 4)
    params = init_params(kp, cfg)

    inp = jax.random.normal(k1, (bs, seq, cfg["d_model"]), jnp.float32)
    enc_output = jax.random.normal(k2, (bs, n_enc, cfg["d_model"]), jnp.float32)
    box_lastlayer = jax.random.normal(k3, (bs, nb, cfg["d_model"]), jnp.float32)
    box_lastlayer = box_lastlayer.at[0, 6:].set(0.0)   # zero boxes -> box_mask

    pad_np = np.ones((bs, seq, 1), np.float32)
    pad_np[1, -4:, 0] = 0.0                            # padded decoder positions
    mask_pad = jnp.asarray(pad_np)

    causal = np.triu(np.ones((seq, seq), dtype=bool), k=1)
    mask_self_att = jnp.asarray(
        np.broadcast_to(causal[None, None], (bs, 1, seq, seq)).copy())

    enc_mask_np = np.zeros((bs, 1, 1, n_enc), dtype=bool)
    enc_mask_np[1, 0, 0, -3:] = True                   # padded encoder positions
    mask_enc_att = jnp.asarray(enc_mask_np)

    out = decoder_layer_caption(params, cfg, inp, enc_output, box_lastlayer,
                                mask_pad, mask_self_att, mask_enc_att)
    out = jax.block_until_ready(out)

    assert out.shape == (bs, seq, cfg["d_model"]), out.shape
    assert bool(jnp.all(jnp.isfinite(out)))
    print("KERNEL_OK")
</pallas_src>

<mosaic_0001>
module attributes {stable_mosaic.version = 11 : i64} {
  func.func @_decoder_layer_kernel(%arg0: i32, %arg1: memref<1x16x64xf32, #tpu.memory_space<vmem>>, %arg2: memref<1x24x64xf32, #tpu.memory_space<vmem>>, %arg3: memref<1x8x64xf32, #tpu.memory_space<vmem>>, %arg4: memref<1x16x1xf32, #tpu.memory_space<vmem>>, %arg5: memref<1x16x16xi32, #tpu.memory_space<vmem>>, %arg6: memref<1x1x32xi32, #tpu.memory_space<vmem>>, %arg7: memref<64x192xbf16, #tpu.memory_space<vmem>>, %arg8: memref<1x192xf32, #tpu.memory_space<vmem>>, %arg9: memref<64x64xbf16, #tpu.memory_space<vmem>>, %arg10: memref<1x64xf32, #tpu.memory_space<vmem>>, %arg11: memref<1x64xf32, #tpu.memory_space<vmem>>, %arg12: memref<1x64xf32, #tpu.memory_space<vmem>>, %arg13: memref<1x64xf32, #tpu.memory_space<vmem>>, %arg14: memref<1x64xf32, #tpu.memory_space<vmem>>, %arg15: memref<64x64xbf16, #tpu.memory_space<vmem>>, %arg16: memref<1x64xf32, #tpu.memory_space<vmem>>, %arg17: memref<64x128xbf16, #tpu.memory_space<vmem>>, %arg18: memref<1x128xf32, #tpu.memory_space<vmem>>, %arg19: memref<64x64xbf16, #tpu.memory_space<vmem>>, %arg20: memref<1x64xf32, #tpu.memory_space<vmem>>, %arg21: memref<1x64xf32, #tpu.memory_space<vmem>>, %arg22: memref<1x64xf32, #tpu.memory_space<vmem>>, %arg23: memref<1x64xf32, #tpu.memory_space<vmem>>, %arg24: memref<1x64xf32, #tpu.memory_space<vmem>>, %arg25: memref<64x128xbf16, #tpu.memory_space<vmem>>, %arg26: memref<1x128xf32, #tpu.memory_space<vmem>>, %arg27: memref<128x64xbf16, #tpu.memory_space<vmem>>, %arg28: memref<1x64xf32, #tpu.memory_space<vmem>>, %arg29: memref<1x64xf32, #tpu.memory_space<vmem>>, %arg30: memref<1x64xf32, #tpu.memory_space<vmem>>, %arg31: memref<1x16x64xf32, #tpu.memory_space<vmem>>) attributes {dimension_semantics = [#tpu.dimension_semantics<parallel>], iteration_bounds = array<i64: 2>, scalar_prefetch = 0 : i64, scratch_operands = 0 : i64, tpu.core_type = #tpu.core_type<tc>, window_params = [{transform_indices = @transform_0, window_bounds = array<i64: 1, 16, 64>}, {transform_indices = @transform_1, window_bounds = array<i64: 1, 24, 64>}, {transform_indices = @transform_2, window_bounds = array<i64: 1, 8, 64>}, {transform_indices = @transform_3, window_bounds = array<i64: 1, 16, 1>}, {transform_indices = @transform_4, window_bounds = array<i64: 1, 16, 16>}, {transform_indices = @transform_5, window_bounds = array<i64: 1, 1, 32>}, {pipeline_mode = #tpu.pipeline_mode<synchronous>, transform_indices = @transform_6, window_bounds = array<i64: 64, 192>}, {pipeline_mode = #tpu.pipeline_mode<synchronous>, transform_indices = @transform_7, window_bounds = array<i64: 1, 192>}, {pipeline_mode = #tpu.pipeline_mode<synchronous>, transform_indices = @transform_8, window_bounds = array<i64: 64, 64>}, {pipeline_mode = #tpu.pipeline_mode<synchronous>, transform_indices = @transform_9, window_bounds = array<i64: 1, 64>}, {pipeline_mode = #tpu.pipeline_mode<synchronous>, transform_indices = @transform_10, window_bounds = array<i64: 1, 64>}, {pipeline_mode = #tpu.pipeline_mode<synchronous>, transform_indices = @transform_11, window_bounds = array<i64: 1, 64>}, {pipeline_mode = #tpu.pipeline_mode<synchronous>, transform_indices = @transform_12, window_bounds = array<i64: 1, 64>}, {pipeline_mode = #tpu.pipeline_mode<synchronous>, transform_indices = @transform_13, window_bounds = array<i64: 1, 64>}, {pipeline_mode = #tpu.pipeline_mode<synchronous>, transform_indices = @transform_14, window_bounds = array<i64: 64, 64>}, {pipeline_mode = #tpu.pipeline_mode<synchronous>, transform_indices = @transform_15, window_bounds = array<i64: 1, 64>}, {pipeline_mode = #tpu.pipeline_mode<synchronous>, transform_indices = @transform_16, window_bounds = array<i64: 64, 128>}, {pipeline_mode = #tpu.pipeline_mode<synchronous>, transform_indices = @transform_17, window_bounds = array<i64: 1, 128>}, {pipeline_mode = #tpu.pipeline_mode<synchronous>, transform_indices = @transform_18, window_bounds = array<i64: 64, 64>}, {pipeline_mode = #tpu.pipeline_mode<synchronous>, transform_indices = @transform_19, window_bounds = array<i64: 1, 64>}, {pipeline_mode = #tpu.pipeline_mode<synchronous>, transform_indices = @transform_20, window_bounds = array<i64: 1, 64>}, {pipeline_mode = #tpu.pipeline_mode<synchronous>, transform_indices = @transform_21, window_bounds = array<i64: 1, 64>}, {pipeline_mode = #tpu.pipeline_mode<synchronous>, transform_indices = @transform_22, window_bounds = array<i64: 1, 64>}, {pipeline_mode = #tpu.pipeline_mode<synchronous>, transform_indices = @transform_23, window_bounds = array<i64: 1, 64>}, {pipeline_mode = #tpu.pipeline_mode<synchronous>, transform_indices = @transform_24, window_bounds = array<i64: 64, 128>}, {pipeline_mode = #tpu.pipeline_mode<synchronous>, transform_indices = @transform_25, window_bounds = array<i64: 1, 128>}, {pipeline_mode = #tpu.pipeline_mode<synchronous>, transform_indices = @transform_26, window_bounds = array<i64: 128, 64>}, {pipeline_mode = #tpu.pipeline_mode<synchronous>, transform_indices = @transform_27, window_bounds = array<i64: 1, 64>}, {pipeline_mode = #tpu.pipeline_mode<synchronous>, transform_indices = @transform_28, window_bounds = array<i64: 1, 64>}, {pipeline_mode = #tpu.pipeline_mode<synchronous>, transform_indices = @transform_29, window_bounds = array<i64: 1, 64>}, {transform_indices = @transform_30, window_bounds = array<i64: 1, 16, 64>}]} {
    %c0 = arith.constant 0 : index
    %c0_0 = arith.constant 0 : index
    %c0_1 = arith.constant 0 : index
    %0 = vector.load %arg1[%c0, %c0_0, %c0_1] : memref<1x16x64xf32, #tpu.memory_space<vmem>>, vector<1x16x64xf32>
    %1 = vector.shape_cast %0 : vector<1x16x64xf32> to vector<16x64xf32>
    %c0_2 = arith.constant 0 : index
    %c0_3 = arith.constant 0 : index
    %c0_4 = arith.constant 0 : index
    %2 = vector.load %arg4[%c0_2, %c0_3, %c0_4] : memref<1x16x1xf32, #tpu.memory_space<vmem>>, vector<1x16x1xf32>
    %3 = vector.shape_cast %2 : vector<1x16x1xf32> to vector<16x1xf32>
    %4 = arith.truncf %1 : vector<16x64xf32> to vector<16x64xbf16>
    %c0_5 = arith.constant 0 : index
    %c0_6 = arith.constant 0 : index
    %5 = vector.load %arg7[%c0_5, %c0_6] : memref<64x192xbf16, #tpu.memory_space<vmem>>, vector<64x192xbf16>
    %cst = arith.constant dense<0.000000e+00> : vector<16x192xf32>
    %6 = tpu.matmul %4, %5, %cst {dimension_numbers = #tpu.dot_dimension_numbers<[1], [0], [0], [1], [0, 0, 1, 1], [], []>} : vector<16x64xbf16>, vector<64x192xbf16>, vector<16x192xf32> -> vector<16x192xf32>
    %c0_7 = arith.constant 0 : index
    %c0_8 = arith.constant 0 : index
    %7 = vector.load %arg8[%c0_7, %c0_8] : memref<1x192xf32, #tpu.memory_space<vmem>>, vector<1x192xf32>
    %8 = vector.broadcast %7 : vector<1x192xf32> to vector<16x192xf32>
    %9 = arith.addf %6, %8 : vector<16x192xf32>
    %c0_9 = arith.constant 0 : index
    %c0_10 = arith.constant 0 : index
    %c0_11 = arith.constant 0 : index
    %10 = vector.load %arg5[%c0_9, %c0_10, %c0_11] : memref<1x16x16xi32, #tpu.memory_space<vmem>>, vector<1x16x16xi32>
    %11 = vector.shape_cast %10 : vector<1x16x16xi32> to vector<16x16xi32>
    %c0_i32 = arith.constant 0 : i32
    %12 = vector.broadcast %c0_i32 : i32 to vector<16x16xi32>
    %13 = arith.cmpi ne, %11, %12 : vector<16x16xi32>
    %cst_12 = arith.constant -1.000000e+30 : f32
    %cst_13 = arith.constant 0.000000e+00 : f32
    %14 = vector.broadcast %cst_12 : f32 to vector<16x16xf32>
    %15 = vector.broadcast %cst_13 : f32 to vector<16x16xf32>
    %16 = arith.select %13, %14, %15 : vector<16x16xi1>, vector<16x16xf32>
    %17 = vector.extract_strided_slice %9 {offsets = [0, 0], sizes = [16, 64], strides = [1, 1]} : vector<16x192xf32> to vector<16x64xf32>
    %18 = vector.extract_strided_slice %9 {offsets = [0, 64], sizes = [16, 64], strides = [1, 1]} : vector<16x192xf32> to vector<16x64xf32>
    %19 = vector.extract_strided_slice %9 {offsets = [0, 128], sizes = [16, 64], strides = [1, 1]} : vector<16x192xf32> to vector<16x64xf32>
    %c0_14 = arith.constant 0 : index
    %c0_15 = arith.constant 0 : index
    %20 = vector.load %arg9[%c0_14, %c0_15] : memref<64x64xbf16, #tpu.memory_space<vmem>>, vector<64x64xbf16>
    %c0_16 = arith.constant 0 : index
    %c0_17 = arith.constant 0 : index
    %21 = vector.load %arg10[%c0_16, %c0_17] : memref<1x64xf32, #tpu.memory_space<vmem>>, vector<1x64xf32>
    %22 = arith.truncf %19 : vector<16x64xf32> to vector<16x64xbf16>
    %23 = vector.extract_strided_slice %17 {offsets = [0, 0], sizes = [16, 8], strides = [1, 1]} : vector<16x64xf32> to vector<16x8xf32>
    %24 = vector.extract_strided_slice %18 {offsets = [0, 0], sizes = [16, 8], strides = [1, 1]} : vector<16x64xf32> to vector<16x8xf32>
    %25 = vector.extract_strided_slice %22 {offsets = [0, 0], sizes = [16, 8], strides = [1, 1]} : vector<16x64xbf16> to vector<16x8xbf16>
    "tpu.trace_start"() <{level = 10 : i32, message = "qd,kd->qk"}> : () -> ()
    %cst_18 = arith.constant dense<0.000000e+00> : vector<16x16xf32>
    %26 = tpu.matmul %23, %24, %cst_18 {dimension_numbers = #tpu.dot_dimension_numbers<[1], [1], [0], [0], [0, 0, 1, 0], [], []>} : vector<16x8xf32>, vector<16x8xf32>, vector<16x16xf32> -> vector<16x16xf32>
    "tpu.trace_stop"() : () -> ()
    %cst_19 = arith.constant 0.353553385 : f32
    %27 = vector.broadcast %cst_19 : f32 to vector<16x16xf32>
    %28 = arith.mulf %26, %27 : vector<16x16xf32>
    %29 = arith.addf %28, %16 : vector<16x16xf32>
    %cst_20 = arith.constant dense<0xFF800000> : vector<16xf32>
    %30 = vector.multi_reduction <maximumf>, %29, %cst_20 [1] : vector<16x16xf32> to vector<16xf32>
    %31 = vector.shape_cast %30 : vector<16xf32> to vector<16x1xf32>
    %32 = vector.broadcast %31 : vector<16x1xf32> to vector<16x16xf32>
    %33 = arith.subf %29, %32 : vector<16x16xf32>
    %34 = math.exp %33 : vector<16x16xf32>
    %cst_21 = arith.constant dense<0.000000e+00> : vector<16xf32>
    %35 = vector.multi_reduction <add>, %34, %cst_21 [1] : vector<16x16xf32> to vector<16xf32>
    %36 = vector.shape_cast %35 : vector<16xf32> to vector<16x1xf32>
    %37 = tpu.reciprocal %36 {approx = true} : vector<16x1xf32> -> vector<16x1xf32>
    %38 = vector.broadcast %37 : vector<16x1xf32> to vector<16x16xf32>
    %39 = arith.mulf %34, %38 : vector<16x16xf32>
    %40 = arith.truncf %39 : vector<16x16xf32> to vector<16x16xbf16>
    %cst_22 = arith.constant dense<0.000000e+00> : vector<16x8xf32>
    %41 = tpu.matmul %40, %25, %cst_22 {dimension_numbers = #tpu.dot_dimension_numbers<[1], [0], [0], [1], [0, 0, 1, 1], [], []>} : vector<16x16xbf16>, vector<16x8xbf16>, vector<16x8xf32> -> vector<16x8xf32>
    %42 = vector.extract_strided_slice %17 {offsets = [0, 8], sizes = [16, 8], strides = [1, 1]} : vector<16x64xf32> to vector<16x8xf32>
    %43 = vector.extract_strided_slice %18 {offsets = [0, 8], sizes = [16, 8], strides = [1, 1]} : vector<16x64xf32> to vector<16x8xf32>
    %44 = vector.extract_strided_slice %22 {offsets = [0, 8], sizes = [16, 8], strides = [1, 1]} : vector<16x64xbf16> to vector<16x8xbf16>
    "tpu.trace_start"() <{level = 10 : i32, message = "qd,kd->qk"}> : () -> ()
    %cst_23 = arith.constant dense<0.000000e+00> : vector<16x16xf32>
    %45 = tpu.matmul %42, %43, %cst_23 {dimension_numbers = #tpu.dot_dimension_numbers<[1], [1], [0], [0], [0, 0, 1, 0], [], []>} : vector<16x8xf32>, vector<16x8xf32>, vector<16x16xf32> -> vector<16x16xf32>
    "tpu.trace_stop"() : () -> ()
    %cst_24 = arith.constant 0.353553385 : f32
    %46 = vector.broadcast %cst_24 : f32 to vector<16x16xf32>
    %47 = arith.mulf %45, %46 : vector<16x16xf32>
    %48 = arith.addf %47, %16 : vector<16x16xf32>
    %cst_25 = arith.constant dense<0xFF800000> : vector<16xf32>
    %49 = vector.multi_reduction <maximumf>, %48, %cst_25 [1] : vector<16x16xf32> to vector<16xf32>
    %50 = vector.shape_cast %49 : vector<16xf32> to vector<16x1xf32>
    %51 = vector.broadcast %50 : vector<16x1xf32> to vector<16x16xf32>
    %52 = arith.subf %48, %51 : vector<16x16xf32>
    %53 = math.exp %52 : vector<16x16xf32>
    %cst_26 = arith.constant dense<0.000000e+00> : vector<16xf32>
    %54 = vector.multi_reduction <add>, %53, %cst_26 [1] : vector<16x16xf32> to vector<16xf32>
    %55 = vector.shape_cast %54 : vector<16xf32> to vector<16x1xf32>
    %56 = tpu.reciprocal %55 {approx = true} : vector<16x1xf32> -> vector<16x1xf32>
    %57 = vector.broadcast %56 : vector<16x1xf32> to vector<16x16xf32>
    %58 = arith.mulf %53, %57 : vector<16x16xf32>
    %59 = arith.truncf %58 : vector<16x16xf32> to vector<16x16xbf16>
    %cst_27 = arith.constant dense<0.000000e+00> : vector<16x8xf32>
    %60 = tpu.matmul %59, %44, %cst_27 {dimension_numbers = #tpu.dot_dimension_numbers<[1], [0], [0], [1], [0, 0, 1, 1], [], []>} : vector<16x16xbf16>, vector<16x8xbf16>, vector<16x8xf32> -> vector<16x8xf32>
    %61 = vector.extract_strided_slice %17 {offsets = [0, 16], sizes = [16, 8], strides = [1, 1]} : vector<16x64xf32> to vector<16x8xf32>
    %62 = vector.extract_strided_slice %18 {offsets = [0, 16], sizes = [16, 8], strides = [1, 1]} : vector<16x64xf32> to vector<16x8xf32>
    %63 = vector.extract_strided_slice %22 {offsets = [0, 16], sizes = [16, 8], strides = [1, 1]} : vector<16x64xbf16> to vector<16x8xbf16>
    "tpu.trace_start"() <{level = 10 : i32, message = "qd,kd->qk"}> : () -> ()
    %cst_28 = arith.constant dense<0.000000e+00> : vector<16x16xf32>
    %64 = tpu.matmul %61, %62, %cst_28 {dimension_numbers = #tpu.dot_dimension_numbers<[1], [1], [0], [0], [0, 0, 1, 0], [], []>} : vector<16x8xf32>, vector<16x8xf32>, vector<16x16xf32> -> vector<16x16xf32>
    "tpu.trace_stop"() : () -> ()
    %cst_29 = arith.constant 0.353553385 : f32
    %65 = vector.broadcast %cst_29 : f32 to vector<16x16xf32>
    %66 = arith.mulf %64, %65 : vector<16x16xf32>
    %67 = arith.addf %66, %16 : vector<16x16xf32>
    %cst_30 = arith.constant dense<0xFF800000> : vector<16xf32>
    %68 = vector.multi_reduction <maximumf>, %67, %cst_30 [1] : vector<16x16xf32> to vector<16xf32>
    %69 = vector.shape_cast %68 : vector<16xf32> to vector<16x1xf32>
    %70 = vector.broadcast %69 : vector<16x1xf32> to vector<16x16xf32>
    %71 = arith.subf %67, %70 : vector<16x16xf32>
    %72 = math.exp %71 : vector<16x16xf32>
    %cst_31 = arith.constant dense<0.000000e+00> : vector<16xf32>
    %73 = vector.multi_reduction <add>, %72, %cst_31 [1] : vector<16x16xf32> to vector<16xf32>
    %74 = vector.shape_cast %73 : vector<16xf32> to vector<16x1xf32>
    %75 = tpu.reciprocal %74 {approx = true} : vector<16x1xf32> -> vector<16x1xf32>
    %76 = vector.broadcast %75 : vector<16x1xf32> to vector<16x16xf32>
    %77 = arith.mulf %72, %76 : vector<16x16xf32>
    %78 = arith.truncf %77 : vector<16x16xf32> to vector<16x16xbf16>
    %cst_32 = arith.constant dense<0.000000e+00> : vector<16x8xf32>
    %79 = tpu.matmul %78, %63, %cst_32 {dimension_numbers = #tpu.dot_dimension_numbers<[1], [0], [0], [1], [0, 0, 1, 1], [], []>} : vector<16x16xbf16>, vector<16x8xbf16>, vector<16x8xf32> -> vector<16x8xf32>
    %80 = vector.extract_strided_slice %17 {offsets = [0, 24], sizes = [16, 8], strides = [1, 1]} : vector<16x64xf32> to vector<16x8xf32>
    %81 = vector.extract_strided_slice %18 {offsets = [0, 24], sizes = [16, 8], strides = [1, 1]} : vector<16x64xf32> to vector<16x8xf32>
    %82 = vector.extract_strided_slice %22 {offsets = [0, 24], sizes = [16, 8], strides = [1, 1]} : vector<16x64xbf16> to vector<16x8xbf16>
    "tpu.trace_start"() <{level = 10 : i32, message = "qd,kd->qk"}> : () -> ()
    %cst_33 = arith.constant dense<0.000000e+00> : vector<16x16xf32>
    %83 = tpu.matmul %80, %81, %cst_33 {dimension_numbers = #tpu.dot_dimension_numbers<[1], [1], [0], [0], [0, 0, 1, 0], [], []>} : vector<16x8xf32>, vector<16x8xf32>, vector<16x16xf32> -> vector<16x16xf32>
    "tpu.trace_stop"() : () -> ()
    %cst_34 = arith.constant 0.353553385 : f32
    %84 = vector.broadcast %cst_34 : f32 to vector<16x16xf32>
    %85 = arith.mulf %83, %84 : vector<16x16xf32>
    %86 = arith.addf %85, %16 : vector<16x16xf32>
    %cst_35 = arith.constant dense<0xFF800000> : vector<16xf32>
    %87 = vector.multi_reduction <maximumf>, %86, %cst_35 [1] : vector<16x16xf32> to vector<16xf32>
    %88 = vector.shape_cast %87 : vector<16xf32> to vector<16x1xf32>
    %89 = vector.broadcast %88 : vector<16x1xf32> to vector<16x16xf32>
    %90 = arith.subf %86, %89 : vector<16x16xf32>
    %91 = math.exp %90 : vector<16x16xf32>
    %cst_36 = arith.constant dense<0.000000e+00> : vector<16xf32>
    %92 = vector.multi_reduction <add>, %91, %cst_36 [1] : vector<16x16xf32> to vector<16xf32>
    %93 = vector.shape_cast %92 : vector<16xf32> to vector<16x1xf32>
    %94 = tpu.reciprocal %93 {approx = true} : vector<16x1xf32> -> vector<16x1xf32>
    %95 = vector.broadcast %94 : vector<16x1xf32> to vector<16x16xf32>
    %96 = arith.mulf %91, %95 : vector<16x16xf32>
    %97 = arith.truncf %96 : vector<16x16xf32> to vector<16x16xbf16>
    %cst_37 = arith.constant dense<0.000000e+00> : vector<16x8xf32>
    %98 = tpu.matmul %97, %82, %cst_37 {dimension_numbers = #tpu.dot_dimension_numbers<[1], [0], [0], [1], [0, 0, 1, 1], [], []>} : vector<16x16xbf16>, vector<16x8xbf16>, vector<16x8xf32> -> vector<16x8xf32>
    %99 = vector.extract_strided_slice %17 {offsets = [0, 32], sizes = [16, 8], strides = [1, 1]} : vector<16x64xf32> to vector<16x8xf32>
    %100 = vector.extract_strided_slice %18 {offsets = [0, 32], sizes = [16, 8], strides = [1, 1]} : vector<16x64xf32> to vector<16x8xf32>
    %101 = vector.extract_strided_slice %22 {offsets = [0, 32], sizes = [16, 8], strides = [1, 1]} : vector<16x64xbf16> to vector<16x8xbf16>
    "tpu.trace_start"() <{level = 10 : i32, message = "qd,kd->qk"}> : () -> ()
    %cst_38 = arith.constant dense<0.000000e+00> : vector<16x16xf32>
    %102 = tpu.matmul %99, %100, %cst_38 {dimension_numbers = #tpu.dot_dimension_numbers<[1], [1], [0], [0], [0, 0, 1, 0], [], []>} : vector<16x8xf32>, vector<16x8xf32>, vector<16x16xf32> -> vector<16x16xf32>
    "tpu.trace_stop"() : () -> ()
    %cst_39 = arith.constant 0.353553385 : f32
    %103 = vector.broadcast %cst_39 : f32 to vector<16x16xf32>
    %104 = arith.mulf %102, %103 : vector<16x16xf32>
    %105 = arith.addf %104, %16 : vector<16x16xf32>
    %cst_40 = arith.constant dense<0xFF800000> : vector<16xf32>
    %106 = vector.multi_reduction <maximumf>, %105, %cst_40 [1] : vector<16x16xf32> to vector<16xf32>
    %107 = vector.shape_cast %106 : vector<16xf32> to vector<16x1xf32>
    %108 = vector.broadcast %107 : vector<16x1xf32> to vector<16x16xf32>
    %109 = arith.subf %105, %108 : vector<16x16xf32>
    %110 = math.exp %109 : vector<16x16xf32>
    %cst_41 = arith.constant dense<0.000000e+00> : vector<16xf32>
    %111 = vector.multi_reduction <add>, %110, %cst_41 [1] : vector<16x16xf32> to vector<16xf32>
    %112 = vector.shape_cast %111 : vector<16xf32> to vector<16x1xf32>
    %113 = tpu.reciprocal %112 {approx = true} : vector<16x1xf32> -> vector<16x1xf32>
    %114 = vector.broadcast %113 : vector<16x1xf32> to vector<16x16xf32>
    %115 = arith.mulf %110, %114 : vector<16x16xf32>
    %116 = arith.truncf %115 : vector<16x16xf32> to vector<16x16xbf16>
    %cst_42 = arith.constant dense<0.000000e+00> : vector<16x8xf32>
    %117 = tpu.matmul %116, %101, %cst_42 {dimension_numbers = #tpu.dot_dimension_numbers<[1], [0], [0], [1], [0, 0, 1, 1], [], []>} : vector<16x16xbf16>, vector<16x8xbf16>, vector<16x8xf32> -> vector<16x8xf32>
    %118 = vector.extract_strided_slice %17 {offsets = [0, 40], sizes = [16, 8], strides = [1, 1]} : vector<16x64xf32> to vector<16x8xf32>
    %119 = vector.extract_strided_slice %18 {offsets = [0, 40], sizes = [16, 8], strides = [1, 1]} : vector<16x64xf32> to vector<16x8xf32>
    %120 = vector.extract_strided_slice %22 {offsets = [0, 40], sizes = [16, 8], strides = [1, 1]} : vector<16x64xbf16> to vector<16x8xbf16>
    "tpu.trace_start"() <{level = 10 : i32, message = "qd,kd->qk"}> : () -> ()
    %cst_43 = arith.constant dense<0.000000e+00> : vector<16x16xf32>
    %121 = tpu.matmul %118, %119, %cst_43 {dimension_numbers = #tpu.dot_dimension_numbers<[1], [1], [0], [0], [0, 0, 1, 0], [], []>} : vector<16x8xf32>, vector<16x8xf32>, vector<16x16xf32> -> vector<16x16xf32>
    "tpu.trace_stop"() : () -> ()
    %cst_44 = arith.constant 0.353553385 : f32
    %122 = vector.broadcast %cst_44 : f32 to vector<16x16xf32>
    %123 = arith.mulf %121, %122 : vector<16x16xf32>
    %124 = arith.addf %123, %16 : vector<16x16xf32>
    %cst_45 = arith.constant dense<0xFF800000> : vector<16xf32>
    %125 = vector.multi_reduction <maximumf>, %124, %cst_45 [1] : vector<16x16xf32> to vector<16xf32>
    %126 = vector.shape_cast %125 : vector<16xf32> to vector<16x1xf32>
    %127 = vector.broadcast %126 : vector<16x1xf32> to vector<16x16xf32>
    %128 = arith.subf %124, %127 : vector<16x16xf32>
    %129 = math.exp %128 : vector<16x16xf32>
    %cst_46 = arith.constant dense<0.000000e+00> : vector<16xf32>
    %130 = vector.multi_reduction <add>, %129, %cst_46 [1] : vector<16x16xf32> to vector<16xf32>
    %131 = vector.shape_cast %130 : vector<16xf32> to vector<16x1xf32>
    %132 = tpu.reciprocal %131 {approx = true} : vector<16x1xf32> -> vector<16x1xf32>
    %133 = vector.broadcast %132 : vector<16x1xf32> to vector<16x16xf32>
    %134 = arith.mulf %129, %133 : vector<16x16xf32>
    %135 = arith.truncf %134 : vector<16x16xf32> to vector<16x16xbf16>
    %cst_47 = arith.constant dense<0.000000e+00> : vector<16x8xf32>
    %136 = tpu.matmul %135, %120, %cst_47 {dimension_numbers = #tpu.dot_dimension_numbers<[1], [0], [0], [1], [0, 0, 1, 1], [], []>} : vector<16x16xbf16>, vector<16x8xbf16>, vector<16x8xf32> -> vector<16x8xf32>
    %137 = vector.extract_strided_slice %17 {offsets = [0, 48], sizes = [16, 8], strides = [1, 1]} : vector<16x64xf32> to vector<16x8xf32>
    %138 = vector.extract_strided_slice %18 {offsets = [0, 48], sizes = [16, 8], strides = [1, 1]} : vector<16x64xf32> to vector<16x8xf32>
    %139 = vector.extract_strided_slice %22 {offsets = [0, 48], sizes = [16, 8], strides = [1, 1]} : vector<16x64xbf16> to vector<16x8xbf16>
    "tpu.trace_start"() <{level = 10 : i32, message = "qd,kd->qk"}> : () -> ()
    %cst_48 = arith.constant dense<0.000000e+00> : vector<16x16xf32>
    %140 = tpu.matmul %137, %138, %cst_48 {dimension_numbers = #tpu.dot_dimension_numbers<[1], [1], [0], [0], [0, 0, 1, 0], [], []>} : vector<16x8xf32>, vector<16x8xf32>, vector<16x16xf32> -> vector<16x16xf32>
    "tpu.trace_stop"() : () -> ()
    %cst_49 = arith.constant 0.353553385 : f32
    %141 = vector.broadcast %cst_49 : f32 to vector<16x16xf32>
    %142 = arith.mulf %140, %141 : vector<16x16xf32>
    %143 = arith.addf %142, %16 : vector<16x16xf32>
    %cst_50 = arith.constant dense<0xFF800000> : vector<16xf32>
    %144 = vector.multi_reduction <maximumf>, %143, %cst_50 [1] : vector<16x16xf32> to vector<16xf32>
    %145 = vector.shape_cast %144 : vector<16xf32> to vector<16x1xf32>
    %146 = vector.broadcast %145 : vector<16x1xf32> to vector<16x16xf32>
    %147 = arith.subf %143, %146 : vector<16x16xf32>
    %148 = math.exp %147 : vector<16x16xf32>
    %cst_51 = arith.constant dense<0.000000e+00> : vector<16xf32>
    %149 = vector.multi_reduction <add>, %148, %cst_51 [1] : vector<16x16xf32> to vector<16xf32>
    %150 = vector.shape_cast %149 : vector<16xf32> to vector<16x1xf32>
    %151 = tpu.reciprocal %150 {approx = true} : vector<16x1xf32> -> vector<16x1xf32>
    %152 = vector.broadcast %151 : vector<16x1xf32> to vector<16x16xf32>
    %153 = arith.mulf %148, %152 : vector<16x16xf32>
    %154 = arith.truncf %153 : vector<16x16xf32> to vector<16x16xbf16>
    %cst_52 = arith.constant dense<0.000000e+00> : vector<16x8xf32>
    %155 = tpu.matmul %154, %139, %cst_52 {dimension_numbers = #tpu.dot_dimension_numbers<[1], [0], [0], [1], [0, 0, 1, 1], [], []>} : vector<16x16xbf16>, vector<16x8xbf16>, vector<16x8xf32> -> vector<16x8xf32>
    %156 = vector.extract_strided_slice %17 {offsets = [0, 56], sizes = [16, 8], strides = [1, 1]} : vector<16x64xf32> to vector<16x8xf32>
    %157 = vector.extract_strided_slice %18 {offsets = [0, 56], sizes = [16, 8], strides = [1, 1]} : vector<16x64xf32> to vector<16x8xf32>
    %158 = vector.extract_strided_slice %22 {offsets = [0, 56], sizes = [16, 8], strides = [1, 1]} : vector<16x64xbf16> to vector<16x8xbf16>
    "tpu.trace_start"() <{level = 10 : i32, message = "qd,kd->qk"}> : () -> ()
    %cst_53 = arith.constant dense<0.000000e+00> : vector<16x16xf32>
    %159 = tpu.matmul %156, %157, %cst_53 {dimension_numbers = #tpu.dot_dimension_numbers<[1], [1], [0], [0], [0, 0, 1, 0], [], []>} : vector<16x8xf32>, vector<16x8xf32>, vector<16x16xf32> -> vector<16x16xf32>
    "tpu.trace_stop"() : () -> ()
    %cst_54 = arith.constant 0.353553385 : f32
    %160 = vector.broadcast %cst_54 : f32 to vector<16x16xf32>
    %161 = arith.mulf %159, %160 : vector<16x16xf32>
    %162 = arith.addf %161, %16 : vector<16x16xf32>
    %cst_55 = arith.constant dense<0xFF800000> : vector<16xf32>
    %163 = vector.multi_reduction <maximumf>, %162, %cst_55 [1] : vector<16x16xf32> to vector<16xf32>
    %164 = vector.shape_cast %163 : vector<16xf32> to vector<16x1xf32>
    %165 = vector.broadcast %164 : vector<16x1xf32> to vector<16x16xf32>
    %166 = arith.subf %162, %165 : vector<16x16xf32>
    %167 = math.exp %166 : vector<16x16xf32>
    %cst_56 = arith.constant dense<0.000000e+00> : vector<16xf32>
    %168 = vector.multi_reduction <add>, %167, %cst_56 [1] : vector<16x16xf32> to vector<16xf32>
    %169 = vector.shape_cast %168 : vector<16xf32> to vector<16x1xf32>
    %170 = tpu.reciprocal %169 {approx = true} : vector<16x1xf32> -> vector<16x1xf32>
    %171 = vector.broadcast %170 : vector<16x1xf32> to vector<16x16xf32>
    %172 = arith.mulf %167, %171 : vector<16x16xf32>
    %173 = arith.truncf %172 : vector<16x16xf32> to vector<16x16xbf16>
    %cst_57 = arith.constant dense<0.000000e+00> : vector<16x8xf32>
    %174 = tpu.matmul %173, %158, %cst_57 {dimension_numbers = #tpu.dot_dimension_numbers<[1], [0], [0], [1], [0, 0, 1, 1], [], []>} : vector<16x16xbf16>, vector<16x8xbf16>, vector<16x8xf32> -> vector<16x8xf32>
    %175 = tpu.concatenate %41, %60, %79, %98, %117, %136, %155, %174 in 1 : vector<16x8xf32>, vector<16x8xf32>, vector<16x8xf32>, vector<16x8xf32>, vector<16x8xf32>, vector<16x8xf32>, vector<16x8xf32>, vector<16x8xf32> -> vector<16x64xf32>
    %176 = arith.truncf %175 : vector<16x64xf32> to vector<16x64xbf16>
    %cst_58 = arith.constant dense<0.000000e+00> : vector<16x64xf32>
    %177 = tpu.matmul %176, %20, %cst_58 {dimension_numbers = #tpu.dot_dimension_numbers<[1], [0], [0], [1], [0, 0, 1, 1], [], []>} : vector<16x64xbf16>, vector<64x64xbf16>, vector<16x64xf32> -> vector<16x64xf32>
    %178 = vector.broadcast %21 : vector<1x64xf32> to vector<16x64xf32>
    %179 = arith.addf %177, %178 : vector<16x64xf32>
    %180 = arith.addf %1, %179 : vector<16x64xf32>
    %c0_59 = arith.constant 0 : index
    %c0_60 = arith.constant 0 : index
    %181 = vector.load %arg11[%c0_59, %c0_60] : memref<1x64xf32, #tpu.memory_space<vmem>>, vector<1x64xf32>
    %c0_61 = arith.constant 0 : index
    %c0_62 = arith.constant 0 : index
    %182 = vector.load %arg12[%c0_61, %c0_62] : memref<1x64xf32, #tpu.memory_space<vmem>>, vector<1x64xf32>
    %cst_63 = arith.constant dense<0.000000e+00> : vector<16xf32>
    %183 = vector.multi_reduction <add>, %180, %cst_63 [1] : vector<16x64xf32> to vector<16xf32>
    %184 = vector.shape_cast %183 : vector<16xf32> to vector<16x1xf32>
    %cst_64 = arith.constant 6.400000e+01 : f32
    %185 = vector.broadcast %cst_64 : f32 to vector<16x1xf32>
    %186 = arith.divf %184, %185 : vector<16x1xf32>
    %187 = vector.broadcast %186 : vector<16x1xf32> to vector<16x64xf32>
    %188 = arith.subf %180, %187 : vector<16x64xf32>
    %189 = arith.mulf %188, %188 : vector<16x64xf32>
    %cst_65 = arith.constant dense<0.000000e+00> : vector<16xf32>
    %190 = vector.multi_reduction <add>, %189, %cst_65 [1] : vector<16x64xf32> to vector<16xf32>
    %191 = vector.shape_cast %190 : vector<16xf32> to vector<16x1xf32>
    %cst_66 = arith.constant 6.400000e+01 : f32
    %192 = vector.broadcast %cst_66 : f32 to vector<16x1xf32>
    %193 = arith.divf %191, %192 : vector<16x1xf32>
    %194 = vector.broadcast %186 : vector<16x1xf32> to vector<16x64xf32>
    %195 = arith.subf %180, %194 : vector<16x64xf32>
    %cst_67 = arith.constant 9.99999974E-6 : f32
    %196 = vector.broadcast %cst_67 : f32 to vector<16x1xf32>
    %197 = arith.addf %193, %196 : vector<16x1xf32>
    %198 = math.rsqrt %197 : vector<16x1xf32>
    %199 = vector.broadcast %198 : vector<16x1xf32> to vector<16x64xf32>
    %200 = arith.mulf %195, %199 : vector<16x64xf32>
    %201 = vector.broadcast %181 : vector<1x64xf32> to vector<16x64xf32>
    %202 = arith.mulf %200, %201 : vector<16x64xf32>
    %203 = vector.broadcast %182 : vector<1x64xf32> to vector<16x64xf32>
    %204 = arith.addf %202, %203 : vector<16x64xf32>
    %205 = arith.addf %1, %204 : vector<16x64xf32>
    %c0_68 = arith.constant 0 : index
    %c0_69 = arith.constant 0 : index
    %206 = vector.load %arg13[%c0_68, %c0_69] : memref<1x64xf32, #tpu.memory_space<vmem>>, vector<1x64xf32>
    %c0_70 = arith.constant 0 : index
    %c0_71 = arith.constant 0 : index
    %207 = vector.load %arg14[%c0_70, %c0_71] : memref<1x64xf32, #tpu.memory_space<vmem>>, vector<1x64xf32>
    %cst_72 = arith.constant dense<0.000000e+00> : vector<16xf32>
    %208 = vector.multi_reduction <add>, %205, %cst_72 [1] : vector<16x64xf32> to vector<16xf32>
    %209 = vector.shape_cast %208 : vector<16xf32> to vector<16x1xf32>
    %cst_73 = arith.constant 6.400000e+01 : f32
    %210 = vector.broadcast %cst_73 : f32 to vector<16x1xf32>
    %211 = arith.divf %209, %210 : vector<16x1xf32>
    %212 = vector.broadcast %211 : vector<16x1xf32> to vector<16x64xf32>
    %213 = arith.subf %205, %212 : vector<16x64xf32>
    %214 = arith.mulf %213, %213 : vector<16x64xf32>
    %cst_74 = arith.constant dense<0.000000e+00> : vector<16xf32>
    %215 = vector.multi_reduction <add>, %214, %cst_74 [1] : vector<16x64xf32> to vector<16xf32>
    %216 = vector.shape_cast %215 : vector<16xf32> to vector<16x1xf32>
    %cst_75 = arith.constant 6.400000e+01 : f32
    %217 = vector.broadcast %cst_75 : f32 to vector<16x1xf32>
    %218 = arith.divf %216, %217 : vector<16x1xf32>
    %219 = vector.broadcast %211 : vector<16x1xf32> to vector<16x64xf32>
    %220 = arith.subf %205, %219 : vector<16x64xf32>
    %cst_76 = arith.constant 9.99999974E-6 : f32
    %221 = vector.broadcast %cst_76 : f32 to vector<16x1xf32>
    %222 = arith.addf %218, %221 : vector<16x1xf32>
    %223 = math.rsqrt %222 : vector<16x1xf32>
    %224 = vector.broadcast %223 : vector<16x1xf32> to vector<16x64xf32>
    %225 = arith.mulf %220, %224 : vector<16x64xf32>
    %226 = vector.broadcast %206 : vector<1x64xf32> to vector<16x64xf32>
    %227 = arith.mulf %225, %226 : vector<16x64xf32>
    %228 = vector.broadcast %207 : vector<1x64xf32> to vector<16x64xf32>
    %229 = arith.addf %227, %228 : vector<16x64xf32>
    %230 = vector.broadcast %3 : vector<16x1xf32> to vector<16x64xf32>
    %231 = arith.mulf %229, %230 : vector<16x64xf32>
    %c0_77 = arith.constant 0 : index
    %c0_78 = arith.constant 0 : index
    %c0_79 = arith.constant 0 : index
    %232 = vector.load %arg2[%c0_77, %c0_78, %c0_79] : memref<1x24x64xf32, #tpu.memory_space<vmem>>, vector<1x24x64xf32>
    %233 = vector.shape_cast %232 : vector<1x24x64xf32> to vector<24x64xf32>
    %c0_80 = arith.constant 0 : index
    %c0_81 = arith.constant 0 : index
    %c0_82 = arith.constant 0 : index
    %234 = vector.load %arg3[%c0_80, %c0_81, %c0_82] : memref<1x8x64xf32, #tpu.memory_space<vmem>>, vector<1x8x64xf32>
    %235 = vector.shape_cast %234 : vector<1x8x64xf32> to vector<8x64xf32>
    %236 = tpu.concatenate %233, %235 in 0 : vector<24x64xf32>, vector<8x64xf32> -> vector<32x64xf32>
    %237 = arith.truncf %231 : vector<16x64xf32> to vector<16x64xbf16>
    %c0_83 = arith.constant 0 : index
    %c0_84 = arith.constant 0 : index
    %238 = vector.load %arg15[%c0_83, %c0_84] : memref<64x64xbf16, #tpu.memory_space<vmem>>, vector<64x64xbf16>
    %cst_85 = arith.constant dense<0.000000e+00> : vector<16x64xf32>
    %239 = tpu.matmul %237, %238, %cst_85 {dimension_numbers = #tpu.dot_dimension_numbers<[1], [0], [0], [1], [0, 0, 1, 1], [], []>} : vector<16x64xbf16>, vector<64x64xbf16>, vector<16x64xf32> -> vector<16x64xf32>
    %c0_86 = arith.constant 0 : index
    %c0_87 = arith.constant 0 : index
    %240 = vector.load %arg16[%c0_86, %c0_87] : memref<1x64xf32, #tpu.memory_space<vmem>>, vector<1x64xf32>
    %241 = vector.broadcast %240 : vector<1x64xf32> to vector<16x64xf32>
    %242 = arith.addf %239, %241 : vector<16x64xf32>
    %243 = arith.truncf %236 : vector<32x64xf32> to vector<32x64xbf16>
    %c0_88 = arith.constant 0 : index
    %c0_89 = arith.constant 0 : index
    %244 = vector.load %arg17[%c0_88, %c0_89] : memref<64x128xbf16, #tpu.memory_space<vmem>>, vector<64x128xbf16>
    %cst_90 = arith.constant dense<0.000000e+00> : vector<32x128xf32>
    %245 = tpu.matmul %243, %244, %cst_90 {dimension_numbers = #tpu.dot_dimension_numbers<[1], [0], [0], [1], [0, 0, 1, 1], [], []>} : vector<32x64xbf16>, vector<64x128xbf16>, vector<32x128xf32> -> vector<32x128xf32>
    %c0_91 = arith.constant 0 : index
    %c0_92 = arith.constant 0 : index
    %246 = vector.load %arg18[%c0_91, %c0_92] : memref<1x128xf32, #tpu.memory_space<vmem>>, vector<1x128xf32>
    %247 = vector.broadcast %246 : vector<1x128xf32> to vector<32x128xf32>
    %248 = arith.addf %245, %247 : vector<32x128xf32>
    %c0_93 = arith.constant 0 : index
    %c0_94 = arith.constant 0 : index
    %c0_95 = arith.constant 0 : index
    %249 = vector.load %arg6[%c0_93, %c0_94, %c0_95] : memref<1x1x32xi32, #tpu.memory_space<vmem>>, vector<1x1x32xi32>
    %250 = vector.shape_cast %249 : vector<1x1x32xi32> to vector<1x32xi32>
    %c0_i32_96 = arith.constant 0 : i32
    %251 = vector.broadcast %c0_i32_96 : i32 to vector<1x32xi32>
    %252 = arith.cmpi ne, %250, %251 : vector<1x32xi32>
    %cst_97 = arith.constant -1.000000e+30 : f32
    %cst_98 = arith.constant 0.000000e+00 : f32
    %253 = vector.broadcast %cst_97 : f32 to vector<1x32xf32>
    %254 = vector.broadcast %cst_98 : f32 to vector<1x32xf32>
    %255 = arith.select %252, %253, %254 : vector<1x32xi1>, vector<1x32xf32>
    %256 = vector.extract_strided_slice %248 {offsets = [0, 0], sizes = [32, 64], strides = [1, 1]} : vector<32x128xf32> to vector<32x64xf32>
    %257 = vector.extract_strided_slice %248 {offsets = [0, 64], sizes = [32, 64], strides = [1, 1]} : vector<32x128xf32> to vector<32x64xf32>
    %c0_99 = arith.constant 0 : index
    %c0_100 = arith.constant 0 : index
    %258 = vector.load %arg19[%c0_99, %c0_100] : memref<64x64xbf16, #tpu.memory_space<vmem>>, vector<64x64xbf16>
    %c0_101 = arith.constant 0 : index
    %c0_102 = arith.constant 0 : index
    %259 = vector.load %arg20[%c0_101, %c0_102] : memref<1x64xf32, #tpu.memory_space<vmem>>, vector<1x64xf32>
    %260 = arith.truncf %257 : vector<32x64xf32> to vector<32x64xbf16>
    %261 = vector.extract_strided_slice %242 {offsets = [0, 0], sizes = [16, 8], strides = [1, 1]} : vector<16x64xf32> to vector<16x8xf32>
    %262 = vector.extract_strided_slice %256 {offsets = [0, 0], sizes = [32, 8], strides = [1, 1]} : vector<32x64xf32> to vector<32x8xf32>
    %263 = vector.extract_strided_slice %260 {offsets = [0, 0], sizes = [32, 8], strides = [1, 1]} : vector<32x64xbf16> to vector<32x8xbf16>
    "tpu.trace_start"() <{level = 10 : i32, message = "qd,kd->qk"}> : () -> ()
    %cst_103 = arith.constant dense<0.000000e+00> : vector<16x32xf32>
    %264 = tpu.matmul %261, %262, %cst_103 {dimension_numbers = #tpu.dot_dimension_numbers<[1], [1], [0], [0], [0, 0, 1, 0], [], []>} : vector<16x8xf32>, vector<32x8xf32>, vector<16x32xf32> -> vector<16x32xf32>
    "tpu.trace_stop"() : () -> ()
    %cst_104 = arith.constant 0.353553385 : f32
    %265 = vector.broadcast %cst_104 : f32 to vector<16x32xf32>
    %266 = arith.mulf %264, %265 : vector<16x32xf32>
    %267 = vector.broadcast %255 : vector<1x32xf32> to vector<16x32xf32>
    %268 = arith.addf %266, %267 : vector<16x32xf32>
    %cst_105 = arith.constant dense<0xFF800000> : vector<16xf32>
    %269 = vector.multi_reduction <maximumf>, %268, %cst_105 [1] : vector<16x32xf32> to vector<16xf32>
    %270 = vector.shape_cast %269 : vector<16xf32> to vector<16x1xf32>
    %271 = vector.broadcast %270 : vector<16x1xf32> to vector<16x32xf32>
    %272 = arith.subf %268, %271 : vector<16x32xf32>
    %273 = math.exp %272 : vector<16x32xf32>
    %cst_106 = arith.constant dense<0.000000e+00> : vector<16xf32>
    %274 = vector.multi_reduction <add>, %273, %cst_106 [1] : vector<16x32xf32> to vector<16xf32>
    %275 = vector.shape_cast %274 : vector<16xf32> to vector<16x1xf32>
    %276 = tpu.reciprocal %275 {approx = true} : vector<16x1xf32> -> vector<16x1xf32>
    %277 = vector.broadcast %276 : vector<16x1xf32> to vector<16x32xf32>
    %278 = arith.mulf %273, %277 : vector<16x32xf32>
    %279 = arith.truncf %278 : vector<16x32xf32> to vector<16x32xbf16>
    %cst_107 = arith.constant dense<0.000000e+00> : vector<16x8xf32>
    %280 = tpu.matmul %279, %263, %cst_107 {dimension_numbers = #tpu.dot_dimension_numbers<[1], [0], [0], [1], [0, 0, 1, 1], [], []>} : vector<16x32xbf16>, vector<32x8xbf16>, vector<16x8xf32> -> vector<16x8xf32>
    %281 = vector.extract_strided_slice %242 {offsets = [0, 8], sizes = [16, 8], strides = [1, 1]} : vector<16x64xf32> to vector<16x8xf32>
    %282 = vector.extract_strided_slice %256 {offsets = [0, 8], sizes = [32, 8], strides = [1, 1]} : vector<32x64xf32> to vector<32x8xf32>
    %283 = vector.extract_strided_slice %260 {offsets = [0, 8], sizes = [32, 8], strides = [1, 1]} : vector<32x64xbf16> to vector<32x8xbf16>
    "tpu.trace_start"() <{level = 10 : i32, message = "qd,kd->qk"}> : () -> ()
    %cst_108 = arith.constant dense<0.000000e+00> : vector<16x32xf32>
    %284 = tpu.matmul %281, %282, %cst_108 {dimension_numbers = #tpu.dot_dimension_numbers<[1], [1], [0], [0], [0, 0, 1, 0], [], []>} : vector<16x8xf32>, vector<32x8xf32>, vector<16x32xf32> -> vector<16x32xf32>
    "tpu.trace_stop"() : () -> ()
    %cst_109 = arith.constant 0.353553385 : f32
    %285 = vector.broadcast %cst_109 : f32 to vector<16x32xf32>
    %286 = arith.mulf %284, %285 : vector<16x32xf32>
    %287 = vector.broadcast %255 : vector<1x32xf32> to vector<16x32xf32>
    %288 = arith.addf %286, %287 : vector<16x32xf32>
    %cst_110 = arith.constant dense<0xFF800000> : vector<16xf32>
    %289 = vector.multi_reduction <maximumf>, %288, %cst_110 [1] : vector<16x32xf32> to vector<16xf32>
    %290 = vector.shape_cast %289 : vector<16xf32> to vector<16x1xf32>
    %291 = vector.broadcast %290 : vector<16x1xf32> to vector<16x32xf32>
    %292 = arith.subf %288, %291 : vector<16x32xf32>
    %293 = math.exp %292 : vector<16x32xf32>
    %cst_111 = arith.constant dense<0.000000e+00> : vector<16xf32>
    %294 = vector.multi_reduction <add>, %293, %cst_111 [1] : vector<16x32xf32> to vector<16xf32>
    %295 = vector.shape_cast %294 : vector<16xf32> to vector<16x1xf32>
    %296 = tpu.reciprocal %295 {approx = true} : vector<16x1xf32> -> vector<16x1xf32>
    %297 = vector.broadcast %296 : vector<16x1xf32> to vector<16x32xf32>
    %298 = arith.mulf %293, %297 : vector<16x32xf32>
    %299 = arith.truncf %298 : vector<16x32xf32> to vector<16x32xbf16>
    %cst_112 = arith.constant dense<0.000000e+00> : vector<16x8xf32>
    %300 = tpu.matmul %299, %283, %cst_112 {dimension_numbers = #tpu.dot_dimension_numbers<[1], [0], [0], [1], [0, 0, 1, 1], [], []>} : vector<16x32xbf16>, vector<32x8xbf16>, vector<16x8xf32> -> vector<16x8xf32>
    %301 = vector.extract_strided_slice %242 {offsets = [0, 16], sizes = [16, 8], strides = [1, 1]} : vector<16x64xf32> to vector<16x8xf32>
    %302 = vector.extract_strided_slice %256 {offsets = [0, 16], sizes = [32, 8], strides = [1, 1]} : vector<32x64xf32> to vector<32x8xf32>
    %303 = vector.extract_strided_slice %260 {offsets = [0, 16], sizes = [32, 8], strides = [1, 1]} : vector<32x64xbf16> to vector<32x8xbf16>
    "tpu.trace_start"() <{level = 10 : i32, message = "qd,kd->qk"}> : () -> ()
    %cst_113 = arith.constant dense<0.000000e+00> : vector<16x32xf32>
    %304 = tpu.matmul %301, %302, %cst_113 {dimension_numbers = #tpu.dot_dimension_numbers<[1], [1], [0], [0], [0, 0, 1, 0], [], []>} : vector<16x8xf32>, vector<32x8xf32>, vector<16x32xf32> -> vector<16x32xf32>
    "tpu.trace_stop"() : () -> ()
    %cst_114 = arith.constant 0.353553385 : f32
    %305 = vector.broadcast %cst_114 : f32 to vector<16x32xf32>
    %306 = arith.mulf %304, %305 : vector<16x32xf32>
    %307 = vector.broadcast %255 : vector<1x32xf32> to vector<16x32xf32>
    %308 = arith.addf %306, %307 : vector<16x32xf32>
    %cst_115 = arith.constant dense<0xFF800000> : vector<16xf32>
    %309 = vector.multi_reduction <maximumf>, %308, %cst_115 [1] : vector<16x32xf32> to vector<16xf32>
    %310 = vector.shape_cast %309 : vector<16xf32> to vector<16x1xf32>
    %311 = vector.broadcast %310 : vector<16x1xf32> to vector<16x32xf32>
    %312 = arith.subf %308, %311 : vector<16x32xf32>
    %313 = math.exp %312 : vector<16x32xf32>
    %cst_116 = arith.constant dense<0.000000e+00> : vector<16xf32>
    %314 = vector.multi_reduction <add>, %313, %cst_116 [1] : vector<16x32xf32> to vector<16xf32>
    %315 = vector.shape_cast %314 : vector<16xf32> to vector<16x1xf32>
    %316 = tpu.reciprocal %315 {approx = true} : vector<16x1xf32> -> vector<16x1xf32>
    %317 = vector.broadcast %316 : vector<16x1xf32> to vector<16x32xf32>
    %318 = arith.mulf %313, %317 : vector<16x32xf32>
    %319 = arith.truncf %318 : vector<16x32xf32> to vector<16x32xbf16>
    %cst_117 = arith.constant dense<0.000000e+00> : vector<16x8xf32>
    %320 = tpu.matmul %319, %303, %cst_117 {dimension_numbers = #tpu.dot_dimension_numbers<[1], [0], [0], [1], [0, 0, 1, 1], [], []>} : vector<16x32xbf16>, vector<32x8xbf16>, vector<16x8xf32> -> vector<16x8xf32>
    %321 = vector.extract_strided_slice %242 {offsets = [0, 24], sizes = [16, 8], strides = [1, 1]} : vector<16x64xf32> to vector<16x8xf32>
    %322 = vector.extract_strided_slice %256 {offsets = [0, 24], sizes = [32, 8], strides = [1, 1]} : vector<32x64xf32> to vector<32x8xf32>
    %323 = vector.extract_strided_slice %260 {offsets = [0, 24], sizes = [32, 8], strides = [1, 1]} : vector<32x64xbf16> to vector<32x8xbf16>
    "tpu.trace_start"() <{level = 10 : i32, message = "qd,kd->qk"}> : () -> ()
    %cst_118 = arith.constant dense<0.000000e+00> : vector<16x32xf32>
    %324 = tpu.matmul %321, %322, %cst_118 {dimension_numbers = #tpu.dot_dimension_numbers<[1], [1], [0], [0], [0, 0, 1, 0], [], []>} : vector<16x8xf32>, vector<32x8xf32>, vector<16x32xf32> -> vector<16x32xf32>
    "tpu.trace_stop"() : () -> ()
    %cst_119 = arith.constant 0.353553385 : f32
    %325 = vector.broadcast %cst_119 : f32 to vector<16x32xf32>
    %326 = arith.mulf %324, %325 : vector<16x32xf32>
    %327 = vector.broadcast %255 : vector<1x32xf32> to vector<16x32xf32>
    %328 = arith.addf %326, %327 : vector<16x32xf32>
    %cst_120 = arith.constant dense<0xFF800000> : vector<16xf32>
    %329 = vector.multi_reduction <maximumf>, %328, %cst_120 [1] : vector<16x32xf32> to vector<16xf32>
    %330 = vector.shape_cast %329 : vector<16xf32> to vector<16x1xf32>
    %331 = vector.broadcast %330 : vector<16x1xf32> to vector<16x32xf32>
    %332 = arith.subf %328, %331 : vector<16x32xf32>
    %333 = math.exp %332 : vector<16x32xf32>
    %cst_121 = arith.constant dense<0.000000e+00> : vector<16xf32>
    %334 = vector.multi_reduction <add>, %333, %cst_121 [1] : vector<16x32xf32> to vector<16xf32>
    %335 = vector.shape_cast %334 : vector<16xf32> to vector<16x1xf32>
    %336 = tpu.reciprocal %335 {approx = true} : vector<16x1xf32> -> vector<16x1xf32>
    %337 = vector.broadcast %336 : vector<16x1xf32> to vector<16x32xf32>
    %338 = arith.mulf %333, %337 : vector<16x32xf32>
    %339 = arith.truncf %338 : vector<16x32xf32> to vector<16x32xbf16>
    %cst_122 = arith.constant dense<0.000000e+00> : vector<16x8xf32>
    %340 = tpu.matmul %339, %323, %cst_122 {dimension_numbers = #tpu.dot_dimension_numbers<[1], [0], [0], [1], [0, 0, 1, 1], [], []>} : vector<16x32xbf16>, vector<32x8xbf16>, vector<16x8xf32> -> vector<16x8xf32>
    %341 = vector.extract_strided_slice %242 {offsets = [0, 32], sizes = [16, 8], strides = [1, 1]} : vector<16x64xf32> to vector<16x8xf32>
    %342 = vector.extract_strided_slice %256 {offsets = [0, 32], sizes = [32, 8], strides = [1, 1]} : vector<32x64xf32> to vector<32x8xf32>
    %343 = vector.extract_strided_slice %260 {offsets = [0, 32], sizes = [32, 8], strides = [1, 1]} : vector<32x64xbf16> to vector<32x8xbf16>
    "tpu.trace_start"() <{level = 10 : i32, message = "qd,kd->qk"}> : () -> ()
    %cst_123 = arith.constant dense<0.000000e+00> : vector<16x32xf32>
    %344 = tpu.matmul %341, %342, %cst_123 {dimension_numbers = #tpu.dot_dimension_numbers<[1], [1], [0], [0], [0, 0, 1, 0], [], []>} : vector<16x8xf32>, vector<32x8xf32>, vector<16x32xf32> -> vector<16x32xf32>
    "tpu.trace_stop"() : () -> ()
    %cst_124 = arith.constant 0.353553385 : f32
    %345 = vector.broadcast %cst_124 : f32 to vector<16x32xf32>
    %346 = arith.mulf %344, %345 : vector<16x32xf32>
    %347 = vector.broadcast %255 : vector<1x32xf32> to vector<16x32xf32>
    %348 = arith.addf %346, %347 : vector<16x32xf32>
    %cst_125 = arith.constant dense<0xFF800000> : vector<16xf32>
    %349 = vector.multi_reduction <maximumf>, %348, %cst_125 [1] : vector<16x32xf32> to vector<16xf32>
    %350 = vector.shape_cast %349 : vector<16xf32> to vector<16x1xf32>
    %351 = vector.broadcast %350 : vector<16x1xf32> to vector<16x32xf32>
    %352 = arith.subf %348, %351 : vector<16x32xf32>
    %353 = math.exp %352 : vector<16x32xf32>
    %cst_126 = arith.constant dense<0.000000e+00> : vector<16xf32>
    %354 = vector.multi_reduction <add>, %353, %cst_126 [1] : vector<16x32xf32> to vector<16xf32>
    %355 = vector.shape_cast %354 : vector<16xf32> to vector<16x1xf32>
    %356 = tpu.reciprocal %355 {approx = true} : vector<16x1xf32> -> vector<16x1xf32>
    %357 = vector.broadcast %356 : vector<16x1xf32> to vector<16x32xf32>
    %358 = arith.mulf %353, %357 : vector<16x32xf32>
    %359 = arith.truncf %358 : vector<16x32xf32> to vector<16x32xbf16>
    %cst_127 = arith.constant dense<0.000000e+00> : vector<16x8xf32>
    %360 = tpu.matmul %359, %343, %cst_127 {dimension_numbers = #tpu.dot_dimension_numbers<[1], [0], [0], [1], [0, 0, 1, 1], [], []>} : vector<16x32xbf16>, vector<32x8xbf16>, vector<16x8xf32> -> vector<16x8xf32>
    %361 = vector.extract_strided_slice %242 {offsets = [0, 40], sizes = [16, 8], strides = [1, 1]} : vector<16x64xf32> to vector<16x8xf32>
    %362 = vector.extract_strided_slice %256 {offsets = [0, 40], sizes = [32, 8], strides = [1, 1]} : vector<32x64xf32> to vector<32x8xf32>
    %363 = vector.extract_strided_slice %260 {offsets = [0, 40], sizes = [32, 8], strides = [1, 1]} : vector<32x64xbf16> to vector<32x8xbf16>
    "tpu.trace_start"() <{level = 10 : i32, message = "qd,kd->qk"}> : () -> ()
    %cst_128 = arith.constant dense<0.000000e+00> : vector<16x32xf32>
    %364 = tpu.matmul %361, %362, %cst_128 {dimension_numbers = #tpu.dot_dimension_numbers<[1], [1], [0], [0], [0, 0, 1, 0], [], []>} : vector<16x8xf32>, vector<32x8xf32>, vector<16x32xf32> -> vector<16x32xf32>
    "tpu.trace_stop"() : () -> ()
    %cst_129 = arith.constant 0.353553385 : f32
    %365 = vector.broadcast %cst_129 : f32 to vector<16x32xf32>
    %366 = arith.mulf %364, %365 : vector<16x32xf32>
    %367 = vector.broadcast %255 : vector<1x32xf32> to vector<16x32xf32>
    %368 = arith.addf %366, %367 : vector<16x32xf32>
    %cst_130 = arith.constant dense<0xFF800000> : vector<16xf32>
    %369 = vector.multi_reduction <maximumf>, %368, %cst_130 [1] : vector<16x32xf32> to vector<16xf32>
    %370 = vector.shape_cast %369 : vector<16xf32> to vector<16x1xf32>
    %371 = vector.broadcast %370 : vector<16x1xf32> to vector<16x32xf32>
    %372 = arith.subf %368, %371 : vector<16x32xf32>
    %373 = math.exp %372 : vector<16x32xf32>
    %cst_131 = arith.constant dense<0.000000e+00> : vector<16xf32>
    %374 = vector.multi_reduction <add>, %373, %cst_131 [1] : vector<16x32xf32> to vector<16xf32>
    %375 = vector.shape_cast %374 : vector<16xf32> to vector<16x1xf32>
    %376 = tpu.reciprocal %375 {approx = true} : vector<16x1xf32> -> vector<16x1xf32>
    %377 = vector.broadcast %376 : vector<16x1xf32> to vector<16x32xf32>
    %378 = arith.mulf %373, %377 : vector<16x32xf32>
    %379 = arith.truncf %378 : vector<16x32xf32> to vector<16x32xbf16>
    %cst_132 = arith.constant dense<0.000000e+00> : vector<16x8xf32>
    %380 = tpu.matmul %379, %363, %cst_132 {dimension_numbers = #tpu.dot_dimension_numbers<[1], [0], [0], [1], [0, 0, 1, 1], [], []>} : vector<16x32xbf16>, vector<32x8xbf16>, vector<16x8xf32> -> vector<16x8xf32>
    %381 = vector.extract_strided_slice %242 {offsets = [0, 48], sizes = [16, 8], strides = [1, 1]} : vector<16x64xf32> to vector<16x8xf32>
    %382 = vector.extract_strided_slice %256 {offsets = [0, 48], sizes = [32, 8], strides = [1, 1]} : vector<32x64xf32> to vector<32x8xf32>
    %383 = vector.extract_strided_slice %260 {offsets = [0, 48], sizes = [32, 8], strides = [1, 1]} : vector<32x64xbf16> to vector<32x8xbf16>
    "tpu.trace_start"() <{level = 10 : i32, message = "qd,kd->qk"}> : () -> ()
    %cst_133 = arith.constant dense<0.000000e+00> : vector<16x32xf32>
    %384 = tpu.matmul %381, %382, %cst_133 {dimension_numbers = #tpu.dot_dimension_numbers<[1], [1], [0], [0], [0, 0, 1, 0], [], []>} : vector<16x8xf32>, vector<32x8xf32>, vector<16x32xf32> -> vector<16x32xf32>
    "tpu.trace_stop"() : () -> ()
    %cst_134 = arith.constant 0.353553385 : f32
    %385 = vector.broadcast %cst_134 : f32 to vector<16x32xf32>
    %386 = arith.mulf %384, %385 : vector<16x32xf32>
    %387 = vector.broadcast %255 : vector<1x32xf32> to vector<16x32xf32>
    %388 = arith.addf %386, %387 : vector<16x32xf32>
    %cst_135 = arith.constant dense<0xFF800000> : vector<16xf32>
    %389 = vector.multi_reduction <maximumf>, %388, %cst_135 [1] : vector<16x32xf32> to vector<16xf32>
    %390 = vector.shape_cast %389 : vector<16xf32> to vector<16x1xf32>
    %391 = vector.broadcast %390 : vector<16x1xf32> to vector<16x32xf32>
    %392 = arith.subf %388, %391 : vector<16x32xf32>
    %393 = math.exp %392 : vector<16x32xf32>
    %cst_136 = arith.constant dense<0.000000e+00> : vector<16xf32>
    %394 = vector.multi_reduction <add>, %393, %cst_136 [1] : vector<16x32xf32> to vector<16xf32>
    %395 = vector.shape_cast %394 : vector<16xf32> to vector<16x1xf32>
    %396 = tpu.reciprocal %395 {approx = true} : vector<16x1xf32> -> vector<16x1xf32>
    %397 = vector.broadcast %396 : vector<16x1xf32> to vector<16x32xf32>
    %398 = arith.mulf %393, %397 : vector<16x32xf32>
    %399 = arith.truncf %398 : vector<16x32xf32> to vector<16x32xbf16>
    %cst_137 = arith.constant dense<0.000000e+00> : vector<16x8xf32>
    %400 = tpu.matmul %399, %383, %cst_137 {dimension_numbers = #tpu.dot_dimension_numbers<[1], [0], [0], [1], [0, 0, 1, 1], [], []>} : vector<16x32xbf16>, vector<32x8xbf16>, vector<16x8xf32> -> vector<16x8xf32>
    %401 = vector.extract_strided_slice %242 {offsets = [0, 56], sizes = [16, 8], strides = [1, 1]} : vector<16x64xf32> to vector<16x8xf32>
    %402 = vector.extract_strided_slice %256 {offsets = [0, 56], sizes = [32, 8], strides = [1, 1]} : vector<32x64xf32> to vector<32x8xf32>
    %403 = vector.extract_strided_slice %260 {offsets = [0, 56], sizes = [32, 8], strides = [1, 1]} : vector<32x64xbf16> to vector<32x8xbf16>
    "tpu.trace_start"() <{level = 10 : i32, message = "qd,kd->qk"}> : () -> ()
    %cst_138 = arith.constant dense<0.000000e+00> : vector<16x32xf32>
    %404 = tpu.matmul %401, %402, %cst_138 {dimension_numbers = #tpu.dot_dimension_numbers<[1], [1], [0], [0], [0, 0, 1, 0], [], []>} : vector<16x8xf32>, vector<32x8xf32>, vector<16x32xf32> -> vector<16x32xf32>
    "tpu.trace_stop"() : () -> ()
    %cst_139 = arith.constant 0.353553385 : f32
    %405 = vector.broadcast %cst_139 : f32 to vector<16x32xf32>
    %406 = arith.mulf %404, %405 : vector<16x32xf32>
    %407 = vector.broadcast %255 : vector<1x32xf32> to vector<16x32xf32>
    %408 = arith.addf %406, %407 : vector<16x32xf32>
    %cst_140 = arith.constant dense<0xFF800000> : vector<16xf32>
    %409 = vector.multi_reduction <maximumf>, %408, %cst_140 [1] : vector<16x32xf32> to vector<16xf32>
    %410 = vector.shape_cast %409 : vector<16xf32> to vector<16x1xf32>
    %411 = vector.broadcast %410 : vector<16x1xf32> to vector<16x32xf32>
    %412 = arith.subf %408, %411 : vector<16x32xf32>
    %413 = math.exp %412 : vector<16x32xf32>
    %cst_141 = arith.constant dense<0.000000e+00> : vector<16xf32>
    %414 = vector.multi_reduction <add>, %413, %cst_141 [1] : vector<16x32xf32> to vector<16xf32>
    %415 = vector.shape_cast %414 : vector<16xf32> to vector<16x1xf32>
    %416 = tpu.reciprocal %415 {approx = true} : vector<16x1xf32> -> vector<16x1xf32>
    %417 = vector.broadcast %416 : vector<16x1xf32> to vector<16x32xf32>
    %418 = arith.mulf %413, %417 : vector<16x32xf32>
    %419 = arith.truncf %418 : vector<16x32xf32> to vector<16x32xbf16>
    %cst_142 = arith.constant dense<0.000000e+00> : vector<16x8xf32>
    %420 = tpu.matmul %419, %403, %cst_142 {dimension_numbers = #tpu.dot_dimension_numbers<[1], [0], [0], [1], [0, 0, 1, 1], [], []>} : vector<16x32xbf16>, vector<32x8xbf16>, vector<16x8xf32> -> vector<16x8xf32>
    %421 = tpu.concatenate %280, %300, %320, %340, %360, %380, %400, %420 in 1 : vector<16x8xf32>, vector<16x8xf32>, vector<16x8xf32>, vector<16x8xf32>, vector<16x8xf32>, vector<16x8xf32>, vector<16x8xf32>, vector<16x8xf32> -> vector<16x64xf32>
    %422 = arith.truncf %421 : vector<16x64xf32> to vector<16x64xbf16>
    %cst_143 = arith.constant dense<0.000000e+00> : vector<16x64xf32>
    %423 = tpu.matmul %422, %258, %cst_143 {dimension_numbers = #tpu.dot_dimension_numbers<[1], [0], [0], [1], [0, 0, 1, 1], [], []>} : vector<16x64xbf16>, vector<64x64xbf16>, vector<16x64xf32> -> vector<16x64xf32>
    %424 = vector.broadcast %259 : vector<1x64xf32> to vector<16x64xf32>
    %425 = arith.addf %423, %424 : vector<16x64xf32>
    %426 = arith.addf %231, %425 : vector<16x64xf32>
    %c0_144 = arith.constant 0 : index
    %c0_145 = arith.constant 0 : index
    %427 = vector.load %arg21[%c0_144, %c0_145] : memref<1x64xf32, #tpu.memory_space<vmem>>, vector<1x64xf32>
    %c0_146 = arith.constant 0 : index
    %c0_147 = arith.constant 0 : index
    %428 = vector.load %arg22[%c0_146, %c0_147] : memref<1x64xf32, #tpu.memory_space<vmem>>, vector<1x64xf32>
    %cst_148 = arith.constant dense<0.000000e+00> : vector<16xf32>
    %429 = vector.multi_reduction <add>, %426, %cst_148 [1] : vector<16x64xf32> to vector<16xf32>
    %430 = vector.shape_cast %429 : vector<16xf32> to vector<16x1xf32>
    %cst_149 = arith.constant 6.400000e+01 : f32
    %431 = vector.broadcast %cst_149 : f32 to vector<16x1xf32>
    %432 = arith.divf %430, %431 : vector<16x1xf32>
    %433 = vector.broadcast %432 : vector<16x1xf32> to vector<16x64xf32>
    %434 = arith.subf %426, %433 : vector<16x64xf32>
    %435 = arith.mulf %434, %434 : vector<16x64xf32>
    %cst_150 = arith.constant dense<0.000000e+00> : vector<16xf32>
    %436 = vector.multi_reduction <add>, %435, %cst_150 [1] : vector<16x64xf32> to vector<16xf32>
    %437 = vector.shape_cast %436 : vector<16xf32> to vector<16x1xf32>
    %cst_151 = arith.constant 6.400000e+01 : f32
    %438 = vector.broadcast %cst_151 : f32 to vector<16x1xf32>
    %439 = arith.divf %437, %438 : vector<16x1xf32>
    %440 = vector.broadcast %432 : vector<16x1xf32> to vector<16x64xf32>
    %441 = arith.subf %426, %440 : vector<16x64xf32>
    %cst_152 = arith.constant 9.99999974E-6 : f32
    %442 = vector.broadcast %cst_152 : f32 to vector<16x1xf32>
    %443 = arith.addf %439, %442 : vector<16x1xf32>
    %444 = math.rsqrt %443 : vector<16x1xf32>
    %445 = vector.broadcast %444 : vector<16x1xf32> to vector<16x64xf32>
    %446 = arith.mulf %441, %445 : vector<16x64xf32>
    %447 = vector.broadcast %427 : vector<1x64xf32> to vector<16x64xf32>
    %448 = arith.mulf %446, %447 : vector<16x64xf32>
    %449 = vector.broadcast %428 : vector<1x64xf32> to vector<16x64xf32>
    %450 = arith.addf %448, %449 : vector<16x64xf32>
    %451 = arith.addf %231, %450 : vector<16x64xf32>
    %c0_153 = arith.constant 0 : index
    %c0_154 = arith.constant 0 : index
    %452 = vector.load %arg23[%c0_153, %c0_154] : memref<1x64xf32, #tpu.memory_space<vmem>>, vector<1x64xf32>
    %c0_155 = arith.constant 0 : index
    %c0_156 = arith.constant 0 : index
    %453 = vector.load %arg24[%c0_155, %c0_156] : memref<1x64xf32, #tpu.memory_space<vmem>>, vector<1x64xf32>
    %cst_157 = arith.constant dense<0.000000e+00> : vector<16xf32>
    %454 = vector.multi_reduction <add>, %451, %cst_157 [1] : vector<16x64xf32> to vector<16xf32>
    %455 = vector.shape_cast %454 : vector<16xf32> to vector<16x1xf32>
    %cst_158 = arith.constant 6.400000e+01 : f32
    %456 = vector.broadcast %cst_158 : f32 to vector<16x1xf32>
    %457 = arith.divf %455, %456 : vector<16x1xf32>
    %458 = vector.broadcast %457 : vector<16x1xf32> to vector<16x64xf32>
    %459 = arith.subf %451, %458 : vector<16x64xf32>
    %460 = arith.mulf %459, %459 : vector<16x64xf32>
    %cst_159 = arith.constant dense<0.000000e+00> : vector<16xf32>
    %461 = vector.multi_reduction <add>, %460, %cst_159 [1] : vector<16x64xf32> to vector<16xf32>
    %462 = vector.shape_cast %461 : vector<16xf32> to vector<16x1xf32>
    %cst_160 = arith.constant 6.400000e+01 : f32
    %463 = vector.broadcast %cst_160 : f32 to vector<16x1xf32>
    %464 = arith.divf %462, %463 : vector<16x1xf32>
    %465 = vector.broadcast %457 : vector<16x1xf32> to vector<16x64xf32>
    %466 = arith.subf %451, %465 : vector<16x64xf32>
    %cst_161 = arith.constant 9.99999974E-6 : f32
    %467 = vector.broadcast %cst_161 : f32 to vector<16x1xf32>
    %468 = arith.addf %464, %467 : vector<16x1xf32>
    %469 = math.rsqrt %468 : vector<16x1xf32>
    %470 = vector.broadcast %469 : vector<16x1xf32> to vector<16x64xf32>
    %471 = arith.mulf %466, %470 : vector<16x64xf32>
    %472 = vector.broadcast %452 : vector<1x64xf32> to vector<16x64xf32>
    %473 = arith.mulf %471, %472 : vector<16x64xf32>
    %474 = vector.broadcast %453 : vector<1x64xf32> to vector<16x64xf32>
    %475 = arith.addf %473, %474 : vector<16x64xf32>
    %476 = vector.broadcast %3 : vector<16x1xf32> to vector<16x64xf32>
    %477 = arith.mulf %475, %476 : vector<16x64xf32>
    %478 = arith.truncf %477 : vector<16x64xf32> to vector<16x64xbf16>
    %c0_162 = arith.constant 0 : index
    %c0_163 = arith.constant 0 : index
    %479 = vector.load %arg25[%c0_162, %c0_163] : memref<64x128xbf16, #tpu.memory_space<vmem>>, vector<64x128xbf16>
    %cst_164 = arith.constant dense<0.000000e+00> : vector<16x128xf32>
    %480 = tpu.matmul %478, %479, %cst_164 {dimension_numbers = #tpu.dot_dimension_numbers<[1], [0], [0], [1], [0, 0, 1, 1], [], []>} : vector<16x64xbf16>, vector<64x128xbf16>, vector<16x128xf32> -> vector<16x128xf32>
    %c0_165 = arith.constant 0 : index
    %c0_166 = arith.constant 0 : index
    %481 = vector.load %arg26[%c0_165, %c0_166] : memref<1x128xf32, #tpu.memory_space<vmem>>, vector<1x128xf32>
    %482 = vector.broadcast %481 : vector<1x128xf32> to vector<16x128xf32>
    %483 = arith.addf %480, %482 : vector<16x128xf32>
    %cst_167 = arith.constant 0.000000e+00 : f32
    %484 = vector.broadcast %cst_167 : f32 to vector<16x128xf32>
    %485 = arith.maximumf %483, %484 : vector<16x128xf32>
    %486 = arith.truncf %485 : vector<16x128xf32> to vector<16x128xbf16>
    %c0_168 = arith.constant 0 : index
    %c0_169 = arith.constant 0 : index
    %487 = vector.load %arg27[%c0_168, %c0_169] : memref<128x64xbf16, #tpu.memory_space<vmem>>, vector<128x64xbf16>
    %cst_170 = arith.constant dense<0.000000e+00> : vector<16x64xf32>
    %488 = tpu.matmul %486, %487, %cst_170 {dimension_numbers = #tpu.dot_dimension_numbers<[1], [0], [0], [1], [0, 0, 1, 1], [], []>} : vector<16x128xbf16>, vector<128x64xbf16>, vector<16x64xf32> -> vector<16x64xf32>
    %c0_171 = arith.constant 0 : index
    %c0_172 = arith.constant 0 : index
    %489 = vector.load %arg28[%c0_171, %c0_172] : memref<1x64xf32, #tpu.memory_space<vmem>>, vector<1x64xf32>
    %490 = vector.broadcast %489 : vector<1x64xf32> to vector<16x64xf32>
    %491 = arith.addf %488, %490 : vector<16x64xf32>
    %492 = arith.addf %477, %491 : vector<16x64xf32>
    %c0_173 = arith.constant 0 : index
    %c0_174 = arith.constant 0 : index
    %493 = vector.load %arg29[%c0_173, %c0_174] : memref<1x64xf32, #tpu.memory_space<vmem>>, vector<1x64xf32>
    %c0_175 = arith.constant 0 : index
    %c0_176 = arith.constant 0 : index
    %494 = vector.load %arg30[%c0_175, %c0_176] : memref<1x64xf32, #tpu.memory_space<vmem>>, vector<1x64xf32>
    %cst_177 = arith.constant dense<0.000000e+00> : vector<16xf32>
    %495 = vector.multi_reduction <add>, %492, %cst_177 [1] : vector<16x64xf32> to vector<16xf32>
    %496 = vector.shape_cast %495 : vector<16xf32> to vector<16x1xf32>
    %cst_178 = arith.constant 6.400000e+01 : f32
    %497 = vector.broadcast %cst_178 : f32 to vector<16x1xf32>
    %498 = arith.divf %496, %497 : vector<16x1xf32>
    %499 = vector.broadcast %498 : vector<16x1xf32> to vector<16x64xf32>
    %500 = arith.subf %492, %499 : vector<16x64xf32>
    %501 = arith.mulf %500, %500 : vector<16x64xf32>
    %cst_179 = arith.constant dense<0.000000e+00> : vector<16xf32>
    %502 = vector.multi_reduction <add>, %501, %cst_179 [1] : vector<16x64xf32> to vector<16xf32>
    %503 = vector.shape_cast %502 : vector<16xf32> to vector<16x1xf32>
    %cst_180 = arith.constant 6.400000e+01 : f32
    %504 = vector.broadcast %cst_180 : f32 to vector<16x1xf32>
    %505 = arith.divf %503, %504 : vector<16x1xf32>
    %506 = vector.broadcast %498 : vector<16x1xf32> to vector<16x64xf32>
    %507 = arith.subf %492, %506 : vector<16x64xf32>
    %cst_181 = arith.constant 9.99999974E-6 : f32
    %508 = vector.broadcast %cst_181 : f32 to vector<16x1xf32>
    %509 = arith.addf %505, %508 : vector<16x1xf32>
    %510 = math.rsqrt %509 : vector<16x1xf32>
    %511 = vector.broadcast %510 : vector<16x1xf32> to vector<16x64xf32>
    %512 = arith.mulf %507, %511 : vector<16x64xf32>
    %513 = vector.broadcast %493 : vector<1x64xf32> to vector<16x64xf32>
    %514 = arith.mulf %512, %513 : vector<16x64xf32>
    %515 = vector.broadcast %494 : vector<1x64xf32> to vector<16x64xf32>
    %516 = arith.addf %514, %515 : vector<16x64xf32>
    %517 = vector.broadcast %3 : vector<16x1xf32> to vector<16x64xf32>
    %518 = arith.mulf %516, %517 : vector<16x64xf32>
    %c0_182 = arith.constant 0 : index
    %c0_183 = arith.constant 0 : index
    %c0_184 = arith.constant 0 : index
    %519 = vector.load %arg31[%c0_182, %c0_183, %c0_184] : memref<1x16x64xf32, #tpu.memory_space<vmem>>, vector<1x16x64xf32>
    %520 = vector.shape_cast %519 : vector<1x16x64xf32> to vector<16x64xf32>
    %521 = vector.shape_cast %518 : vector<16x64xf32> to vector<1x16x64xf32>
    tpu.vector_store %arg31[%c0_182, %c0_183, %c0_184], %521 {strides = array<i32>} : memref<1x16x64xf32, #tpu.memory_space<vmem>>, vector<1x16x64xf32>,
    return
  }
  func.func @transform_0(%arg0: i32) -> (i32, i32, i32) {
    %c0_i32 = arith.constant 0 : i32
    %c0_i32_0 = arith.constant 0 : i32
    %c0_i32_1 = arith.constant 0 : i32
    return %arg0, %c0_i32, %c0_i32_0 : i32, i32, i32
  }
  func.func @transform_1(%arg0: i32) -> (i32, i32, i32) {
    %c0_i32 = arith.constant 0 : i32
    %c0_i32_0 = arith.constant 0 : i32
    %c0_i32_1 = arith.constant 0 : i32
    return %arg0, %c0_i32, %c0_i32_0 : i32, i32, i32
  }
  func.func @transform_2(%arg0: i32) -> (i32, i32, i32) {
    %c0_i32 = arith.constant 0 : i32
    %c0_i32_0 = arith.constant 0 : i32
    %c0_i32_1 = arith.constant 0 : i32
    return %arg0, %c0_i32, %c0_i32_0 : i32, i32, i32
  }
  func.func @transform_3(%arg0: i32) -> (i32, i32, i32) {
    %c0_i32 = arith.constant 0 : i32
    %c0_i32_0 = arith.constant 0 : i32
    %c0_i32_1 = arith.constant 0 : i32
    return %arg0, %c0_i32, %c0_i32_0 : i32, i32, i32
  }
  func.func @transform_4(%arg0: i32) -> (i32, i32, i32) {
    %c0_i32 = arith.constant 0 : i32
    %c0_i32_0 = arith.constant 0 : i32
    %c0_i32_1 = arith.constant 0 : i32
    return %arg0, %c0_i32, %c0_i32_0 : i32, i32, i32
  }
  func.func @transform_5(%arg0: i32) -> (i32, i32, i32) {
    %c0_i32 = arith.constant 0 : i32
    %c0_i32_0 = arith.constant 0 : i32
    %c0_i32_1 = arith.constant 0 : i32
    return %arg0, %c0_i32, %c0_i32_0 : i32, i32, i32
  }
  func.func @transform_6(%arg0: i32) -> (i32, i32) {
    %c0_i32 = arith.constant 0 : i32
    %c0_i32_0 = arith.constant 0 : i32
    %c0_i32_1 = arith.constant 0 : i32
    return %c0_i32, %c0_i32_0 : i32, i32
  }
  func.func @transform_7(%arg0: i32) -> (i32, i32) {
    %c0_i32 = arith.constant 0 : i32
    %c0_i32_0 = arith.constant 0 : i32
    %c0_i32_1 = arith.constant 0 : i32
    return %c0_i32, %c0_i32_0 : i32, i32
  }
  func.func @transform_8(%arg0: i32) -> (i32, i32) {
    %c0_i32 = arith.constant 0 : i32
    %c0_i32_0 = arith.constant 0 : i32
    %c0_i32_1 = arith.constant 0 : i32
    return %c0_i32, %c0_i32_0 : i32, i32
  }
  func.func @transform_9(%arg0: i32) -> (i32, i32) {
    %c0_i32 = arith.constant 0 : i32
    %c0_i32_0 = arith.constant 0 : i32
    %c0_i32_1 = arith.constant 0 : i32
    return %c0_i32, %c0_i32_0 : i32, i32
  }
  func.func @transform_10(%arg0: i32) -> (i32, i32) {
    %c0_i32 = arith.constant 0 : i32
    %c0_i32_0 = arith.constant 0 : i32
    %c0_i32_1 = arith.constant 0 : i32
    return %c0_i32, %c0_i32_0 : i32, i32
  }
  func.func @transform_11(%arg0: i32) -> (i32, i32) {
    %c0_i32 = arith.constant 0 : i32
    %c0_i32_0 = arith.constant 0 : i32
    %c0_i32_1 = arith.constant 0 : i32
    return %c0_i32, %c0_i32_0 : i32, i32
  }
  func.func @transform_12(%arg0: i32) -> (i32, i32) {
    %c0_i32 = arith.constant 0 : i32
    %c0_i32_0 = arith.constant 0 : i32
    %c0_i32_1 = arith.constant 0 : i32
    return %c0_i32, %c0_i32_0 : i32, i32
  }
  func.func @transform_13(%arg0: i32) -> (i32, i32) {
    %c0_i32 = arith.constant 0 : i32
    %c0_i32_0 = arith.constant 0 : i32
    %c0_i32_1 = arith.constant 0 : i32
    return %c0_i32, %c0_i32_0 : i32, i32
  }
  func.func @transform_14(%arg0: i32) -> (i32, i32) {
    %c0_i32 = arith.constant 0 : i32
    %c0_i32_0 = arith.constant 0 : i32
    %c0_i32_1 = arith.constant 0 : i32
    return %c0_i32, %c0_i32_0 : i32, i32
  }
  func.func @transform_15(%arg0: i32) -> (i32, i32) {
    %c0_i32 = arith.constant 0 : i32
    %c0_i32_0 = arith.constant 0 : i32
    %c0_i32_1 = arith.constant 0 : i32
    return %c0_i32, %c0_i32_0 : i32, i32
  }
  func.func @transform_16(%arg0: i32) -> (i32, i32) {
    %c0_i32 = arith.constant 0 : i32
    %c0_i32_0 = arith.constant 0 : i32
    %c0_i32_1 = arith.constant 0 : i32
    return %c0_i32, %c0_i32_0 : i32, i32
  }
  func.func @transform_17(%arg0: i32) -> (i32, i32) {
    %c0_i32 = arith.constant 0 : i32
    %c0_i32_0 = arith.constant 0 : i32
    %c0_i32_1 = arith.constant 0 : i32
    return %c0_i32, %c0_i32_0 : i32, i32
  }
  func.func @transform_18(%arg0: i32) -> (i32, i32) {
    %c0_i32 = arith.constant 0 : i32
    %c0_i32_0 = arith.constant 0 : i32
    %c0_i32_1 = arith.constant 0 : i32
    return %c0_i32, %c0_i32_0 : i32, i32
  }
  func.func @transform_19(%arg0: i32) -> (i32, i32) {
    %c0_i32 = arith.constant 0 : i32
    %c0_i32_0 = arith.constant 0 : i32
    %c0_i32_1 = arith.constant 0 : i32
    return %c0_i32, %c0_i32_0 : i32, i32
  }
  func.func @transform_20(%arg0: i32) -> (i32, i32) {
    %c0_i32 = arith.constant 0 : i32
    %c0_i32_0 = arith.constant 0 : i32
    %c0_i32_1 = arith.constant 0 : i32
    return %c0_i32, %c0_i32_0 : i32, i32
  }
  func.func @transform_21(%arg0: i32) -> (i32, i32) {
    %c0_i32 = arith.constant 0 : i32
    %c0_i32_0 = arith.constant 0 : i32
    %c0_i32_1 = arith.constant 0 : i32
    return %c0_i32, %c0_i32_0 : i32, i32
  }
  func.func @transform_22(%arg0: i32) -> (i32, i32) {
    %c0_i32 = arith.constant 0 : i32
    %c0_i32_0 = arith.constant 0 : i32
    %c0_i32_1 = arith.constant 0 : i32
    return %c0_i32, %c0_i32_0 : i32, i32
  }
  func.func @transform_23(%arg0: i32) -> (i32, i32) {
    %c0_i32 = arith.constant 0 : i32
    %c0_i32_0 = arith.constant 0 : i32
    %c0_i32_1 = arith.constant 0 : i32
    return %c0_i32, %c0_i32_0 : i32, i32
  }
  func.func @transform_24(%arg0: i32) -> (i32, i32) {
    %c0_i32 = arith.constant 0 : i32
    %c0_i32_0 = arith.constant 0 : i32
    %c0_i32_1 = arith.constant 0 : i32
    return %c0_i32, %c0_i32_0 : i32, i32
  }
  func.func @transform_25(%arg0: i32) -> (i32, i32) {
    %c0_i32 = arith.constant 0 : i32
    %c0_i32_0 = arith.constant 0 : i32
    %c0_i32_1 = arith.constant 0 : i32
    return %c0_i32, %c0_i32_0 : i32, i32
  }
  func.func @transform_26(%arg0: i32) -> (i32, i32) {
    %c0_i32 = arith.constant 0 : i32
    %c0_i32_0 = arith.constant 0 : i32
    %c0_i32_1 = arith.constant 0 : i32
    return %c0_i32, %c0_i32_0 : i32, i32
  }
  func.func @transform_27(%arg0: i32) -> (i32, i32) {
    %c0_i32 = arith.constant 0 : i32
    %c0_i32_0 = arith.constant 0 : i32
    %c0_i32_1 = arith.constant 0 : i32
    return %c0_i32, %c0_i32_0 : i32, i32
  }
  func.func @transform_28(%arg0: i32) -> (i32, i32) {
    %c0_i32 = arith.constant 0 : i32
    %c0_i32_0 = arith.constant 0 : i32
    %c0_i32_1 = arith.constant 0 : i32
    return %c0_i32, %c0_i32_0 : i32, i32
  }
  func.func @transform_29(%arg0: i32) -> (i32, i32) {
    %c0_i32 = arith.constant 0 : i32
    %c0_i32_0 = arith.constant 0 : i32
    %c0_i32_1 = arith.constant 0 : i32
    return %c0_i32, %c0_i32_0 : i32, i32
  }
  func.func @transform_30(%arg0: i32) -> (i32, i32, i32) {
    %c0_i32 = arith.constant 0 : i32
    %c0_i32_0 = arith.constant 0 : i32
    %c0_i32_1 = arith.constant 0 : i32
    return %arg0, %c0_i32, %c0_i32_0 : i32, i32, i32
  }
}

</mosaic_0001>

<bundles_post_ra>
// kernel: tpu_custom_call.1
= control target key start
LH: loop header
LB: loop body
LE: loop exit
PB: predicated region body
PF: predicated region fallthrough
CT: control target
= control target key end

     0   :  { %s7441_s6 = smov 1   ;;  %s7442_s10 = smov 2   ;;  %s8997_s0 = inlined_call_operand.smem [shape: u32[31], index: -1, kind: input, shape index: {}] }
   0x1   :  { %s7520_s5 = sld [smem:[%s8997_s0]]   ;;  %s7443_s14 = smov 3  }
   0x2   :  { %s7525_s9 = sld [smem:[%s8997_s0 + %s7441_s6]]   ;;  %s7444_s18 = smov 4  }
   0x3   :  { %s7530_s13 = sld [smem:[%s8997_s0 + %s7442_s10]]   ;;  %s7445_s22 = smov 5  }
   0x4   :  { %s7535_s17 = sld [smem:[%s8997_s0 + %s7443_s14]]   ;;  %s7446_s26 = smov 6  }
   0x5   :  { %s7540_s21 = sld [smem:[%s8997_s0 + %s7444_s18]]   ;;  %s7447_s30 = smov 7  }
   0x6   :  { %s7545_s25 = sld [smem:[%s8997_s0 + %s7445_s22]]   ;;  %s7448_s4 = smov 8  }
   0x7   :  { %9054 = sst [smem:[#allocation41_spill]] %s7520_s5  ;;  %s7449_s10 = smov 9  }
   0x8   :  { %9055 = sst [smem:[#allocation42_spill]] %s7525_s9  ;;  %s7450_s15 = smov 10  }
   0x9   :  { %9056 = sst [smem:[#allocation43_spill]] %s7530_s13  ;;  %s7451_s20 = smov 11  }
   0xa   :  { %9057 = sst [smem:[#allocation44_spill]] %s7535_s17  ;;  %s7453_s1 = smov 13  }
   0xb   :  { %9058 = sst [smem:[#allocation45_spill]] %s7540_s21  ;;  %s7454_s7 = smov 14  }
   0xc   :  { %9059 = sst [smem:[#allocation46_spill]] %s7545_s25  ;;  %s7456_s22 = smov 16  }
   0xd   :  { %s7550_s29 = sld [smem:[%s8997_s0 + %s7446_s26]]   ;;  %s7452_s26 = smov 12  }
   0xe   :  { %s7555_s3 = sld [smem:[%s8997_s0 + %s7447_s30]]   ;;  %s7457_s28 = smov 17  }
   0xf   :  { %s7560_s8 = sld [smem:[%s8997_s0 + %s7448_s4]]  }
  0x10   :  { %s7565_s14 = sld [smem:[%s8997_s0 + %s7449_s10]]  }
  0x11   :  { %s7570_s19 = sld [smem:[%s8997_s0 + %s7450_s15]]   ;;  %s7455_s15 = smov 15  }
  0x12   :  { %s7575_s24 = sld [smem:[%s8997_s0 + %s7451_s20]]  }
  0x13   :  { %9060 = sst [smem:[#allocation47_spill]] %s7550_s29 }
  0x14   :  { %9061 = sst [smem:[#allocation48_spill]] %s7555_s3 }
  0x15   :  { %9062 = sst [smem:[#allocation49_spill]] %s7560_s8 }
  0x16   :  { %9063 = sst [smem:[#allocation50_spill]] %s7565_s14 }
  0x17   :  { %s7580_s30 = sld [smem:[%s8997_s0 + %s7452_s26]]  }
  0x18   :  { %9064 = sst [smem:[#allocation51_spill]] %s7575_s24 }
  0x19   :  { %s7585_s6 = sld [smem:[%s8997_s0 + %s7453_s1]]  }
  0x1a   :  { %s7590_s12 = sld [smem:[%s8997_s0 + %s7454_s7]]   ;;  %s7458_s7 = smov 18  }
  0x1b   :  { %s7595_s20 = sld [smem:[%s8997_s0 + %s7455_s15]]   ;;  %s7459_s15 = smov 19  }
  0x1c   :  { %s7600_s27 = sld [smem:[%s8997_s0 + %s7456_s22]]   ;;  %s7460_s22 = smov 20  }
  0x1d   :  { %s7605_s4 = sld [smem:[%s8997_s0 + %s7457_s28]]   ;;  %s7461_s28 = smov 21  }
  0x1e   :  { %s7615_s17 = sld [smem:[%s8997_s0 + %s7459_s15]]   ;;  %s7463_s15 = smov 23  }
  0x1f   :  { %9065 = sst [smem:[#allocation52_spill]] %s7585_s6 }
  0x20   :  { %9066 = sst [smem:[#allocation53_spill]] %s7590_s12 }
  0x21   :  { %s7610_s12 = sld [smem:[%s8997_s0 + %s7458_s7]]   ;;  %s7462_s7 = smov 22  }
  0x22   :  { %9067 = sst [smem:[#allocation54_spill]] %s7600_s27 }
  0x23   :  { %9068 = sst [smem:[#allocation55_spill]] %s7605_s4 }
  0x24   :  { %9070 = sst [smem:[#allocation57_spill]] %s7615_s17 }
  0x25   :  { %s7620_s9 = sld [smem:[%s8997_s0 + %s7460_s22]]   ;;  %s7464_s22 = smov 24  }
  0x26   :  { %s7625_s14 = sld [smem:[%s8997_s0 + %s7461_s28]]   ;;  %s7465_s28 = smov 25  }
  0x27   :  { %9069 = sst [smem:[#allocation56_spill]] %s7610_s12 }
  0x28   :  { %s7630_s29 = sld [smem:[%s8997_s0 + %s7462_s7]]   ;;  %s7466_s7 = smov 26  }
  0x29   :  { %s7635_s25 = sld [smem:[%s8997_s0 + %s7463_s15]]   ;;  %s7467_s15 = smov 27  }
  0x2a   :  { %s7640_s21 = sld [smem:[%s8997_s0 + %s7464_s22]]   ;;  %s7468_s22 = smov 28  }
  0x2b   :  { %9071 = sst [smem:[#allocation58_spill]] %s7620_s9 }
  0x2c   :  { %9072 = sst [smem:[#allocation59_spill]] %s7625_s14 }
  0x2d   :  { %s7645_s5 = sld [smem:[%s8997_s0 + %s7465_s28]]   ;;  %s7469_s28 = smov 29  }
  0x2e   :  { %9073 = sst [smem:[#allocation60_spill]] %s7630_s29 }
  0x2f   :  { %9074 = sst [smem:[#allocation61_spill]] %s7635_s25 }
  0x30   :  { %9075 = sst [smem:[#allocation62_spill]] %s7640_s21 }
  0x31   :  { %s7650_s29 = sld [smem:[%s8997_s0 + %s7466_s7]]   ;;  %s7470_s7 = smov 30  }
  0x32   :  { %s7655_s25 = sld [smem:[%s8997_s0 + %s7467_s15]]  }
  0x33   :  { %9076 = sst [smem:[#allocation63_spill]] %s7645_s5 }
  0x34   :  { %s7660_s21 = sld [smem:[%s8997_s0 + %s7468_s22]]  }
  0x35   :  { %s7665_s5 = sld [smem:[%s8997_s0 + %s7469_s28]]  }
  0x37   :  { %9077 = sst [smem:[#allocation64_spill]] %s7650_s29 }
  0x38   :  { %s7670_s29 = sld [smem:[%s8997_s0 + %s7470_s7]]  }
  0x3e   :  { %9078 = sst [smem:[#allocation65_spill]] %s7670_s29 }
  0x3f   :  { %66 = vsyncpa [#allocation3], 0 }
  0x40   :  { %68 = vsyncpa [#allocation3 + $0x1], 0 }
  0x41   :  { %69 = vsyncpa [#allocation6], 0 }
  0x42   :  { %71 = vsyncpa [#allocation6 + $0x1], 0 }
  0x43   :  { %72 = vsyncpa [#allocation9], 0 }
  0x44   :  { %74 = vsyncpa [#allocation9 + $0x1], 0 }
  0x45   :  { %75 = vsyncpa [#allocation12], 0 }
  0x46   :  { %76 = vsyncpa [#allocation15], 0 }
  0x47   :  { %77 = vsyncpa [#allocation18], 0 }
  0x48   :  { %78 = vsyncpa [#allocation21], 0 }
  0x49   :  { %79 = vsyncpa [#allocation24], 0 }
  0x4a   :  { %80 = vsyncpa [#allocation27], 0 }
  0x4b   :  { %81 = vsyncpa [#allocation4], 0 }
  0x4c   :  { %83 = vsyncpa [#allocation4 + $0x1], 0  ;;  %s7672_s15 = smov 0   ;;  %s7674_s16 = smov 0  }
  0x4d   :  { %s7676_s0 = smov 0   ;;  %s7678_s18 = smov 0  }
  0x4e LB: > { %s9079_s17 = sld [smem:[#allocation57_spill]]  ;;  %s9080_s14 = sld [smem:[#allocation59_spill]]  ;;  %s7435_s0 = sphi %s7676_s0, %s9159_s0   ;;  %s7431_s16 = sphi %s7674_s16, %s9161_s16   ;;  %s7427_s15 = sphi %s7672_s15, %s9160_s15   ;;  %s7439_s18 = sphi %s7678_s18, %s9157_s18  }
  0x4f   : > { %s9081_s4 = sld [smem:[#allocation55_spill]]  ;;  %s9082_s13 = sld [smem:[#allocation43_spill]] }
  0x50   : > { %s9083_s27 = sld [smem:[#allocation54_spill]]  ;;  %s9084_s24 = sld [smem:[#allocation51_spill]] }
  0x51   : > { %s9085_s12 = sld [smem:[#allocation56_spill]]  ;;  %s9086_s9 = sld [smem:[#allocation58_spill]] }
  0x52   : > { %s9087_s6 = sld [smem:[#allocation52_spill]]  ;;  %s9088_s8 = sld [smem:[#allocation49_spill]] }
  0x53   : > { %s9089_s3 = sld [smem:[#allocation48_spill]]  ;;  %9090 = sst [smem:[#allocation66_spill]] %s7435_s0 }
  0x54   : > { %s7471_s22 = smov [#allocation10]   ;;  %s7693_s26 = sadd.s32 4294967295, %s7439_s18  }
  0x55   : > { %s796_s23 = sshll.u32 %s7471_s22, 4  ;;  %p5391_p0 = scmp.ge.s32.totalorder %s7439_s18, 1  ;;  %s797_s23 = int_to_ptr.vmem [resolvable:$true] %s796_s23 }
  0x56   : > { %p9006_p1 = scmp.eq.s32.totalorder %s7693_s26, 0  ;;  %p780_p2 = scmp.lt.s32.totalorder %s7439_s18, 3 }
  0x57   : > { %s7472_s1 = smov [#allocation11]   ;;  %s7473_s10 = smov [#allocation14]  }
  0x58   : > { %p7698_p3 = pnand %p5391_p0, %p780_p2  ;;  %s806_s2 = sshll.u32 %s7472_s1, 4  ;;  %s7705_s2 = int_to_ptr.vmem [resolvable:$true] %s806_s2 }
  0x59   : > { %s834_s11 = sshll.u32 %s7473_s10, 4  ;;  %s6853_s22 = scalar_lea.hbm %s9089_s3, 32  ;;  %s7713_s11 = int_to_ptr.vmem [resolvable:$true] %s834_s11 }
  0x5a   : > { %s9091_s28 = scalar_select %p7698_p3, 1, 0 }
  0x5b   : > { %p6298_p5 = pneg %p7698_p3  ;;  %p6854_p7 = scmp.ne.s32.totalorder %s9089_s3, %s6853_s22 }
  0x5c   : > { %p6860_p11 = scmp.lt.u32.totalorder %s6853_s22, %s9089_s3 }
  0x5d   : > { %p7709_p6 = pnand %p6298_p5, %p9006_p1 }
  0x5f   : > { %s9092_s7 = scalar_select %p7709_p6, 1, 0 }
  0x60   : > { %p7719_p8 = pneg %p7709_p6 }
  0x62   : > { %s9093_s29 = scalar_select %p7719_p8, 1, 0 }
  0x63   : > { %p6856_p9 = pnand %p7719_p8, %p6854_p7 }
  0x65   : > { %p6857_p10 = pneg %p6856_p9 }
  0x67   : > { %p6862_p12 = pnand %p6860_p11, %p6857_p10 }
  0x69   : > { %6865 = shalt.err (!%p6862_p12)
}
  0x6a   : > { %s6866_s1 = scalar_lea.vmem %s797_s23, 32  ;;  %p6874_p5 = scmp.lt.s32.totalorder %s797_s23, %s797_s23 }
  0x6b   : > { %p6867_p13 = scmp.ne.s32.totalorder %s797_s23, %s6866_s1  ;;  %p6875_p4 = scmp.lt.s32.totalorder %s6866_s1, %s6866_s1 }
  0x6d   : > { %p6869_p0 = pnand %p6867_p13, %p7719_p8  ;;  %p6876_p1 = por %p6875_p4, %p6874_p5 }
  0x6f   : > { %p6870_p2 = pneg %p6869_p0 }
  0x71   : > { %p6877_p3 = pnand %p6876_p1, %p6870_p2 }
  0x73   : > { %6880 = shalt.err (!%p6877_p3)
}
  0x74   : > { %6301 = dma.hbm_to_vmem [thread:$0]  (!%p7709_p6), %s9089_s3, 32, %s797_s23, [#allocation9]  }
  0x75   : > { %s6881_s10 = scalar_lea.hbm %s9088_s8, 512 }
  0x76   : > { %p6882_p7 = scmp.ne.s32.totalorder %s9088_s8, %s6881_s10  ;;  %p6888_p11 = scmp.lt.u32.totalorder %s6881_s10, %s9088_s8 }
  0x78   : > { %p6884_p9 = pnand %p6882_p7, %p7719_p8 }
  0x7a   : > { %p6885_p10 = pneg %p6884_p9 }
  0x7c   : > { %p6890_p12 = pnand %p6888_p11, %p6885_p10 }
  0x7e   : > { %6893 = shalt.err (!%p6890_p12)
}
  0x7f   : > { %s6894_s22 = scalar_lea.vmem %s7705_s2, 512  ;;  %p6902_p13 = scmp.lt.s32.totalorder %s7705_s2, %s7705_s2 }
  0x80   : > { %p6895_p1 = scmp.ne.s32.totalorder %s7705_s2, %s6894_s22  ;;  %p6903_p0 = scmp.lt.s32.totalorder %s6894_s22, %s6894_s22 }
  0x82   : > { %p6897_p3 = pnand %p6895_p1, %p7719_p8  ;;  %p6904_p2 = por %p6903_p0, %p6902_p13 }
  0x84   : > { %p6898_p4 = pneg %p6897_p3 }
  0x86   : > { %p6905_p5 = pnand %p6904_p2, %p6898_p4 }
  0x88   : > { %6908 = shalt.err (!%p6905_p5)
}
  0x89   : > { %s9009_s23 = smov 64   ;;  %s9011_s1 = smov 4  }
  0x8a   : > { %6304 = dma.hbm_to_vmem [thread:$0]  (!%p7709_p6), %s9088_s8, 512, %s7705_s2, [#allocation12], %s9009_s23, %s9009_s23, %s9011_s1  }
  0x8b   : > { %s6909_s10 = scalar_lea.hbm %s9084_s24, 16 }
  0x8c   : > { %p6910_p7 = scmp.ne.s32.totalorder %s9084_s24, %s6909_s10  ;;  %p6916_p11 = scmp.lt.u32.totalorder %s6909_s10, %s9084_s24 }
  0x8e   : > { %p6912_p9 = pnand %p6910_p7, %p7719_p8 }
  0x90   : > { %p6913_p10 = pneg %p6912_p9 }
  0x92   : > { %p6918_p12 = pnand %p6916_p11, %p6913_p10 }
  0x94   : > { %6921 = shalt.err (!%p6918_p12)
}
  0x95   : > { %s6922_s22 = scalar_lea.vmem %s7713_s11, 16  ;;  %s6929_s3 = scalar_lea.vmem %s7713_s11, 32 }
  0x96   : > { %p6923_p1 = scmp.ne.s32.totalorder %s7713_s11, %s6922_s22  ;;  %p6930_p13 = scmp.lt.s32.totalorder %s7713_s11, %s7713_s11 }
  0x97   : > { %p6931_p0 = scmp.lt.s32.totalorder %s6929_s3, %s6922_s22 }
  0x98   : > { %p6925_p3 = pnand %p6923_p1, %p7719_p8 }
  0x99   : > { %p6932_p2 = por %p6931_p0, %p6930_p13 }
  0x9a   : > { %p6926_p4 = pneg %p6925_p3 }
  0x9c   : > { %p6933_p5 = pnand %p6932_p2, %p6926_p4 }
  0x9e   : > { %6936 = shalt.err (!%p6933_p5)
}
  0x9f   : > { %6310 = dma.hbm_to_vmem [thread:$0]  (!%p7709_p6), %s9084_s24, 16, %s7713_s11, [#allocation15]  }
  0xa0   : > { %s7476_s2 = smov [#allocation17]   ;;  %s7477_s23 = smov [#allocation20]  }
  0xa1   : > { %s856_s10 = sshll.u32 %s7476_s2, 4  ;;  %s880_s1 = sshll.u32 %s7477_s23, 4  ;;  %s857_s10 = int_to_ptr.vmem [resolvable:$true] %s856_s10  ;;  %s881_s1 = int_to_ptr.vmem [resolvable:$true] %s880_s1 }
  0xa2   : > { %s6937_s8 = scalar_lea.hbm %s9087_s6, 16 }
  0xa3   : > { %p6938_p7 = scmp.ne.s32.totalorder %s9087_s6, %s6937_s8  ;;  %p6944_p11 = scmp.lt.u32.totalorder %s6937_s8, %s9087_s6 }
  0xa5   : > { %p6940_p9 = pnand %p6938_p7, %p7719_p8 }
  0xa7   : > { %p6941_p10 = pneg %p6940_p9 }
  0xa9   : > { %p6946_p12 = pnand %p6944_p11, %p6941_p10 }
  0xab   : > { %6949 = shalt.err (!%p6946_p12)
}
  0xac   : > { %s6950_s3 = scalar_lea.vmem %s857_s10, 16  ;;  %s6957_s11 = scalar_lea.vmem %s857_s10, 32 }
  0xad   : > { %p6951_p1 = scmp.ne.s32.totalorder %s857_s10, %s6950_s3  ;;  %p6958_p13 = scmp.lt.s32.totalorder %s857_s10, %s857_s10 }
  0xae   : > { %p6959_p0 = scmp.lt.s32.totalorder %s6957_s11, %s6950_s3 }
  0xaf   : > { %p6953_p3 = pnand %p6951_p1, %p7719_p8 }
  0xb0   : > { %p6960_p2 = por %p6959_p0, %p6958_p13 }
  0xb1   : > { %p6954_p4 = pneg %p6953_p3 }
  0xb3   : > { %p6961_p5 = pnand %p6960_p2, %p6954_p4 }
  0xb5   : > { %6964 = shalt.err (!%p6961_p5)
}
  0xb6   : > { %6316 = dma.hbm_to_vmem [thread:$0]  (!%p7709_p6), %s9087_s6, 16, %s857_s10, [#allocation18]  }
  0xb7   : > { %s6965_s8 = scalar_lea.hbm %s9083_s27, 512 }
  0xb8   : > { %p6966_p7 = scmp.ne.s32.totalorder %s9083_s27, %s6965_s8  ;;  %p6972_p11 = scmp.lt.u32.totalorder %s6965_s8, %s9083_s27 }
  0xba   : > { %p6968_p9 = pnand %p6966_p7, %p7719_p8 }
  0xbc   : > { %p6969_p10 = pneg %p6968_p9 }
  0xbe   : > { %p6974_p12 = pnand %p6972_p11, %p6969_p10 }
  0xc0   : > { %6977 = shalt.err (!%p6974_p12)
}
  0xc1   : > { %s6978_s23 = scalar_lea.vmem %s881_s1, 512  ;;  %p6986_p13 = scmp.lt.s32.totalorder %s881_s1, %s881_s1 }
  0xc2   : > { %p6979_p1 = scmp.ne.s32.totalorder %s881_s1, %s6978_s23  ;;  %p6987_p0 = scmp.lt.s32.totalorder %s6978_s23, %s6978_s23 }
  0xc4   : > { %p6981_p3 = pnand %p6979_p1, %p7719_p8  ;;  %p6988_p2 = por %p6987_p0, %p6986_p13 }
  0xc6   : > { %p6982_p4 = pneg %p6981_p3 }
  0xc8   : > { %p6989_p5 = pnand %p6988_p2, %p6982_p4 }
  0xca   : > { %6992 = shalt.err (!%p6989_p5)
}
  0xcb   : > { %s9094_s22 = smov 4   ;;  %s9095_s2 = smov 64  }
  0xcc   : > { %6322 = dma.hbm_to_vmem [thread:$0]  (!%p7709_p6), %s9083_s27, 512, %s881_s1, [#allocation21], %s9095_s2, %s9095_s2, %s9094_s22  }
  0xcd   : > { %s7478_s10 = smov [#allocation23]   ;;  %s7479_s11 = smov [#allocation26]  }
  0xce   : > { %s904_s3 = sshll.u32 %s7478_s10, 4  ;;  %s929_s8 = sshll.u32 %s7479_s11, 4  ;;  %s905_s3 = int_to_ptr.vmem [resolvable:$true] %s904_s3  ;;  %s930_s8 = int_to_ptr.vmem [resolvable:$true] %s929_s8 }
  0xcf   : > { %s6993_s23 = scalar_lea.hbm %s9085_s12, 512 }
  0xd0   : > { %p6994_p7 = scmp.ne.s32.totalorder %s9085_s12, %s6993_s23  ;;  %p7000_p11 = scmp.lt.u32.totalorder %s6993_s23, %s9085_s12 }
  0xd2   : > { %p6996_p9 = pnand %p6994_p7, %p7719_p8 }
  0xd4   : > { %p6997_p10 = pneg %p6996_p9 }
  0xd6   : > { %p7002_p12 = pnand %p7000_p11, %p6997_p10 }
  0xd8   : > { %7005 = shalt.err (!%p7002_p12)
}
  0xd9   : > { %s7006_s6 = scalar_lea.vmem %s905_s3, 512  ;;  %p7014_p13 = scmp.lt.s32.totalorder %s905_s3, %s905_s3 }
  0xda   : > { %p7007_p1 = scmp.ne.s32.totalorder %s905_s3, %s7006_s6  ;;  %p7015_p0 = scmp.lt.s32.totalorder %s7006_s6, %s7006_s6 }
  0xdc   : > { %p7009_p3 = pnand %p7007_p1, %p7719_p8  ;;  %p7016_p2 = por %p7015_p0, %p7014_p13 }
  0xde   : > { %p7010_p4 = pneg %p7009_p3 }
  0xe0   : > { %p7017_p5 = pnand %p7016_p2, %p7010_p4 }
  0xe2   : > { %7020 = shalt.err (!%p7017_p5)
}
  0xe3   : > { %6328 = dma.hbm_to_vmem [thread:$0]  (!%p7709_p6), %s9085_s12, 512, %s905_s3, [#allocation24], %s9095_s2, %s9095_s2, %s9094_s22  }
  0xe4   : > { %s7021_s1 = scalar_lea.hbm %s9086_s9, 16 }
  0xe5   : > { %p7022_p7 = scmp.ne.s32.totalorder %s9086_s9, %s7021_s1  ;;  %p7028_p11 = scmp.lt.u32.totalorder %s7021_s1, %s9086_s9 }
  0xe7   : > { %p7024_p9 = pnand %p7022_p7, %p7719_p8 }
  0xe9   : > { %p7025_p10 = pneg %p7024_p9 }
  0xeb   : > { %p7030_p12 = pnand %p7028_p11, %p7025_p10 }
  0xed   : > { %7033 = shalt.err (!%p7030_p12)
}
  0xee   : > { %s7034_s6 = scalar_lea.vmem %s930_s8, 16  ;;  %s7041_s10 = scalar_lea.vmem %s930_s8, 32 }
  0xef   : > { %p7035_p1 = scmp.ne.s32.totalorder %s930_s8, %s7034_s6  ;;  %p7042_p13 = scmp.lt.s32.totalorder %s930_s8, %s930_s8 }
  0xf0   : > { %p7043_p0 = scmp.lt.s32.totalorder %s7041_s10, %s7034_s6 }
  0xf1   : > { %p7037_p3 = pnand %p7035_p1, %p7719_p8 }
  0xf2   : > { %p7044_p2 = por %p7043_p0, %p7042_p13 }
  0xf3   : > { %p7038_p4 = pneg %p7037_p3 }
  0xf5   : > { %p7045_p5 = pnand %p7044_p2, %p7038_p4 }
  0xf7   : > { %7048 = shalt.err (!%p7045_p5)
}
  0xf8   : > { %6334 = dma.hbm_to_vmem [thread:$0]  (!%p7709_p6), %s9086_s9, 16, %s930_s8, [#allocation27]  }
  0xf9   : > { %s5390_s22 = sadd.s32 4294967294, %s7439_s18   ;;  %s7813_s2 = sadd.s32 1, %s7439_s18  }
  0xfa   : > { %9096 = sst [smem:[#allocation67_spill]] %s7813_s2  ;;  %s96_s3 = sadd.s32 1, %s7435_s0 }
  0xfb   : > { %s93_s11 = ssub.s32 %s7439_s18, %s7813_s2  ;;  %p103_p7 = scmp.ne.s32.totalorder %s7435_s0, %s7431_s16 }
  0xfc   : > { %p94_p9 = scmp.eq.s32.totalorder %s93_s11, 0  ;;  %p104_p10 = scmp.eq.s32.totalorder %s7439_s18, 0 }
  0xfd   : > { %p109_p11 = scmp.ne.s32.totalorder %s7431_s16, %s7427_s15  ;;  %p767_p12 = scmp.eq.s32.totalorder %s7693_s26, 1 }
  0xfe   : > { %s7825_s23 = scalar_select %p94_p9, %s7435_s0, %s96_s3  }
  0xff   : > { %p105_p1 = por %p104_p10, %p103_p7  ;;  %p9098_p3 = scmp.eq.s32.totalorder %s7693_s26, 0 }
 0x100   : > { %9097 = sst [smem:[#allocation68_spill]] %s7825_s23  ;;  %p7833_p13 = por %p767_p12, %p103_p7 }
 0x101   : > { %p7829_p4 = por %p9098_p3, %p109_p11  ;;  %p773_p0 = scmp.eq.s32.totalorder %s5390_s22, 1 }
 0x102   : > { %s9100_s1 = scalar_select %p7833_p13, 1, 0 }
 0x103   : > { %s9099_s8 = scalar_select %p7829_p4, 1, 0 }
 0x104   : > { %p6368_p2 = scmp.lt.s32.totalorder %s7439_s18, 2  ;;  %s7839_s6 = sand.u32 1, %s7435_s0  }
 0x105   : > { %p7841_p5 = por %p773_p0, %p109_p11  ;;  %s9028_s3 = sand.u32 1, %s7439_s18  }
 0x106   : > { %p7846_p9 = pnand %p6368_p2, %p105_p1  ;;  %s5409_s9 = sshll.u32 %s7839_s6, 3 }
 0x107   : > { %s9101_s10 = scalar_select %p7841_p5, 1, 0 }
 0x108   : > { %s9103_s11 = scalar_select %p7846_p9, 1, 0 }
 0x109   : > { %9102 = sst [smem:[#allocation69_spill]] %s9101_s10  ;;  %s5410_s12 = sshll.u32 %s7439_s18, 7 }
 0x10a   : > { %s7853_s24 = scalar_lea.hbm %s9082_s13, %s5410_s12  ;;  %s1008_s22 = scalar_lea.vmem [#allocation5], %s5409_s9 }
 0x10b   : > { %s1015_s27 = sshll.u32 %s1008_s22, 4  ;;  %s7859_s23 = scalar_lea.sflag [#allocation6], %s9028_s3  ;;  %s7855_s27 = int_to_ptr.vmem [resolvable:$true] %s1015_s27 }
 0x10c   : > { %s7049_s0 = scalar_lea.hbm %s7853_s24, 128  ;;  %p7865_p10 = pneg %p7846_p9 }
 0x10d   : > { %p7050_p7 = scmp.ne.s32.totalorder %s7853_s24, %s7049_s0  ;;  %s7054_s12 = scalar_lea.hbm %s9082_s13, 256 }
 0x10e   : > { %s9104_s2 = scalar_select %p7865_p10, 1, 0 }
 0x10f   : > { %p7052_p11 = pnand %p7865_p10, %p7050_p7  ;;  %p7055_p1 = scmp.lt.u32.totalorder %s7853_s24, %s9082_s13 }
 0x110   : > { %p7056_p3 = scmp.lt.u32.totalorder %s7054_s12, %s7049_s0  ;;  %p7058_p2 = scmp.lt.u32.totalorder %s7049_s0, %s7853_s24 }
 0x111   : > { %p7053_p12 = pneg %p7052_p11 }
 0x112   : > { %p7057_p0 = por %p7056_p3, %p7055_p1 }
 0x114   : > { %p7059_p5 = por %p7058_p2, %p7057_p0 }
 0x116   : > { %p7060_p13 = pnand %p7059_p5, %p7053_p12 }
 0x118   : > { %7063 = shalt.err (!%p7060_p13)
}
 0x119   : > { %s7064_s9 = scalar_lea.vmem %s7855_s27, 128  ;;  %s7480_s22 = smov [#allocation5]  }
 0x11a   : > { %p7065_p4 = scmp.ne.s32.totalorder %s7855_s27, %s7064_s9  ;;  %s7069_s3 = sshll.u32 %s7480_s22, 4  ;;  %s7070_s3 = int_to_ptr.vmem [resolvable:$false] %s7069_s3 }
 0x11b   : > { %s7071_s10 = scalar_lea.vmem %s7070_s3, 256  ;;  %p7072_p7 = scmp.lt.s32.totalorder %s7855_s27, %s7070_s3 }
 0x11c   : > { %p7067_p6 = pnand %p7065_p4, %p7865_p10  ;;  %p7073_p11 = scmp.lt.s32.totalorder %s7071_s10, %s7064_s9 }
 0x11e   : > { %p7068_p8 = pneg %p7067_p6  ;;  %p7074_p1 = por %p7073_p11, %p7072_p7 }
 0x120   : > { %p7075_p3 = pnand %p7074_p1, %p7068_p8 }
 0x122   : > { %7078 = shalt.err (!%p7075_p3)
}
 0x123   : > { %6344 = dma.hbm_to_vmem [thread:$0]  (!%p7846_p9), %s7853_s24, 128, %s7855_s27, %s7859_s23  }
 0x124   : > { %s7481_s0 = smov [#allocation13]   ;;  %s7482_s22 = smov [#allocation16]  }
 0x125   : > { %s823_s12 = sshll.u32 %s7481_s0, 4  ;;  %s845_s13 = sshll.u32 %s7482_s22, 4  ;;  %s824_s12 = int_to_ptr.vmem [resolvable:$true] %s823_s12  ;;  %s7885_s13 = int_to_ptr.vmem [resolvable:$true] %s845_s13 }
 0x126   : > { %s7079_s10 = scalar_lea.hbm %s7570_s19, 16  ;;  %p9105_p8 = scmp.ne.s32.totalorder %s9093_s29, 0 }
 0x127   : > { %p7080_p6 = scmp.ne.s32.totalorder %s7570_s19, %s7079_s10  ;;  %p7086_p5 = scmp.lt.u32.totalorder %s7079_s10, %s7570_s19 }
 0x129   : > { %p7082_p4 = pnand %p7080_p6, %p9105_p8 }
 0x12b   : > { %p7083_p13 = pneg %p7082_p4 }
 0x12d   : > { %p7088_p12 = pnand %p7086_p5, %p7083_p13 }
 0x12f   : > { %7091 = shalt.err (!%p7088_p12)
}
 0x130   : > { %s7092_s3 = scalar_lea.vmem %s824_s12, 16  ;;  %s7099_s24 = scalar_lea.vmem %s824_s12, 32 }
 0x131   : > { %p7093_p0 = scmp.ne.s32.totalorder %s824_s12, %s7092_s3  ;;  %p7100_p11 = scmp.lt.s32.totalorder %s824_s12, %s824_s12 }
 0x132   : > { %p7101_p1 = scmp.lt.s32.totalorder %s7099_s24, %s7092_s3 }
 0x133   : > { %p7095_p2 = pnand %p7093_p0, %p9105_p8 }
 0x134   : > { %p7102_p3 = por %p7101_p1, %p7100_p11 }
 0x135   : > { %p7096_p7 = pneg %p7095_p2 }
 0x137   : > { %p7103_p9 = pnand %p7102_p3, %p7096_p7 }
 0x139   : > { %7106 = shalt.err (!%p7103_p9)
}
 0x13a   : > { %p9106_p10 = scmp.ne.s32.totalorder %s9092_s7, 0  ;;  %s7107_s27 = scalar_lea.hbm %s7580_s30, 16 }
 0x13b   : > { %p7108_p6 = scmp.ne.s32.totalorder %s7580_s30, %s7107_s27  ;;  %p7114_p5 = scmp.lt.u32.totalorder %s7107_s27, %s7580_s30 }
 0x13c   : > { %6307 = dma.hbm_to_vmem [thread:$0]  (!%p9106_p10), %s7570_s19, 16, %s824_s12, [#allocation12]  }
 0x13d   : > { %p7110_p4 = pnand %p7108_p6, %p9105_p8 }
 0x13f   : > { %p7111_p13 = pneg %p7110_p4 }
 0x141   : > { %p7116_p12 = pnand %p7114_p5, %p7111_p13 }
 0x143   : > { %7119 = shalt.err (!%p7116_p12)
}
 0x144   : > { %s7120_s9 = scalar_lea.vmem %s7885_s13, 16  ;;  %s7127_s0 = scalar_lea.vmem %s7885_s13, 32 }
 0x145   : > { %p7121_p9 = scmp.ne.s32.totalorder %s7885_s13, %s7120_s9  ;;  %p7128_p7 = scmp.lt.s32.totalorder %s7885_s13, %s7885_s13 }
 0x146   : > { %p7129_p11 = scmp.lt.s32.totalorder %s7127_s0, %s7120_s9 }
 0x147   : > { %p7123_p0 = pnand %p7121_p9, %p9105_p8 }
 0x148   : > { %p7130_p1 = por %p7129_p11, %p7128_p7 }
 0x149   : > { %p7124_p2 = pneg %p7123_p0 }
 0x14b   : > { %p7131_p3 = pnand %p7130_p1, %p7124_p2 }
 0x14d   : > { %7134 = shalt.err (!%p7131_p3)
}
 0x14e   : > { %6313 = dma.hbm_to_vmem [thread:$0]  (!%p9106_p10), %s7580_s30, 16, %s7885_s13, [#allocation15]  }
 0x14f   : > { %s7483_s12 = smov [#allocation19]   ;;  %s7484_s10 = smov [#allocation22]  }
 0x150   : > { %s870_s22 = sshll.u32 %s7483_s12, 4  ;;  %s894_s3 = sshll.u32 %s7484_s10, 4  ;;  %s871_s22 = int_to_ptr.vmem [resolvable:$true] %s870_s22  ;;  %s7913_s3 = int_to_ptr.vmem [resolvable:$true] %s894_s3 }
 0x151   : > { %s7135_s24 = scalar_lea.hbm %s7595_s20, 16 }
 0x152   : > { %p7136_p6 = scmp.ne.s32.totalorder %s7595_s20, %s7135_s24  ;;  %p7142_p5 = scmp.lt.u32.totalorder %s7135_s24, %s7595_s20 }
 0x154   : > { %p7138_p4 = pnand %p7136_p6, %p9105_p8 }
 0x156   : > { %p7139_p13 = pneg %p7138_p4 }
 0x158   : > { %p7144_p12 = pnand %p7142_p5, %p7139_p13 }
 0x15a   : > { %7147 = shalt.err (!%p7144_p12)
}
 0x15b   : > { %s7148_s27 = scalar_lea.vmem %s871_s22, 16  ;;  %s7155_s13 = scalar_lea.vmem %s871_s22, 32 }
 0x15c   : > { %p7149_p9 = scmp.ne.s32.totalorder %s871_s22, %s7148_s27  ;;  %p7156_p7 = scmp.lt.s32.totalorder %s871_s22, %s871_s22 }
 0x15d   : > { %p7157_p11 = scmp.lt.s32.totalorder %s7155_s13, %s7148_s27 }
 0x15e   : > { %p7151_p0 = pnand %p7149_p9, %p9105_p8 }
 0x15f   : > { %p7158_p1 = por %p7157_p11, %p7156_p7 }
 0x160   : > { %p7152_p2 = pneg %p7151_p0 }
 0x162   : > { %p7159_p3 = pnand %p7158_p1, %p7152_p2 }
 0x164   : > { %7162 = shalt.err (!%p7159_p3)
}
 0x165   : > { %6319 = dma.hbm_to_vmem [thread:$0]  (!%p9106_p10), %s7595_s20, 16, %s871_s22, [#allocation18]  }
 0x166   : > { %s7163_s9 = scalar_lea.hbm %s9081_s4, 16 }
 0x167   : > { %p7164_p6 = scmp.ne.s32.totalorder %s9081_s4, %s7163_s9  ;;  %p7170_p5 = scmp.lt.u32.totalorder %s7163_s9, %s9081_s4 }
 0x169   : > { %p7166_p4 = pnand %p7164_p6, %p9105_p8 }
 0x16b   : > { %p7167_p13 = pneg %p7166_p4 }
 0x16d   : > { %p7172_p12 = pnand %p7170_p5, %p7167_p13 }
 0x16f   : > { %7175 = shalt.err (!%p7172_p12)
}
 0x170   : > { %s7176_s0 = scalar_lea.vmem %s7913_s3, 16  ;;  %s7183_s12 = scalar_lea.vmem %s7913_s3, 32 }
 0x171   : > { %p7177_p9 = scmp.ne.s32.totalorder %s7913_s3, %s7176_s0  ;;  %p7184_p7 = scmp.lt.s32.totalorder %s7913_s3, %s7913_s3 }
 0x172   : > { %p7185_p11 = scmp.lt.s32.totalorder %s7183_s12, %s7176_s0 }
 0x173   : > { %p7179_p0 = pnand %p7177_p9, %p9105_p8 }
 0x174   : > { %p7186_p1 = por %p7185_p11, %p7184_p7 }
 0x175   : > { %p7180_p2 = pneg %p7179_p0 }
 0x177   : > { %p7187_p3 = pnand %p7186_p1, %p7180_p2 }
 0x179   : > { %7190 = shalt.err (!%p7187_p3)
}
 0x17a   : > { %6325 = dma.hbm_to_vmem [thread:$0]  (!%p9106_p10), %s9081_s4, 16, %s7913_s3, [#allocation21]  }
 0x17b   : > { %s7485_s22 = smov [#allocation25]   ;;  %s7486_s24 = smov [#allocation28]  }
 0x17c   : > { %s918_s10 = sshll.u32 %s7485_s22, 4  ;;  %s940_s27 = sshll.u32 %s7486_s24, 4  ;;  %s919_s10 = int_to_ptr.vmem [resolvable:$true] %s918_s10  ;;  %s7941_s27 = int_to_ptr.vmem [resolvable:$true] %s940_s27 }
 0x17d   : > { %s7191_s13 = scalar_lea.hbm %s9079_s17, 16 }
 0x17e   : > { %p7192_p6 = scmp.ne.s32.totalorder %s9079_s17, %s7191_s13  ;;  %p7198_p5 = scmp.lt.u32.totalorder %s7191_s13, %s9079_s17 }
 0x180   : > { %p7194_p4 = pnand %p7192_p6, %p9105_p8 }
 0x182   : > { %p7195_p13 = pneg %p7194_p4 }
 0x184   : > { %p7200_p12 = pnand %p7198_p5, %p7195_p13 }
 0x186   : > { %7203 = shalt.err (!%p7200_p12)
}
 0x187   : > { %s7204_s9 = scalar_lea.vmem %s919_s10, 16  ;;  %s7211_s3 = scalar_lea.vmem %s919_s10, 32 }
 0x188   : > { %p7205_p9 = scmp.ne.s32.totalorder %s919_s10, %s7204_s9  ;;  %p7212_p7 = scmp.lt.s32.totalorder %s919_s10, %s919_s10 }
 0x189   : > { %p7213_p11 = scmp.lt.s32.totalorder %s7211_s3, %s7204_s9 }
 0x18a   : > { %p7207_p0 = pnand %p7205_p9, %p9105_p8 }
 0x18b   : > { %p7214_p1 = por %p7213_p11, %p7212_p7 }
 0x18c   : > { %p7208_p2 = pneg %p7207_p0 }
 0x18e   : > { %p7215_p3 = pnand %p7214_p1, %p7208_p2 }
 0x190   : > { %7218 = shalt.err (!%p7215_p3)
}
 0x191   : > { %6331 = dma.hbm_to_vmem [thread:$0]  (!%p9106_p10), %s9079_s17, 16, %s919_s10, [#allocation24]  }
 0x192   : > { %s7219_s0 = scalar_lea.hbm %s9080_s14, 16 }
 0x193   : > { %p7220_p6 = scmp.ne.s32.totalorder %s9080_s14, %s7219_s0  ;;  %p7226_p5 = scmp.lt.u32.totalorder %s7219_s0, %s9080_s14 }
 0x195   : > { %p7222_p4 = pnand %p7220_p6, %p9105_p8 }
 0x197   : > { %p7223_p13 = pneg %p7222_p4 }
 0x199   : > { %p7228_p12 = pnand %p7226_p5, %p7223_p13 }
 0x19b   : > { %7231 = shalt.err (!%p7228_p12)
}
 0x19c   : > { %s7232_s12 = scalar_lea.vmem %s7941_s27, 16  ;;  %s7239_s22 = scalar_lea.vmem %s7941_s27, 32 }
 0x19d   : > { %p7233_p9 = scmp.ne.s32.totalorder %s7941_s27, %s7232_s12  ;;  %p7240_p7 = scmp.lt.s32.totalorder %s7941_s27, %s7941_s27 }
 0x19e   : > { %p7241_p11 = scmp.lt.s32.totalorder %s7239_s22, %s7232_s12 }
 0x19f   : > { %p7235_p0 = pnand %p7233_p9, %p9105_p8 }
 0x1a0   : > { %p7242_p1 = por %p7241_p11, %p7240_p7 }
 0x1a1   : > { %p7236_p2 = pneg %p7235_p0 }
 0x1a3   : > { %p7243_p3 = pnand %p7242_p1, %p7236_p2 }
 0x1a5   : > { %7246 = shalt.err (!%p7243_p3)
}
 0x1a6   : > { %s9107_s10 = sld [smem:[#allocation41_spill]]  ;;  %s9035_s29 = sshll.u32 %s7839_s6, 4 }
 0x1a7   : > { %6337 = dma.hbm_to_vmem [thread:$0]  (!%p9106_p10), %s9080_s14, 16, %s7941_s27, [#allocation27]  }
 0x1a8   : > { %s9036_s24 = sshll.u32 %s7439_s18, 8  ;;  %s979_s7 = scalar_lea.vmem [#allocation2], %s9035_s29 }
 0x1a9   : > { %s986_s9 = sshll.u32 %s979_s7, 4  ;;  %s976_s3 = scalar_lea.sflag [#allocation3], %s7839_s6  ;;  %s7978_s9 = int_to_ptr.vmem [resolvable:$true] %s986_s9 }
 0x1aa   : > { %p9108_p6 = scmp.ne.s32.totalorder %s9104_s2, 0 }
 0x1ac   : > { %s7974_s13 = scalar_lea.hbm %s9107_s10, %s9036_s24  ;;  %s7252_s27 = scalar_lea.hbm %s9107_s10, 512 }
 0x1ad   : > { %s7247_s0 = scalar_lea.hbm %s7974_s13, 256  ;;  %p7253_p13 = scmp.lt.u32.totalorder %s7974_s13, %s9107_s10 }
 0x1ae   : > { %p7248_p8 = scmp.ne.s32.totalorder %s7974_s13, %s7247_s0  ;;  %p7254_p5 = scmp.lt.u32.totalorder %s7252_s27, %s7247_s0 }
 0x1af   : > { %p7256_p9 = scmp.lt.u32.totalorder %s7247_s0, %s7974_s13 }
 0x1b0   : > { %p7250_p4 = pnand %p7248_p8, %p9108_p6  ;;  %p7255_p12 = por %p7254_p5, %p7253_p13 }
 0x1b2   : > { %p7251_p10 = pneg %p7250_p4  ;;  %p7257_p0 = por %p7256_p9, %p7255_p12 }
 0x1b4   : > { %p7258_p2 = pnand %p7257_p0, %p7251_p10 }
 0x1b6   : > { %7261 = shalt.err (!%p7258_p2)
}
 0x1b7   : > { %s7262_s12 = scalar_lea.vmem %s7978_s9, 256  ;;  %s7487_s22 = smov [#allocation2]  }
 0x1b8   : > { %p7263_p7 = scmp.ne.s32.totalorder %s7978_s9, %s7262_s12  ;;  %s7267_s7 = sshll.u32 %s7487_s22, 4  ;;  %s7268_s7 = int_to_ptr.vmem [resolvable:$false] %s7267_s7 }
 0x1b9   : > { %s7269_s29 = scalar_lea.vmem %s7268_s7, 512  ;;  %p7270_p3 = scmp.lt.s32.totalorder %s7978_s9, %s7268_s7 }
 0x1ba   : > { %p7265_p11 = pnand %p7263_p7, %p9108_p6  ;;  %p7271_p8 = scmp.lt.s32.totalorder %s7269_s29, %s7262_s12 }
 0x1bc   : > { %p7266_p1 = pneg %p7265_p11  ;;  %p7272_p4 = por %p7271_p8, %p7270_p3 }
 0x1be   : > { %p7273_p13 = pnand %p7272_p4, %p7266_p1 }
 0x1c0   : > { %7276 = shalt.err (!%p7273_p13)
}
 0x1c1   : > { %s7488_s0 = smov 128   ;;  %s9109_s27 = sld [smem:[#allocation45_spill]] }
 0x1c2   : > { %s7489_s24 = smov 8   ;;  %p9110_p10 = scmp.ne.s32.totalorder %s9103_s11, 0 }
 0x1c3   : > { %s9111_s29 = sshll.u32 %s7439_s18, 8  ;;  %s9112_s22 = sshll.u32 %s7839_s6, 4 }
 0x1c4   : > { %6341 = dma.hbm_to_vmem [thread:$0]  (!%p9110_p10), %s7974_s13, 256, %s7978_s9, %s976_s3, %s7488_s0, %s7488_s0, %s7489_s24  }
 0x1c5   : > { %s1034_s7 = scalar_lea.vmem [#allocation7], %s9112_s22 }
 0x1c6   : > { %s1041_s4 = sshll.u32 %s1034_s7, 4  ;;  %s8010_s4 = int_to_ptr.vmem [resolvable:$true] %s1041_s4 }
 0x1c7   : > { %s8006_s12 = scalar_lea.hbm %s9109_s27, %s9111_s29  ;;  %s7282_s14 = scalar_lea.hbm %s9109_s27, 512 }
 0x1c8   : > { %s7277_s10 = scalar_lea.hbm %s8006_s12, 256  ;;  %p7283_p0 = scmp.lt.u32.totalorder %s8006_s12, %s9109_s27 }
 0x1c9   : > { %p7278_p5 = scmp.ne.s32.totalorder %s8006_s12, %s7277_s10  ;;  %p7284_p2 = scmp.lt.u32.totalorder %s7282_s14, %s7277_s10 }
 0x1ca   : > { %p7286_p11 = scmp.lt.u32.totalorder %s7277_s10, %s8006_s12 }
 0x1cb   : > { %p7280_p12 = pnand %p7278_p5, %p9108_p6  ;;  %p7285_p7 = por %p7284_p2, %p7283_p0 }
 0x1cd   : > { %p7281_p9 = pneg %p7280_p12  ;;  %p7287_p1 = por %p7286_p11, %p7285_p7 }
 0x1cf   : > { %p7288_p3 = pnand %p7287_p1, %p7281_p9 }
 0x1d1   : > { %7291 = shalt.err (!%p7288_p3)
}
 0x1d2   : > { %s7292_s13 = scalar_lea.vmem %s8010_s4, 256  ;;  %s7490_s9 = smov [#allocation7]  }
 0x1d3   : > { %p7293_p8 = scmp.ne.s32.totalorder %s8010_s4, %s7292_s13  ;;  %s7297_s3 = sshll.u32 %s7490_s9, 4  ;;  %s7298_s3 = int_to_ptr.vmem [resolvable:$false] %s7297_s3 }
 0x1d4   : > { %s7299_s29 = scalar_lea.vmem %s7298_s3, 512  ;;  %p7300_p5 = scmp.lt.s32.totalorder %s8010_s4, %s7298_s3 }
 0x1d5   : > { %p7295_p4 = pnand %p7293_p8, %p9108_p6  ;;  %p7301_p12 = scmp.lt.s32.totalorder %s7299_s29, %s7292_s13 }
 0x1d7   : > { %p7296_p13 = pneg %p7295_p4  ;;  %p7302_p0 = por %p7301_p12, %p7300_p5 }
 0x1d9   : > { %p7303_p2 = pnand %p7302_p0, %p7296_p13 }
 0x1db   : > { %7306 = shalt.err (!%p7303_p2)
}
 0x1dc   : > { %s9113_s14 = sld [smem:[#allocation46_spill]]  ;;  %s5414_s10 = sshll.u32 %s7439_s18, 4 }
 0x1dd   : > { %6347 = dma.hbm_to_vmem [thread:$0]  (!%p9110_p10), %s8006_s12, 256, %s8010_s4, %s7859_s23, %s7488_s0, %s7488_s0, %s7489_s24  }
 0x1de   : > { %s1054_s22 = scalar_lea.vmem [#allocation8], %s7839_s6  ;;  %s9114_s9 = sand.u32 1, %s7439_s18  }
 0x1df   : > { %s1061_s7 = sshll.u32 %s1054_s22, 4  ;;  %s1052_s3 = scalar_lea.sflag [#allocation9], %s9114_s9  ;;  %s1062_s7 = int_to_ptr.vmem [resolvable:$true] %s1061_s7 }
 0x1e2   : > { %s8036_s13 = scalar_lea.hbm %s9113_s14, %s5414_s10  ;;  %s7312_s17 = scalar_lea.hbm %s9113_s14, 32 }
 0x1e3   : > { %s7307_s29 = scalar_lea.hbm %s8036_s13, 16  ;;  %p7313_p1 = scmp.lt.u32.totalorder %s8036_s13, %s9113_s14 }
 0x1e4   : > { %p7308_p9 = scmp.ne.s32.totalorder %s8036_s13, %s7307_s29  ;;  %p7314_p3 = scmp.lt.u32.totalorder %s7312_s17, %s7307_s29 }
 0x1e5   : > { %p7316_p4 = scmp.lt.u32.totalorder %s7307_s29, %s8036_s13 }
 0x1e6   : > { %p7310_p7 = pnand %p7308_p9, %p9108_p6  ;;  %p7315_p8 = por %p7314_p3, %p7313_p1 }
 0x1e8   : > { %p7311_p11 = pneg %p7310_p7  ;;  %p7317_p13 = por %p7316_p4, %p7315_p8 }
 0x1ea   : > { %p7318_p5 = pnand %p7317_p13, %p7311_p11 }
 0x1ec   : > { %7321 = shalt.err (!%p7318_p5)
}
 0x1ed   : > { %s7322_s4 = scalar_lea.vmem %s1062_s7, 16  ;;  %s7491_s23 = smov [#allocation8]  }
 0x1ee   : > { %p7323_p12 = scmp.ne.s32.totalorder %s1062_s7, %s7322_s4  ;;  %s7327_s6 = sshll.u32 %s7491_s23, 4  ;;  %s7328_s6 = int_to_ptr.vmem [resolvable:$false] %s7327_s6 }
 0x1ef   : > { %s7329_s24 = scalar_lea.vmem %s7328_s6, 32  ;;  %p7330_p9 = scmp.lt.s32.totalorder %s1062_s7, %s7328_s6 }
 0x1f0   : > { %p7325_p0 = pnand %p7323_p12, %p9108_p6  ;;  %p7331_p7 = scmp.lt.s32.totalorder %s7329_s24, %s7322_s4 }
 0x1f2   : > { %p7326_p2 = pneg %p7325_p0  ;;  %p7332_p10 = por %p7331_p7, %p7330_p9 }
 0x1f4   : > { %p7333_p1 = pnand %p7332_p10, %p7326_p2 }
 0x1f6   : > { %7336 = shalt.err (!%p7333_p1)
}
 0x1f7   : > { %p9115_p3 = scmp.ne.s32.totalorder %s9103_s11, 0  ;;  %p9116_p11 = scmp.ne.s32.totalorder %s9091_s28, 0 }
 0x1f8   : > { %s8056_s17 = sand.u32 (!%p9116_p11), 1, %s7431_s16   ;;  %p9117_p6 = scmp.ne.s32.totalorder (!%p9116_p11), %s9099_s8, 0 }
 0x1f9   : > { %6350 = dma.hbm_to_vmem [thread:$0]  (!%p9115_p3), %s8036_s13, 16, %s1062_s7, %s1052_s3  }
 0x1fa   : > { %1070 = sbr.rel (%p9116_p11) target bundleno = 9426 (0x24d2), region = 140  ;;  %s8059_s2 = sshll.u32 (!%p9116_p11), %s8056_s17, 4 }
 0x1fb   : > { %s1073_s0 = scalar_lea.sflag (!%p9116_p11), [#allocation3], %s8056_s17  ;;  %s8063_s12 = scalar_lea.vmem (!%p9116_p11), [#allocation2], %s8059_s2 }
 0x201   : > { %7382 = dma.done.wait (%p9117_p6), %s1073_s0, 256  }
 0x202   : > { %7384 = vsyncadd (%p9117_p6), %s1073_s0, 4294967040  ;;  %s1081_s28 = sand.u32 1, %s7693_s26   ;;  %s5417_s11 = sshll.u32 %s8056_s17, 3 }
 0x203   : > { %s1082_s10 = scalar_lea.sflag [#allocation6], %s1081_s28  ;;  %s8071_s22 = scalar_lea.vmem [#allocation5], %s5417_s11 }
 0x204   : > { %7386 = dma.done.wait (%p9117_p6), %s1082_s10, 384  }
 0x205   : > { %7388 = vsyncadd (%p9117_p6), %s1082_s10, 4294966912  ;;  %s1094_s7 = scalar_lea.vmem [#allocation7], %s8059_s2  ;;  %s1100_s13 = scalar_lea.sflag [#allocation9], %s1081_s28 }
 0x206   : > { %7390 = dma.done.wait (%p9117_p6), %s1100_s13, 16  }
 0x207   : > { %7392 = vsyncadd (%p9117_p6), %s1100_s13, 4294967280  ;;  %p9118_p10 = scmp.eq.s32.totalorder %s7693_s26, 0 }
 0x209   : > { %7394 = dma.done.wait (%p9118_p10), [#allocation9], 32   ;;  %p9119_p8 = pmov %p9118_p10 }
 0x20b   : > { %7396 = vsyncadd (%p9119_p8), [#allocation9], 4294967264  ;;  %p9120_p4 = pmov %p9119_p8 }
 0x20d   : > { %7398 = dma.done.wait (%p9120_p4), [#allocation12], 528   ;;  %p9121_p13 = pmov %p9120_p4 }
 0x20e   : > { %p9122_p5 = pmov %p9120_p4 }
 0x20f   : > { %7400 = vsyncadd (%p9121_p13), [#allocation12], 4294966768 }
 0x210   : > { %7402 = dma.done.wait (%p9122_p5), [#allocation15], 32   ;;  %p9123_p12 = pmov %p9120_p4 }
 0x211   : > { %p9124_p0 = pmov %p9120_p4 }
 0x212   : > { %7404 = vsyncadd (%p9123_p12), [#allocation15], 4294967264 }
 0x213   : > { %7406 = dma.done.wait (%p9124_p0), [#allocation18], 32   ;;  %p9125_p2 = pmov %p9124_p0 }
 0x214   : > { %p9126_p9 = pmov %p9124_p0 }
 0x215   : > { %7408 = vsyncadd (%p9125_p2), [#allocation18], 4294967264 }
 0x216   : > { %7410 = dma.done.wait (%p9126_p9), [#allocation21], 528   ;;  %p9127_p7 = pmov %p9124_p0 }
 0x217   : > { %p9128_p1 = pmov %p9124_p0 }
 0x218   : > { %7412 = vsyncadd (%p9127_p7), [#allocation21], 4294966768 }
 0x219   : > { %7414 = dma.done.wait (%p9128_p1), [#allocation24], 528   ;;  %p9129_p3 = pmov %p9124_p0 }
 0x21a   : > { %p9130_p11 = pmov %p9124_p0 }
 0x21b   : > { %7416 = vsyncadd (%p9129_p3), [#allocation24], 4294966768 }
 0x21c   : > { %7418 = dma.done.wait (%p9130_p11), [#allocation27], 32   ;;  %p9131_p6 = pmov %p9124_p0 }
 0x21d   : > { %s9132_s8 = sld [smem:[#allocation47_spill]]  ;;  %v7492_v0 = vmov 0   ;;  %vm1331_vm0 = vcmask 523264   ;;  %v1266_v9 = vld [vmem:[%s8063_s12] sm:$0xff]  ;;  %v1267_v10 = vld [vmem:[%s8063_s12 + $0x8] sm:$0xff]  ;;  %v7493_v12 = vmov 0.0   ;;  %v1281_v13 = vlaneseq }
 0x21e   : > { %7420 = vsyncadd (%p9131_p6), [#allocation27], 4294967264  ;;  %1367 = vmatprep.mubr.bf16.mxu0 %v7492_v0  ;;  %6556 = vset.pattern.permute.xlu1 %v7492_v0  ;;  %v1270_v11 = vpack.c.bf16 %v1267_v10, %v1266_v9  ;;  %v1279_v16 = vld [vmem:[#allocation10] sm:$0x3]  ;;  %vm1400_vm1 = vcmask 64512   ;;  %s9042_s3 = smov 64  }
 0x21f   : > { %6557 = vset.pattern.permute.xlu0 %v7492_v0  ;;  %v8123_v14 = vshrl.u32 %v1281_v13, 7  ;;  %vm8145_vm2 = vmpackc.low %vm1400_vm1, %vm1400_vm1  ;;  %v1379_v35 = vld [vmem:[%s1094_s7 + $0x8] sm:$0xff]  ;;  %v1378_v36 = vld [vmem:[%s1094_s7] sm:$0xff]  ;;  %vm1488_vm5 = vcmask 130048   ;;  %s9044_s29 = smov 56   ;;  %s7496_s4 = smov 48  }
 0x220   : > { %vm1381_vm3 = vcmp.ne.s32.totalorder %v1379_v35, 0  ;;  %vm1380_vm4 = vcmp.ne.s32.totalorder %v1378_v36, 0  ;;  %s7497_s23 = smov 120   ;;  %s7498_s6 = smov 104   ;;  %vm7506_vm6 = vmmov 0   ;;  %vm2772_vm7 = vcmask 195584  }
 0x221   : > { %v1283_v15 = vsub.s32 0, %v8123_v14  ;;  %v1287_v17 = vsub.s32 1, %v8123_v14  ;;  %v8162_v38 = vsel %vm1381_vm3, -1e+30, %v7493_v12  ;;  %v8165_v41 = vsel %vm1380_vm4, -1e+30, %v7493_v12 }
 0x222   : > { %s7499_s24 = smov 96   ;;  %s9050_s0 = smov 16   ;;  %vm2775_vm8 = vcmask 261120   ;;  %vm2778_vm9 = vcmask 326656   ;;  %vm2781_vm10 = vcmask 392192   ;;  %vm2784_vm11 = vcmask 457728  }
 0x223   : > { %v6663_v1 = vld [vmem:[%s9132_s8 + $0x4] ss:$8 sps:$4 sm:$0xff]   ;;  %v6665_v2 = vld [vmem:[%s9132_s8] ss:$8 sps:$4 sm:$0xff]   ;;  %v6666_v3 = vld [vmem:[%s9132_s8 + $0x14] ss:$8 sps:$4 sm:$0xff]   ;;  %v1284_v18 = vrot.slane %v1279_v16, %v1283_v15  ;;  %v1288_v20 = vrot.slane %v1279_v16, %v1287_v17 }
 0x224   : > { %1335 = vmatprep.subr.bf16.mxu0 %v6663_v1  ;;  %v6668_v4 = vld [vmem:[%s9132_s8 + $0x10] ss:$8 sps:$4 sm:$0xff]   ;;  %v6669_v5 = vld [vmem:[%s9132_s8 + $0x24] ss:$8 sps:$4 sm:$0xff]   ;;  %v6671_v6 = vld [vmem:[%s9132_s8 + $0x20] ss:$8 sps:$4 sm:$0xff]  }
 0x225   : > { %1336 = vmatpush1.bf16.msra.mxu0 %v6665_v2  ;;  %v6672_v7 = vld [vmem:[%s9132_s8 + $0x34] ss:$8 sps:$4 sm:$0xff]   ;;  %v6674_v8 = vld [vmem:[%s9132_s8 + $0x30] ss:$8 sps:$4 sm:$0xff]   ;;  %s7501_s28 = smov 88   ;;  %s9052_s11 = smov 80  }
 0x226   : > { %1337 = vmatprep.subr.bf16.mxu0 %v6666_v3  ;;  %s9048_s10 = smov 72   ;;  %s7504_s7 = smov 40  }
 0x227   : > { %s7505_s13 = smov 112   ;;  %s7507_s9 = smov 32  }
 0x228   : > { %p1255_p10 = scmp.lt.s32.totalorder %s7693_s26, 1  ;;  %p9153_p4 = scmp.ne.s32.totalorder %s9100_s1, 0 }
 0x229   : > { %1338 = vmatpush1.bf16.msra.mxu0 %v6668_v4 }
 0x22a   : > { %1339 = vmatprep.subr.bf16.mxu0 %v6669_v5 }
 0x22d   : > { %1340 = vmatpush1.bf16.msra.mxu0 %v6671_v6 }
 0x22e   : > { %1341 = vmatprep.subr.bf16.mxu0 %v6672_v7 }
 0x231   : > { %1342 = vmatpush1.bf16.msra.mxu0 %v6674_v8 }
 0x232   : > { %5775 = vmatprep.subr.bf16.mxu0 %v7493_v12 }
 0x234   : > { %5444 = vmatmul.mubr.msk.bf16.vlgmr.msra.gmra.mrb[0].mxu0 %vm1331_vm0, %v1270_v11 }
 0x235   : > { %5777 = vmatprep.mubr.msk.bf16.mxu0 %vm7506_vm6, %v7493_v12 }
 0x307   : > { %v1369_v19 = vpop.f32.mrb[0].mxu0 }
 0x308   : > { %v8129_v21 = vadd.f32 %v1369_v19, %v1284_v18  ;;  %v1371_v22 = vpop.f32.mrb[1].mxu0 }
 0x309   : > { %v1373_v23 = vpop.f32.mrb[2].mxu0  ;;  %v1372_v26 = vadd.f32 %v1371_v22, %v1288_v20 }
 0x30a   : > { %v8131_v24 = vadd.f32 %v1373_v23, %v1284_v18  ;;  %v1375_v25 = vpop.f32.mrb[3].mxu0  ;;  %5759 = vmatprep.mubr.msk.f32.mxu1 %vm1400_vm1, %v8129_v21 }
 0x30b   : > { %v1376_v27 = vadd.f32 %v1375_v25, %v1288_v20 }
 0x30c   : > { %v8137_v28 = vpack.i.bf16 %v8131_v24, %v8129_v21 }
 0x30d   : > { %v8139_v29 = vpack.c.bf16 %v1376_v27, %v1372_v26 }
 0x30e   : > { %6482 = vrot.lane.b32.xlu0 %v8137_v28, %s9042_s3  ;;  %s7508_s3 = smov 24  }
 0x380   : > { %v6483_v30 = vpop.permute.xlu0 %6482 }
 0x381   : > { %v6485_v31 = vunpack.i.h.bf16 %v6483_v30  ;;  %v6484_v32 = vunpack.i.l.bf16 %v6483_v30 }
 0x383   : > { %v6091_v34 = vpack.c.bf16 %v6485_v31, %v6484_v32 }
 0x385   : > { %6093 = vmatprep.subr.msk.bf16.mxu1 %vm8145_vm2, %v6091_v34 }
 0x386   : > { %6096 = vmatpush3.bf16.xpose.msk.msra.mxu1 %vm8145_vm2, %v6091_v34 }
 0x387   : > { %5762 = vmatprep.subr.bf16.mxu1 %v7493_v12 }
 0x38d   : > { %5760 = vmatmul.mubr.msk.f32.vlgmr.msra.gmra.mrb[0].mxu1 %vm1400_vm1, %v8131_v24 }
 0x38e   : > { %5763 = vmatpush3.bf16.msra.mxu1 %v8139_v29  ;;  %5764 = vmatprep.mubr.msk.bf16.mxu1 %vm7506_vm6, %v7493_v12 }
 0x460   : > { %v5761_v37 = vpop.f32.mrb[0].mxu1 }
 0x461   : > { %v1485_v39 = vmul.f32 0.35355338, %v5761_v37  ;;  %v1475_v40 = vpop.f32.mrb[1].mxu1 }
 0x462   : > { %v1484_v42 = vmul.f32 0.35355338, %v1475_v40 }
 0x463   : > { %v1487_v43 = vadd.f32 %v1485_v39, %v8162_v38 }
 0x464   : > { %v1486_v44 = vadd.f32 %v1484_v42, %v8165_v41 }
 0x465   : > { %v1492_v45 = vsel %vm1488_vm5, %v1487_v43, -inf }
 0x466   : > { %1493 = vmax.xlane.f32.xlu1 %v1492_v45  ;;  %v1489_v46 = vsel %vm1488_vm5, %v1486_v44, -inf }
 0x467   : > { %1490 = vmax.xlane.f32.xlu0 %v1489_v46 }
 0x477   : > { %6487 = vrot.lane.b32.xlu1 %v8137_v28, %s9044_s29  ;;  %s9046_s29 = smov 8  }
 0x47b   : > { %6492 = vrot.lane.b32.xlu1 %v8137_v28, %s7496_s4 }
 0x47d   : > { %1558 = vrot.lane.b32.xlu0 %v8131_v24, %s7497_s23 }
 0x47f   : > { %1556 = vrot.lane.b32.xlu1 %v8129_v21, %s7497_s23 }
 0x481   : > { %1889 = vrot.lane.b32.xlu0 %v8131_v24, %s7498_s6 }
 0x485   : > { %2052 = vrot.lane.b32.xlu0 %v8129_v21, %s7499_s24 }
 0x489   : > { %6512 = vrot.lane.b32.xlu0 %v8137_v28, %s9050_s0 }
 0x48d   : > { %2219 = vrot.lane.b32.xlu0 %v8131_v24, %s7501_s28 }
 0x491   : > { %2382 = vrot.lane.b32.xlu0 %v8129_v21, %s9052_s11 }
 0x495   : > { %2547 = vrot.lane.b32.xlu0 %v8129_v21, %s9048_s10 }
 0x4f3   : > { %v1494_v47 = vpop.xlane.xlu1 %1493 }
 0x4f4   : > { %v1496_v48 = vsub.f32 %v1487_v43, %v1494_v47  ;;  %v1491_v49 = vpop.xlane.xlu0 %1490 }
 0x4f5   : > { %v1495_v50 = vsub.f32 %v1486_v44, %v1491_v49 }
 0x4f6   : > { %v1499_v51 = vmul.f32 1.442695, %v1496_v48 }
 0x4f7   : > { %v1497_v52 = vmul.f32 1.442695, %v1495_v50  ;;  %v6488_v53 = vpop.permute.xlu1 %6487 }
 0x4f8   : > { %6703 = vpow2.f32 %v1499_v51  ;;  %v6490_v54 = vunpack.i.h.bf16 %v6488_v53  ;;  %v6489_v55 = vunpack.i.l.bf16 %v6488_v53  ;;  %v1559_v18 = vpop.permute.xlu0 %1558 }
 0x4f9   : > { %6705 = vpow2.f32 %v1497_v52 }
 0x4fa   : > { %v6097_v56 = vpack.c.bf16 %v6490_v54, %v6489_v55 }
 0x4fb   : > { %v6493_v61 = vpop.permute.xlu1 %6492 }
 0x4fc   : > { %6099 = vmatprep.subr.msk.bf16.mxu1 %vm8145_vm2, %v6097_v56  ;;  %v6495_v5 = vunpack.i.h.bf16 %v6493_v61  ;;  %v6494_v6 = vunpack.i.l.bf16 %v6493_v61  ;;  %v1890_v23 = vpop.permute.xlu0 %1889 }
 0x4fe   : > { %v6103_v11 = vpack.c.bf16 %v6495_v5, %v6494_v6 }
 0x4ff   : > { %v1557_v62 = vpop.permute.xlu1 %1556 }
 0x500   : > { %v2053_v26 = vpop.permute.xlu0 %2052 }
 0x502   : > { %v6704_v57 = vpop.eup %6703 }
 0x503   : > { %v1504_v58 = vsel %vm1488_vm5, %v6704_v57, 0.0  ;;  %v6706_v59 = vpop.eup %6705 }
 0x504   : > { %1505 = vadd.xlane.f32.xlu1 %v1504_v58  ;;  %v1501_v60 = vsel %vm1488_vm5, %v6706_v59, 0.0  ;;  %v6513_v32 = vpop.permute.xlu0 %6512 }
 0x505   : > { %v6515_v35 = vunpack.i.h.bf16 %v6513_v32  ;;  %v6514_v36 = vunpack.i.l.bf16 %v6513_v32 }
 0x507   : > { %v6127_v37 = vpack.c.bf16 %v6515_v35, %v6514_v36 }
 0x508   : > { %1502 = vadd.xlane.f32.xlu1 %v1501_v60  ;;  %v2220_v40 = vpop.permute.xlu0 %2219 }
 0x50c   : > { %v2383_v44 = vpop.permute.xlu0 %2382 }
 0x510   : > { %v2548_v47 = vpop.permute.xlu0 %2547 }
 0x519   : > { %6497 = vrot.lane.b32.xlu1 %v8137_v28, %s7504_s7 }
 0x51d   : > { %1722 = vrot.lane.b32.xlu1 %v8129_v21, %s7505_s13 }
 0x521   : > { %1724 = vrot.lane.b32.xlu1 %v8131_v24, %s7505_s13 }
 0x525   : > { %6502 = vrot.lane.b32.xlu1 %v8137_v28, %s7507_s9 }
 0x529   : > { %1887 = vrot.lane.b32.xlu1 %v8129_v21, %s7498_s6 }
 0x52d   : > { %6507 = vrot.lane.b32.xlu1 %v8137_v28, %s7508_s3 }
 0x531   : > { %2054 = vrot.lane.b32.xlu1 %v8131_v24, %s7499_s24 }
 0x535   : > { %2217 = vrot.lane.b32.xlu1 %v8129_v21, %s7501_s28 }
 0x539   : > { %6517 = vrot.lane.b32.xlu1 %v8137_v28, %s9046_s29 }
 0x53d   : > { %2384 = vrot.lane.b32.xlu1 %v8131_v24, %s9052_s11 }
 0x541   : > { %2549 = vrot.lane.b32.xlu1 %v8131_v24, %s9048_s10 }
 0x591   : > { %v1506_v63 = vpop.xlane.xlu1 %1505 }
 0x592   : > { %6707 = vrcp.f32 %v1506_v63 }
 0x595   : > { %v1503_v0 = vpop.xlane.xlu1 %1502 }
 0x596   : > { %6709 = vrcp.f32 %v1503_v0 }
 0x599   : > { %v6498_v1 = vpop.permute.xlu1 %6497 }
 0x59a   : > { %v6500_v16 = vunpack.i.h.bf16 %v6498_v1  ;;  %v6499_v17 = vunpack.i.l.bf16 %v6498_v1 }
 0x59c   : > { %v6708_v3 = vpop.eup %6707  ;;  %v6109_v19 = vpack.c.bf16 %v6500_v16, %v6499_v17 }
 0x59d   : > { %v1723_v2 = vpop.permute.xlu1 %1722  ;;  %v1510_v7 = vmul.f32 %v6708_v3, %v6704_v57 }
 0x5a0   : > { %v6710_v4 = vpop.eup %6709 }
 0x5a1   : > { %v1509_v8 = vmul.f32 %v6710_v4, %v6706_v59  ;;  %v1725_v9 = vpop.permute.xlu1 %1724 }
 0x5a3   : > { %v1511_v10 = vpack.c.bf16 %v1510_v7, %v1509_v8 }
 0x5a5   : > { %5765 = vmatmul.mubr.msk.bf16.vlgmr.msra.gmra.mrb[4].mxu1 %vm1488_vm5, %v1511_v10  ;;  %v6503_v13 = vpop.permute.xlu1 %6502 }
 0x5a6   : > { %6102 = vmatpush3.bf16.xpose.msk.msra.mxu1 %vm8145_vm2, %v6097_v56  ;;  %5772 = vmatprep.mubr.msk.f32.mxu1 %vm1400_vm1, %v1557_v62  ;;  %v6505_v21 = vunpack.i.h.bf16 %v6503_v13  ;;  %v6504_v22 = vunpack.i.l.bf16 %v6503_v13 }
 0x5a7   : > { %6105 = vmatprep.subr.msk.bf16.mxu1 %vm8145_vm2, %v6103_v11 }
 0x5a8   : > { %v6115_v25 = vpack.c.bf16 %v6505_v21, %v6504_v22 }
 0x5a9   : > { %v1888_v20 = vpop.permute.xlu1 %1887 }
 0x5ad   : > { %5773 = vmatmul.mubr.msk.f32.vlgmr.msra.gmra.mrb[2].mxu1 %vm1400_vm1, %v1559_v18  ;;  %v6508_v24 = vpop.permute.xlu1 %6507 }
 0x5ae   : > { %6108 = vmatpush3.bf16.xpose.msk.msra.mxu1 %vm8145_vm2, %v6103_v11  ;;  %5785 = vmatprep.mubr.msk.f32.mxu1 %vm1400_vm1, %v1723_v2  ;;  %v6510_v27 = vunpack.i.h.bf16 %v6508_v24  ;;  %v6509_v28 = vunpack.i.l.bf16 %v6508_v24 }
 0x5af   : > { %6111 = vmatprep.subr.msk.bf16.mxu1 %vm8145_vm2, %v6109_v19 }
 0x5b0   : > { %v6121_v31 = vpack.c.bf16 %v6510_v27, %v6509_v28 }
 0x5b1   : > { %v2055_v30 = vpop.permute.xlu1 %2054 }
 0x5b5   : > { %5786 = vmatmul.mubr.msk.f32.vlgmr.msra.gmra.mrb[8].mxu1 %vm1400_vm1, %v1725_v9  ;;  %v2218_v34 = vpop.permute.xlu1 %2217 }
 0x5b6   : > { %6114 = vmatpush3.bf16.xpose.msk.msra.mxu1 %vm8145_vm2, %v6109_v19  ;;  %5798 = vmatprep.mubr.msk.f32.mxu1 %vm1400_vm1, %v1888_v20 }
 0x5b7   : > { %6117 = vmatprep.subr.msk.bf16.mxu1 %vm8145_vm2, %v6115_v25 }
 0x5b9   : > { %v6518_v39 = vpop.permute.xlu1 %6517 }
 0x5ba   : > { %v6520_v42 = vunpack.i.h.bf16 %v6518_v39  ;;  %v6519_v43 = vunpack.i.l.bf16 %v6518_v39 }
 0x5bc   : > { %v6133_v45 = vpack.c.bf16 %v6520_v42, %v6519_v43 }
 0x5bd   : > { %5799 = vmatmul.mubr.msk.f32.vlgmr.msra.gmra.mrb[10].mxu1 %vm1400_vm1, %v1890_v23  ;;  %v2385_v46 = vpop.permute.xlu1 %2384 }
 0x5be   : > { %6120 = vmatpush3.bf16.xpose.msk.msra.mxu1 %vm8145_vm2, %v6115_v25  ;;  %5811 = vmatprep.mubr.msk.f32.mxu1 %vm1400_vm1, %v2053_v26 }
 0x5bf   : > { %6123 = vmatprep.subr.msk.bf16.mxu1 %vm8145_vm2, %v6121_v31 }
 0x5c1   : > { %v2550_v48 = vpop.permute.xlu1 %2549 }
 0x5c5   : > { %5812 = vmatmul.mubr.msk.f32.vlgmr.msra.gmra.mrb[12].mxu1 %vm1400_vm1, %v2055_v30 }
 0x5c6   : > { %6126 = vmatpush3.bf16.xpose.msk.msra.mxu1 %vm8145_vm2, %v6121_v31  ;;  %5824 = vmatprep.mubr.msk.f32.mxu1 %vm1400_vm1, %v2218_v34 }
 0x5c7   : > { %6129 = vmatprep.subr.msk.bf16.mxu1 %vm8145_vm2, %v6127_v37 }
 0x5cd   : > { %5825 = vmatmul.mubr.msk.f32.vlgmr.msra.gmra.mrb[14].mxu1 %vm1400_vm1, %v2220_v40 }
 0x5ce   : > { %6132 = vmatpush3.bf16.xpose.msk.msra.mxu1 %vm8145_vm2, %v6127_v37  ;;  %5837 = vmatprep.mubr.msk.f32.mxu1 %vm1400_vm1, %v2383_v44 }
 0x5cf   : > { %6135 = vmatprep.subr.msk.bf16.mxu1 %vm8145_vm2, %v6133_v45 }
 0x5d5   : > { %5838 = vmatmul.mubr.msk.f32.vlgmr.msra.gmra.mrb[16].mxu1 %vm1400_vm1, %v2385_v46 }
 0x5d6   : > { %6138 = vmatpush3.bf16.xpose.msk.msra.mxu1 %vm8145_vm2, %v6133_v45  ;;  %5850 = vmatprep.mubr.msk.f32.mxu1 %vm1400_vm1, %v2548_v47 }
 0x5dd   : > { %5851 = vmatmul.mubr.msk.f32.vlgmr.msra.gmra.mrb[18].mxu1 %vm1400_vm1, %v2550_v48 }
 0x678   : > { %v8262_v49 = vpop.f32.mrb[4].mxu1 }
 0x679   : > { %v5766_v50 = vpop.f32.mrb[5].mxu1 }
 0x67a   : > { %v8264_v51 = vpop.f32.mrb[6].mxu1 }
 0x67b   : > { %v5767_v52 = vpop.f32.mrb[7].mxu1 }
 0x680   : > { %v5774_v53 = vpop.f32.mrb[2].mxu1 }
 0x681   : > { %v1648_v54 = vmul.f32 0.35355338, %v5774_v53  ;;  %v1638_v55 = vpop.f32.mrb[3].mxu1 }
 0x682   : > { %v1647_v56 = vmul.f32 0.35355338, %v1638_v55 }
 0x683   : > { %v8267_v57 = vadd.f32 %v1648_v54, %v8162_v38 }
 0x684   : > { %v8270_v58 = vadd.f32 %v1647_v56, %v8165_v41 }
 0x685   : > { %v1654_v59 = vsel %vm1488_vm5, %v8267_v57, -inf }
 0x686   : > { %1655 = vmax.xlane.f32.xlu1 %v1654_v59  ;;  %v1651_v60 = vsel %vm1488_vm5, %v8270_v58, -inf }
 0x687   : > { %1652 = vmax.xlane.f32.xlu0 %v1651_v60 }
 0x688   : > { %v5787_v61 = vpop.f32.mrb[8].mxu1 }
 0x689   : > { %v1804_v62 = vpop.f32.mrb[9].mxu1  ;;  %v1814_v63 = vmul.f32 0.35355338, %v5787_v61 }
 0x68a   : > { %v1813_v0 = vmul.f32 0.35355338, %v1804_v62 }
 0x68b   : > { %v8282_v3 = vadd.f32 %v1814_v63, %v8162_v38 }
 0x68c   : > { %v8277_v1 = vadd.f32 %v1813_v0, %v8165_v41 }
 0x68d   : > { %v1820_v7 = vsel %vm1488_vm5, %v8282_v3, -inf }
 0x68e   : > { %v1817_v2 = vsel %vm1488_vm5, %v8277_v1, -inf }
 0x68f   : > { %1818 = vmax.xlane.f32.xlu0 %v1817_v2 }
 0x690   : > { %v5800_v4 = vpop.f32.mrb[10].mxu1 }
 0x691   : > { %v1979_v5 = vmul.f32 0.35355338, %v5800_v4  ;;  %v1969_v6 = vpop.f32.mrb[11].mxu1 }
 0x692   : > { %v1978_v32 = vmul.f32 0.35355338, %v1969_v6 }
 0x693   : > { %1821 = vmax.xlane.f32.xlu0 %v1820_v7  ;;  %v8287_v8 = vadd.f32 %v1979_v5, %v8162_v38 }
 0x694   : > { %v8314_v37 = vadd.f32 %v1978_v32, %v8165_v41 }
 0x695   : > { %v1985_v9 = vsel %vm1488_vm5, %v8287_v8, -inf }
 0x696   : > { %v1982_v40 = vsel %vm1488_vm5, %v8314_v37, -inf }
 0x697   : > { %1986 = vmax.xlane.f32.xlu0 %v1985_v9  ;;  %1675 = vrot.lane.b32.xlu1 %v8139_v29, %s7497_s23 }
 0x698   : > { %v5813_v10 = vpop.f32.mrb[12].mxu1 }
 0x699   : > { %v2144_v11 = vmul.f32 0.35355338, %v5813_v10  ;;  %v2134_v13 = vpop.f32.mrb[13].mxu1 }
 0x69a   : > { %v2143_v36 = vmul.f32 0.35355338, %v2134_v13 }
 0x69b   : > { %v8294_v16 = vadd.f32 %v2144_v11, %v8162_v38 }
 0x69c   : > { %v8319_v42 = vadd.f32 %v2143_v36, %v8165_v41 }
 0x69d   : > { %v2150_v17 = vsel %vm1488_vm5, %v8294_v16, -inf }
 0x69e   : > { %2151 = vmax.xlane.f32.xlu0 %v2150_v17 }
 0x6a0   : > { %v5826_v18 = vpop.f32.mrb[14].mxu1 }
 0x6a1   : > { %v2309_v19 = vmul.f32 0.35355338, %v5826_v18  ;;  %v2299_v20 = vpop.f32.mrb[15].mxu1 }
 0x6a2   : > { %v2308_v39 = vmul.f32 0.35355338, %v2299_v20 }
 0x6a3   : > { %v8299_v21 = vadd.f32 %v2309_v19, %v8162_v38 }
 0x6a4   : > { %v8324_v44 = vadd.f32 %v2308_v39, %v8165_v41 }
 0x6a5   : > { %v2315_v22 = vsel %vm1488_vm5, %v8299_v21, -inf }
 0x6a6   : > { %2316 = vmax.xlane.f32.xlu0 %v2315_v22  ;;  %v2312_v46 = vsel %vm1488_vm5, %v8324_v44, -inf }
 0x6a8   : > { %v5839_v23 = vpop.f32.mrb[16].mxu1 }
 0x6a9   : > { %v2474_v24 = vmul.f32 0.35355338, %v5839_v23  ;;  %v2464_v25 = vpop.f32.mrb[17].mxu1 }
 0x6aa   : > { %v2473_v43 = vmul.f32 0.35355338, %v2464_v25 }
 0x6ab   : > { %v8304_v26 = vadd.f32 %v2474_v24, %v8162_v38 }
 0x6ac   : > { %v8329_v47 = vadd.f32 %v2473_v43, %v8165_v41 }
 0x6ad   : > { %v2480_v27 = vsel %vm1488_vm5, %v8304_v26, -inf }
 0x6ae   : > { %2481 = vmax.xlane.f32.xlu0 %v2480_v27  ;;  %v2477_v48 = vsel %vm1488_vm5, %v8329_v47, -inf }
 0x6b0   : > { %v5852_v28 = vpop.f32.mrb[18].mxu1 }
 0x6b1   : > { %v2639_v30 = vmul.f32 0.35355338, %v5852_v28  ;;  %v2629_v31 = vpop.f32.mrb[19].mxu1 }
 0x6b2   : > { %v2638_v45 = vmul.f32 0.35355338, %v2629_v31 }
 0x6b3   : > { %v8309_v34 = vadd.f32 %v2639_v30, %v8162_v38  ;;  %v2147_v38 = vsel %vm1488_vm5, %v8319_v42, -inf }
 0x6b4   : > { %v8334_v50 = vadd.f32 %v2638_v45, %v8165_v41 }
 0x6b5   : > { %v2645_v35 = vsel %vm1488_vm5, %v8309_v34, -inf }
 0x6b6   : > { %2646 = vmax.xlane.f32.xlu0 %v2645_v35  ;;  %v2642_v52 = vsel %vm1488_vm5, %v8334_v50, -inf }
 0x6bb   : > { %1983 = vmax.xlane.f32.xlu1 %v1982_v40 }
 0x6bf   : > { %2148 = vmax.xlane.f32.xlu1 %v2147_v38 }
 0x6c3   : > { %2313 = vmax.xlane.f32.xlu1 %v2312_v46 }
 0x6c7   : > { %2478 = vmax.xlane.f32.xlu1 %v2477_v48 }
 0x6cb   : > { %2643 = vmax.xlane.f32.xlu1 %v2642_v52 }
 0x6cc   : > { %1840 = vrot.lane.b32.xlu0 %v8139_v29, %s7505_s13 }
 0x6dc   : > { %2005 = vrot.lane.b32.xlu1 %v8139_v29, %s7498_s6 }
 0x713   : > { %v1656_v53 = vpop.xlane.xlu1 %1655 }
 0x714   : > { %v1658_v54 = vsub.f32 %v8267_v57, %v1656_v53  ;;  %v1653_v55 = vpop.xlane.xlu0 %1652 }
 0x715   : > { %v1657_v56 = vsub.f32 %v8270_v58, %v1653_v55 }
 0x716   : > { %v1661_v59 = vmul.f32 1.442695, %v1658_v54 }
 0x717   : > { %v1659_v41 = vmul.f32 1.442695, %v1657_v56  ;;  %v1676_v60 = vpop.permute.xlu1 %1675 }
 0x718   : > { %6711 = vpow2.f32 %v1661_v59  ;;  %5776 = vmatpush3.bf16.msra.mxu0 %v1676_v60 }
 0x719   : > { %6713 = vpow2.f32 %v1659_v41  ;;  %5788 = vmatprep.subr.bf16.mxu0 %v7493_v12 }
 0x71c   : > { %v1819_v61 = vpop.xlane.xlu0 %1818 }
 0x71d   : > { %v1823_v62 = vsub.f32 %v8277_v1, %v1819_v61 }
 0x71f   : > { %v1825_v63 = vmul.f32 1.442695, %v1823_v62 }
 0x720   : > { %v1822_v0 = vpop.xlane.xlu0 %1821 }
 0x721   : > { %6715 = vpow2.f32 %v1825_v63  ;;  %v1824_v2 = vsub.f32 %v8282_v3, %v1822_v0 }
 0x722   : > { %v8347_v57 = vpop.eup %6711 }
 0x723   : > { %v8349_v4 = vpop.eup %6713  ;;  %v1827_v58 = vmul.f32 1.442695, %v1824_v2  ;;  %v1666_v5 = vsel %vm1488_vm5, %v8347_v57, 0.0 }
 0x724   : > { %v1987_v6 = vpop.xlane.xlu0 %1986  ;;  %1667 = vadd.xlane.f32.xlu0 %v1666_v5  ;;  %v1663_v7 = vsel %vm1488_vm5, %v8349_v4, 0.0 }
 0x725   : > { %6717 = vpow2.f32 %v1827_v58  ;;  %v1989_v1 = vsub.f32 %v8287_v8, %v1987_v6  ;;  %1664 = vadd.xlane.f32.xlu1 %v1663_v7 }
 0x727   : > { %v1992_v9 = vmul.f32 1.442695, %v1989_v1 }
 0x729   : > { %6719 = vpow2.f32 %v1992_v9 }
 0x72b   : > { %v8356_v3 = vpop.eup %6715  ;;  %v2152_v10 = vpop.xlane.xlu0 %2151 }
 0x72c   : > { %v2154_v11 = vsub.f32 %v8294_v16, %v2152_v10  ;;  %v1829_v13 = vsel %vm1488_vm5, %v8356_v3, 0.0 }
 0x72d   : > { %1830 = vadd.xlane.f32.xlu1 %v1829_v13 }
 0x72e   : > { %v2157_v17 = vmul.f32 1.442695, %v2154_v11 }
 0x72f   : > { %v8361_v18 = vpop.eup %6717 }
 0x730   : > { %6721 = vpow2.f32 %v2157_v17  ;;  %v1832_v19 = vsel %vm1488_vm5, %v8361_v18, 0.0 }
 0x731   : > { %1833 = vadd.xlane.f32.xlu0 %v1832_v19 }
 0x733   : > { %v8365_v8 = vpop.eup %6719  ;;  %v2317_v20 = vpop.xlane.xlu0 %2316 }
 0x734   : > { %v2319_v22 = vsub.f32 %v8299_v21, %v2317_v20  ;;  %v1997_v16 = vsel %vm1488_vm5, %v8365_v8, 0.0 }
 0x735   : > { %1998 = vadd.xlane.f32.xlu0 %v1997_v16 }
 0x736   : > { %v2322_v23 = vmul.f32 1.442695, %v2319_v22 }
 0x738   : > { %6723 = vpow2.f32 %v2322_v23 }
 0x73a   : > { %v8370_v24 = vpop.eup %6721 }
 0x73b   : > { %v2162_v25 = vsel %vm1488_vm5, %v8370_v24, 0.0  ;;  %v2482_v32 = vpop.xlane.xlu0 %2481 }
 0x73c   : > { %2163 = vadd.xlane.f32.xlu0 %v2162_v25  ;;  %v2484_v39 = vsub.f32 %v8304_v26, %v2482_v32 }
 0x73e   : > { %v2487_v46 = vmul.f32 1.442695, %v2484_v39 }
 0x742   : > { %v8374_v27 = vpop.eup %6723 }
 0x743   : > { %v2327_v28 = vsel %vm1488_vm5, %v8374_v27, 0.0  ;;  %v2647_v43 = vpop.xlane.xlu0 %2646 }
 0x744   : > { %2328 = vadd.xlane.f32.xlu0 %v2327_v28  ;;  %v2649_v48 = vsub.f32 %v8309_v34, %v2647_v43 }
 0x746   : > { %v2652_v54 = vmul.f32 1.442695, %v2649_v48 }
 0x747   : > { %v1841_v7 = vpop.permute.xlu0 %1840 }
 0x748   : > { %v1984_v30 = vpop.xlane.xlu1 %1983 }
 0x749   : > { %v1988_v21 = vsub.f32 %v8314_v37, %v1984_v30 }
 0x74b   : > { %v1990_v31 = vmul.f32 1.442695, %v1988_v21 }
 0x74c   : > { %v2149_v35 = vpop.xlane.xlu1 %2148 }
 0x74d   : > { %6725 = vpow2.f32 %v1990_v31  ;;  %v2153_v36 = vsub.f32 %v8319_v42, %v2149_v35 }
 0x74f   : > { %v2155_v40 = vmul.f32 1.442695, %v2153_v36 }
 0x750   : > { %v2314_v38 = vpop.xlane.xlu1 %2313 }
 0x751   : > { %6727 = vpow2.f32 %v2155_v40  ;;  %v2318_v45 = vsub.f32 %v8324_v44, %v2314_v38 }
 0x753   : > { %v2320_v52 = vmul.f32 1.442695, %v2318_v45 }
 0x754   : > { %v2479_v53 = vpop.xlane.xlu1 %2478 }
 0x755   : > { %6729 = vpow2.f32 %v2320_v52  ;;  %v2483_v2 = vsub.f32 %v8329_v47, %v2479_v53 }
 0x756   : > { %6731 = vpow2.f32 %v2487_v46 }
 0x757   : > { %v8383_v37 = vpop.eup %6725  ;;  %6733 = vpow2.f32 %v2652_v54  ;;  %v2485_v58 = vmul.f32 1.442695, %v2483_v2 }
 0x758   : > { %v2644_v55 = vpop.xlane.xlu1 %2643  ;;  %v1994_v26 = vsel %vm1488_vm5, %v8383_v37, 0.0 }
 0x759   : > { %v2648_v42 = vsub.f32 %v8334_v50, %v2644_v55  ;;  %1995 = vadd.xlane.f32.xlu1 %v1994_v26 }
 0x75b   : > { %v8388_v56 = vpop.eup %6727  ;;  %v2650_v44 = vmul.f32 1.442695, %v2648_v42 }
 0x75c   : > { %v2159_v34 = vsel %vm1488_vm5, %v8388_v56, 0.0  ;;  %v2006_v1 = vpop.permute.xlu1 %2005 }
 0x75d   : > { %2160 = vadd.xlane.f32.xlu1 %v2159_v34  ;;  %6735 = vpow2.f32 %v2650_v44 }
 0x75e   : > { %6737 = vpow2.f32 %v2485_v58 }
 0x75f   : > { %v8392_v59 = vpop.eup %6729 }
 0x760   : > { %v2324_v41 = vsel %vm1488_vm5, %v8392_v59, 0.0  ;;  %v8396_v60 = vpop.eup %6731 }
 0x761   : > { %2325 = vadd.xlane.f32.xlu0 %v2324_v41  ;;  %v2492_v50 = vsel %vm1488_vm5, %v8396_v60, 0.0  ;;  %v8400_v61 = vpop.eup %6733 }
 0x762   : > { %v2657_v62 = vsel %vm1488_vm5, %v8400_v61, 0.0 }
 0x765   : > { %2493 = vadd.xlane.f32.xlu0 %v2492_v50 }
 0x767   : > { %v8404_v63 = vpop.eup %6735 }
 0x768   : > { %v2654_v0 = vsel %vm1488_vm5, %v8404_v63, 0.0  ;;  %v8413_v5 = vpop.eup %6737 }
 0x769   : > { %2658 = vadd.xlane.f32.xlu0 %v2657_v62  ;;  %v2489_v6 = vsel %vm1488_vm5, %v8413_v5, 0.0 }
 0x76d   : > { %2655 = vadd.xlane.f32.xlu0 %v2654_v0 }
 0x76e   : > { %2170 = vrot.lane.b32.xlu1 %v8139_v29, %s7499_s24 }
 0x783   : > { %2335 = vrot.lane.b32.xlu0 %v8139_v29, %s7501_s28 }
 0x792   : > { %2490 = vadd.xlane.f32.xlu1 %v2489_v6 }
 0x7a3   : > { %2500 = vrot.lane.b32.xlu1 %v8139_v29, %s9052_s11 }
 0x7a7   : > { %2665 = vrot.lane.b32.xlu1 %v8139_v29, %s9048_s10  ;;  %s9136_s10 = sld [smem:[#allocation50_spill]] }
 0x7b1   : > { %v1668_v47 = vpop.xlane.xlu0 %1667 }
 0x7b2   : > { %6739 = vrcp.f32 %v1668_v47  ;;  %v1665_v9 = vpop.xlane.xlu1 %1664 }
 0x7b3   : > { %6741 = vrcp.f32 %v1665_v9 }
 0x7ba   : > { %v1831_v10 = vpop.xlane.xlu1 %1830 }
 0x7bb   : > { %6743 = vrcp.f32 %v1831_v10 }
 0x7bc   : > { %v6740_v11 = vpop.eup %6739 }
 0x7bd   : > { %v6742_v13 = vpop.eup %6741  ;;  %v1672_v17 = vmul.f32 %v6740_v11, %v8347_v57 }
 0x7be   : > { %v1671_v19 = vmul.f32 %v6742_v13, %v8349_v4  ;;  %v1834_v20 = vpop.xlane.xlu0 %1833 }
 0x7bf   : > { %6745 = vrcp.f32 %v1834_v20 }
 0x7c0   : > { %v1673_v22 = vpack.c.bf16 %v1672_v17, %v1671_v19 }
 0x7c2   : > { %5778 = vmatmul.mubr.msk.bf16.vlgmr.msra.gmra.mrb[4].mxu0 %vm1488_vm5, %v1673_v22  ;;  %v1999_v4 = vpop.xlane.xlu0 %1998 }
 0x7c3   : > { %5789 = vmatpush3.bf16.msra.mxu0 %v1841_v7  ;;  %5790 = vmatprep.mubr.msk.bf16.mxu0 %vm7506_vm6, %v7493_v12  ;;  %6747 = vrcp.f32 %v1999_v4 }
 0x7c4   : > { %5801 = vmatprep.subr.bf16.mxu0 %v7493_v12 }
 0x7c5   : > { %v6744_v29 = vpop.eup %6743 }
 0x7c6   : > { %v1837_v23 = vmul.f32 %v6744_v29, %v8356_v3 }
 0x7c9   : > { %v6746_v16 = vpop.eup %6745  ;;  %v2164_v28 = vpop.xlane.xlu0 %2163 }
 0x7ca   : > { %v1838_v57 = vmul.f32 %v6746_v16, %v8361_v18 }
 0x7cc   : > { %v1839_v25 = vpack.c.bf16 %v1838_v57, %v1837_v23 }
 0x7cd   : > { %v6748_v18 = vpop.eup %6747 }
 0x7ce   : > { %5791 = vmatmul.mubr.msk.bf16.vlgmr.msra.gmra.mrb[8].mxu0 %vm1488_vm5, %v1839_v25  ;;  %v2003_v35 = vmul.f32 %v6748_v18, %v8365_v8  ;;  %v6675_v25 = vld [vmem:[#allocation11] sm:$0xff]  }
 0x7cf   : > { %5802 = vmatpush3.bf16.msra.mxu0 %v2006_v1  ;;  %5803 = vmatprep.mubr.msk.bf16.mxu0 %vm7506_vm6, %v7493_v12 }
 0x7d0   : > { %5814 = vmatprep.subr.bf16.mxu0 %v7493_v12 }
 0x7d1   : > { %v2329_v21 = vpop.xlane.xlu0 %2328 }
 0x7e6   : > { %v1996_v30 = vpop.xlane.xlu1 %1995 }
 0x7e7   : > { %6749 = vrcp.f32 %v1996_v30 }
 0x7ea   : > { %v2161_v31 = vpop.xlane.xlu1 %2160 }
 0x7eb   : > { %6751 = vrcp.f32 %v2161_v31 }
 0x7ec   : > { %6753 = vrcp.f32 %v2164_v28 }
 0x7ee   : > { %v2326_v3 = vpop.xlane.xlu0 %2325  ;;  %v2171_v38 = vpop.permute.xlu1 %2170 }
 0x7ef   : > { %6755 = vrcp.f32 %v2326_v3 }
 0x7f0   : > { %6757 = vrcp.f32 %v2329_v21 }
 0x7f1   : > { %v6750_v32 = vpop.eup %6749 }
 0x7f2   : > { %v2002_v36 = vmul.f32 %v6750_v32, %v8383_v37  ;;  %v2494_v39 = vpop.xlane.xlu0 %2493  ;;  %v6676_v32 = vld [vmem:[#allocation11 + $0x8] sm:$0xff]  }
 0x7f3   : > { %6759 = vrcp.f32 %v2494_v39 }
 0x7f4   : > { %v2004_v40 = vpack.c.bf16 %v2003_v35, %v2002_v36  ;;  %v6677_v35 = vld [vmem:[#allocation11 + $0x10] sm:$0xff]  }
 0x7f5   : > { %v6752_v43 = vpop.eup %6751 }
 0x7f6   : > { %v2659_v45 = vpop.xlane.xlu0 %2658  ;;  %5804 = vmatmul.mubr.msk.bf16.vlgmr.msra.gmra.mrb[12].mxu0 %vm1488_vm5, %v2004_v40  ;;  %v6754_v46 = vpop.eup %6753  ;;  %v2167_v48 = vmul.f32 %v6752_v43, %v8388_v56  ;;  %v6678_v43 = vld [vmem:[#allocation11 + $0x18] sm:$0xff]  }
 0x7f7   : > { %5815 = vmatpush3.bf16.msra.mxu0 %v2171_v38  ;;  %5816 = vmatprep.mubr.msk.bf16.mxu0 %vm7506_vm6, %v7493_v12  ;;  %v2168_v8 = vmul.f32 %v6754_v46, %v8370_v24 }
 0x7f8   : > { %5827 = vmatprep.subr.bf16.mxu0 %v7493_v12 }
 0x7f9   : > { %v2169_v53 = vpack.c.bf16 %v2168_v8, %v2167_v48  ;;  %v6756_v37 = vpop.eup %6755 }
 0x7fa   : > { %v2656_v52 = vpop.xlane.xlu0 %2655  ;;  %v6758_v55 = vpop.eup %6757  ;;  %v2332_v26 = vmul.f32 %v6756_v37, %v8392_v59 }
 0x7fb   : > { %v2333_v42 = vmul.f32 %v6758_v55, %v8374_v27 }
 0x7fd   : > { %v2334_v56 = vpack.c.bf16 %v2333_v42, %v2332_v26  ;;  %v6760_v34 = vpop.eup %6759 }
 0x7fe   : > { %v2336_v54 = vpop.permute.xlu0 %2335  ;;  %5817 = vmatmul.mubr.msk.bf16.vlgmr.msra.gmra.mrb[16].mxu0 %vm1488_vm5, %v2169_v53  ;;  %v2498_v41 = vmul.f32 %v6760_v34, %v8396_v60 }
 0x7ff   : > { %5828 = vmatpush3.bf16.msra.mxu0 %v2336_v54  ;;  %5829 = vmatprep.mubr.msk.bf16.mxu0 %vm7506_vm6, %v7493_v12 }
 0x800   : > { %5840 = vmatprep.subr.bf16.mxu0 %v7493_v12 }
 0x806   : > { %5830 = vmatmul.mubr.msk.bf16.vlgmr.msra.gmra.mrb[20].mxu0 %vm1488_vm5, %v2334_v56 }
 0x807   : > { %5842 = vmatprep.mubr.msk.bf16.mxu0 %vm7506_vm6, %v7493_v12 }
 0x81f   : > { %v2491_v24 = vpop.xlane.xlu1 %2490 }
 0x820   : > { %6761 = vrcp.f32 %v2491_v24 }
 0x821   : > { %6763 = vrcp.f32 %v2656_v52 }
 0x822   : > { %6765 = vrcp.f32 %v2659_v45 }
 0x823   : > { %v2501_v44 = vpop.permute.xlu1 %2500 }
 0x824   : > { %5841 = vmatpush3.bf16.msra.mxu0 %v2501_v44 }
 0x825   : > { %5853 = vmatprep.subr.bf16.mxu0 %v7493_v12 }
 0x827   : > { %v2666_v0 = vpop.permute.xlu1 %2665 }
 0x82a   : > { %v6762_v59 = vpop.eup %6761 }
 0x82b   : > { %v2497_v27 = vmul.f32 %v6762_v59, %v8413_v5  ;;  %v6764_v62 = vpop.eup %6763 }
 0x82c   : > { %v6766_v2 = vpop.eup %6765  ;;  %v2662_v58 = vmul.f32 %v6764_v62, %v8404_v63 }
 0x82d   : > { %v2499_v50 = vpack.c.bf16 %v2498_v41, %v2497_v27  ;;  %v2663_v6 = vmul.f32 %v6766_v2, %v8400_v61 }
 0x82f   : > { %5843 = vmatmul.mubr.msk.bf16.vlgmr.msra.gmra.mrb[24].mxu0 %vm1488_vm5, %v2499_v50  ;;  %v2664_v7 = vpack.c.bf16 %v2663_v6, %v2662_v58 }
 0x830   : > { %5854 = vmatpush3.bf16.msra.mxu0 %v2666_v0  ;;  %5855 = vmatprep.mubr.msk.bf16.mxu0 %vm7506_vm6, %v7493_v12 }
 0x831   : > { %5859 = vmatprep.subr.bf16.mxu0 %v7493_v12 }
 0x837   : > { %5856 = vmatmul.mubr.msk.bf16.vlgmr.msra.gmra.mrb[28].mxu0 %vm1488_vm5, %v2664_v7 }
 0x838   : > { %5867 = vmatprep.mubr.msk.bf16.mxu0 %vm7506_vm6, %v7493_v12  ;;  %5860 = vmatpush3.bf16.msra.mxu0 %v6675_v25 }
 0x839   : > { %5861 = vmatprep.subr.bf16.mxu0 %v7493_v12 }
 0x83c   : > { %5862 = vmatpush3.bf16.msra.mxu0 %v6676_v32 }
 0x83d   : > { %5863 = vmatprep.subr.bf16.mxu0 %v7493_v12 }
 0x840   : > { %5864 = vmatpush3.bf16.msra.mxu0 %v6677_v35 }
 0x841   : > { %5865 = vmatprep.subr.bf16.mxu0 %v7493_v12 }
 0x844   : > { %5866 = vmatpush3.bf16.msra.mxu0 %v6678_v43 }
 0x845   : > { %5871 = vmatprep.subr.bf16.mxu0 %v7493_v12 }
 0x895   : > { %v1715_v60 = vpop.f32.mrb[4].mxu0 }
 0x896   : > { %v5779_v5 = vpop.f32.mrb[5].mxu0 }
 0x897   : > { %v1718_v1 = vpop.f32.mrb[6].mxu0 }
 0x898   : > { %v6521_v47 = vpack.i.bf16 %v1718_v1, %v1715_v60  ;;  %v5780_v9 = vpop.f32.mrb[7].mxu0 }
 0x89a   : > { %6522 = vrot.lane.b32.xlu1 %v6521_v47, %s9046_s29  ;;  %s9135_s29 = smov 56  }
 0x8a1   : > { %v1880_v10 = vpop.f32.mrb[8].mxu0 }
 0x8a2   : > { %v5792_v11 = vpop.f32.mrb[9].mxu0 }
 0x8a3   : > { %v1883_v63 = vpop.f32.mrb[10].mxu0 }
 0x8a4   : > { %v6526_v13 = vpack.i.bf16 %v1883_v63, %v1880_v10  ;;  %v5793_v17 = vpop.f32.mrb[11].mxu0 }
 0x8a6   : > { %6527 = vrot.lane.b32.xlu1 %v6526_v13, %s9050_s0 }
 0x8c9   : > { %v2045_v61 = vpop.f32.mrb[12].mxu0 }
 0x8ca   : > { %v5805_v19 = vpop.f32.mrb[13].mxu0 }
 0x8cb   : > { %v2048_v20 = vpop.f32.mrb[14].mxu0 }
 0x8cc   : > { %v6531_v22 = vpack.i.bf16 %v2048_v20, %v2045_v61  ;;  %v5806_v29 = vpop.f32.mrb[15].mxu0 }
 0x8ce   : > { %6532 = vrot.lane.b32.xlu1 %v6531_v22, %s7508_s3 }
 0x8d1   : > { %v2210_v16 = vpop.f32.mrb[16].mxu0 }
 0x8d2   : > { %v5818_v23 = vpop.f32.mrb[17].mxu0 }
 0x8d3   : > { %v2213_v57 = vpop.f32.mrb[18].mxu0 }
 0x8d4   : > { %v6536_v4 = vpack.i.bf16 %v2213_v57, %v2210_v16  ;;  %v5819_v28 = vpop.f32.mrb[19].mxu0  ;;  %v5485_v16 = vld [vmem:[%s9136_s10] ss:$0 sm:$0xff]  ;;  %s8503_s10 = scalar_select %p1255_p10, %s7693_s26, 1 }
 0x8d6   : > { %6537 = vrot.lane.b32.xlu0 %v6536_v4, %s7507_s9  ;;  %s6235_s0 = smul.u32 24, %s8503_s10 }
 0x8d9   : > { %v2375_v30 = vpop.f32.mrb[20].mxu0 }
 0x8da   : > { %v5831_v21 = vpop.f32.mrb[21].mxu0 }
 0x8db   : > { %v2378_v31 = vpop.f32.mrb[22].mxu0  ;;  %v6851_v21 = vld [vmem:[%s8063_s12] sm:$0xff] }
 0x8dc   : > { %v6541_v3 = vpack.i.bf16 %v2378_v31, %v2375_v30  ;;  %v5832_v18 = vpop.f32.mrb[23].mxu0 }
 0x8dd   : > { %v6852_v18 = vld [vmem:[%s8063_s12 + $0x8] sm:$0xff]  ;;  %s9137_s12 = sld [smem:[#allocation42_spill]] }
 0x8de   : > { %6542 = vrot.lane.b32.xlu1 %v6541_v3, %s7504_s7 }
 0x8e3   : > { %s1259_s11 = scalar_lea.vmem %s9137_s12, %s6235_s0  ;;  %s9138_s0 = sld [smem:[#allocation44_spill]] }
 0x8e4   : > { %s9139_s12 = sld [smem:[#allocation53_spill]] }
 0x902   : > { %v2540_v36 = vpop.f32.mrb[24].mxu0 }
 0x903   : > { %v5844_v39 = vpop.f32.mrb[25].mxu0 }
 0x904   : > { %v2543_v40 = vpop.f32.mrb[26].mxu0 }
 0x905   : > { %v6546_v38 = vpack.i.bf16 %v2543_v40, %v2540_v36  ;;  %v5845_v45 = vpop.f32.mrb[27].mxu0 }
 0x907   : > { %6547 = vrot.lane.b32.xlu0 %v6546_v38, %s7496_s4 }
 0x90a   : > { %v2705_v46 = vpop.f32.mrb[28].mxu0 }
 0x90b   : > { %v5857_v48 = vpop.f32.mrb[29].mxu0 }
 0x90c   : > { %v2708_v8 = vpop.f32.mrb[30].mxu0  ;;  %v6523_v37 = vpop.permute.xlu1 %6522 }
 0x90d   : > { %v6551_v52 = vpack.i.bf16 %v2708_v8, %v2705_v46  ;;  %v5858_v53 = vpop.f32.mrb[31].mxu0  ;;  %v6525_v42 = vunpack.i.h.bf16 %v6523_v37  ;;  %v6524_v56 = vunpack.i.l.bf16 %v6523_v37 }
 0x90f   : > { %6552 = vrot.lane.b32.xlu1 %v6551_v52, %s9135_s29  ;;  %v2769_v0 = vsel %vm1400_vm1, %v8264_v51, %v6525_v42  ;;  %v2768_v2 = vsel %vm1400_vm1, %v8262_v49, %v6524_v56 }
 0x918   : > { %v6528_v54 = vpop.permute.xlu1 %6527 }
 0x919   : > { %v6530_v24 = vunpack.i.h.bf16 %v6528_v54  ;;  %v6529_v44 = vunpack.i.l.bf16 %v6528_v54 }
 0x91b   : > { %v2770_v7 = vsel %vm1488_vm5, %v2768_v2, %v6529_v44  ;;  %v2771_v60 = vsel %vm1488_vm5, %v2769_v0, %v6530_v24  ;;  %v5491_v24 = vld [vmem:[#allocation13] ss:$0 sm:$0xff] }
 0x940   : > { %v6533_v55 = vpop.permute.xlu1 %6532 }
 0x941   : > { %v6535_v59 = vunpack.i.h.bf16 %v6533_v55  ;;  %v6534_v41 = vunpack.i.l.bf16 %v6533_v55 }
 0x943   : > { %v2773_v47 = vsel %vm2772_vm7, %v2770_v7, %v6534_v41  ;;  %v2774_v9 = vsel %vm2772_vm7, %v2771_v60, %v6535_v59  ;;  %v6679_v60 = vld [vmem:[#allocation20] sm:$0xff]  }
 0x944   : > { %5883 = vmatprep.subr.bf16.mxu1 %v6679_v60 }
 0x945   : > { %5884 = vmatpush3.bf16.msra.mxu1 %v6679_v60 }
 0x948   : > { %v6538_v26 = vpop.permute.xlu0 %6537 }
 0x949   : > { %v6540_v50 = vunpack.i.h.bf16 %v6538_v26  ;;  %v6539_v62 = vunpack.i.l.bf16 %v6538_v26 }
 0x94b   : > { %v2776_v10 = vsel %vm2775_vm8, %v2773_v47, %v6539_v62  ;;  %v2777_v51 = vsel %vm2775_vm8, %v2774_v9, %v6540_v50  ;;  %v2968_v47 = vld [vmem:[%s1259_s11 + $0x8] sm:$0xff] }
 0x950   : > { %v6543_v34 = vpop.permute.xlu1 %6542 }
 0x951   : > { %v6545_v58 = vunpack.i.h.bf16 %v6543_v34  ;;  %v6544_v6 = vunpack.i.l.bf16 %v6543_v34  ;;  %v5492_v34 = vld [vmem:[#allocation14] ss:$0 sm:$0xff] }
 0x953   : > { %v2779_v11 = vsel %vm2778_vm9, %v2776_v10, %v6544_v6  ;;  %v2780_v63 = vsel %vm2778_vm9, %v2777_v51, %v6545_v58  ;;  %v6681_v10 = vld [vmem:[#allocation20 + $0x10] sm:$0xff]   ;;  %v6682_v51 = vld [vmem:[#allocation20 + $0x18] sm:$0xff]  }
 0x979   : > { %v6548_v27 = vpop.permute.xlu0 %6547 }
 0x97a   : > { %v6550_v5 = vunpack.i.h.bf16 %v6548_v27  ;;  %v6549_v1 = vunpack.i.l.bf16 %v6548_v27 }
 0x97c   : > { %v2782_v61 = vsel %vm2781_vm10, %v2779_v11, %v6549_v1  ;;  %v2783_v19 = vsel %vm2781_vm10, %v2780_v63, %v6550_v5  ;;  %v6680_v5 = vld [vmem:[#allocation20 + $0x8] sm:$0xff]  }
 0x97d   : > { %v2967_v1 = vld [vmem:[%s1259_s11] sm:$0xff]  ;;  %5885 = vmatprep.subr.bf16.mxu1 %v6680_v5 }
 0x97e   : > { %v3055_v9 = vpack.c.bf16 %v2968_v47, %v2967_v1  ;;  %5886 = vmatpush3.bf16.msra.mxu1 %v6680_v5  ;;  %v2970_v11 = vld [vmem:[%s8071_s22] sm:$0xff]  ;;  %s5598_s22 = sshll.u32 %s8503_s10, 4  ;;  %s9140_s10 = smov 64  }
 0x97f   : > { %5887 = vmatprep.subr.bf16.mxu1 %v6681_v10 }
 0x980   : > { %5891 = vmatprep.mubr.msk.bf16.mxu1 %vm1331_vm0, %v3055_v9 }
 0x981   : > { %v6553_v49 = vpop.permute.xlu1 %6552 }
 0x982   : > { %v6555_v13 = vunpack.i.h.bf16 %v6553_v49  ;;  %v6554_v17 = vunpack.i.l.bf16 %v6553_v49  ;;  %v2969_v49 = vld [vmem:[%s1259_s11 + $0x10] sm:$0xff]  ;;  %5888 = vmatpush3.bf16.msra.mxu1 %v6681_v10  ;;  %s1264_s11 = scalar_lea.vmem %s9138_s0, %s5598_s22  ;;  %v5495_v10 = vld [vmem:[#allocation19] ss:$0 sm:$0xff]  ;;  %s9151_s0 = sld [smem:[#allocation65_spill]] }
 0x983   : > { %5889 = vmatprep.subr.bf16.mxu1 %v6682_v51  ;;  %v3056_v63 = vpack.c.bf16 %v2970_v11, %v2969_v49 }
 0x984   : > { %v2785_v20 = vsel %vm2784_vm11, %v2782_v61, %v6554_v17  ;;  %v2786_v22 = vsel %vm2784_vm11, %v2783_v19, %v6555_v13 }
 0x985   : > { %v2787_v29 = vpack.c.bf16 %v2786_v22, %v2785_v20 }
 0x986   : > { %5890 = vmatpush3.bf16.msra.mxu1 %v6682_v51 }
 0x987   : > { %5868 = vmatmul.mubr.msk.bf16.vlgmr.msra.gmra.mrb[32].mxu0 %vm1331_vm0, %v2787_v29  ;;  %5906 = vmatprep.subr.bf16.mxu1 %v7493_v12 }
 0x988   : > { %5879 = vmatprep.mubr.msk.bf16.mxu0 %vm7506_vm6, %v7493_v12  ;;  %s9152_s22 = smov %s9151_s0 }
 0x989   : > { %5892 = vmatmul.mubr.msk.bf16.vlgmr.msra.gmra.mrb[20].mxu1 %vm1331_vm0, %v3056_v63 }
 0x98a   : > { %5910 = vmatprep.mubr.msk.bf16.mxu1 %vm7506_vm6, %v7493_v12 }
 0xa5a   : > { %v2855_v23 = vpop.f32.mrb[32].mxu0 }
 0xa5b   : > { %v2856_v57 = vadd.f32 %v5485_v16, %v2855_v23  ;;  %v5869_v25 = vpop.f32.mrb[33].mxu0 }
 0xa5c   : > { %v2858_v4 = vpop.f32.mrb[34].mxu0  ;;  %v1268_v25 = vld [vmem:[%s1264_s11] sm:$0xff] }
 0xa5d   : > { %v2859_v28 = vadd.f32 %v5485_v16, %v2858_v4  ;;  %v5870_v30 = vpop.f32.mrb[35].mxu0  ;;  %v2862_v31 = vadd.f32 %v6851_v21, %v2856_v57  ;;  %v6683_v4 = vld [vmem:[%s9139_s12] sm:$0xff]  }
 0xa5e   : > { %5872 = vmatpush3.bf16.msra.mxu0 %v6683_v4  ;;  %v6684_v30 = vld [vmem:[%s9139_s12 + $0x8] sm:$0xff]  }
 0xa5f   : > { %v2866_v3 = vsel %vm1331_vm0, %v2862_v31, 0.0  ;;  %v2863_v32 = vadd.f32 %v6852_v18, %v2859_v28  ;;  %v1269_v28 = vld [vmem:[%s1264_s11 + $0x8] sm:$0xff]  ;;  %5873 = vmatprep.subr.bf16.mxu0 %v7493_v12  ;;  %s5599_s11 = sshll.u32 %s7693_s26, 8 }
 0xa60   : > { %2867 = vadd.xlane.f32.xlu0 %v2866_v3  ;;  %v5501_v3 = vld [vmem:[#allocation22] ss:$0 sm:$0xff] }
 0xa61   : > { %v2869_v35 = vsel %vm1331_vm0, %v2863_v32, 0.0 }
 0xa62   : > { %2870 = vadd.xlane.f32.xlu1 %v2869_v35  ;;  %5874 = vmatpush3.bf16.msra.mxu0 %v6684_v30 }
 0xa63   : > { %5875 = vmatprep.subr.bf16.mxu0 %v7493_v12 }
 0xaed   : > { %v2868_v36 = vpop.xlane.xlu0 %2867 }
 0xaee   : > { %v2873_v39 = vmul.f32 0.015625, %v2868_v36 }
 0xaef   : > { %v2871_v40 = vpop.xlane.xlu1 %2870 }
 0xaf0   : > { %v2875_v43 = vsub.f32 %v2862_v31, %v2873_v39  ;;  %v2874_v38 = vmul.f32 0.015625, %v2871_v40  ;;  %v6686_v31 = vld [vmem:[%s9139_s12 + $0x18] sm:$0xff]  }
 0xaf2   : > { %v2876_v45 = vsub.f32 %v2863_v32, %v2874_v38  ;;  %v2877_v46 = vmul.f32 %v2875_v43, %v2875_v43 }
 0xaf4   : > { %v2879_v48 = vsel %vm1331_vm0, %v2877_v46, 0.0  ;;  %v2878_v8 = vmul.f32 %v2876_v45, %v2876_v45 }
 0xaf5   : > { %2880 = vadd.xlane.f32.xlu0 %v2879_v48 }
 0xaf6   : > { %v2882_v52 = vsel %vm1331_vm0, %v2878_v8, 0.0 }
 0xaf9   : > { %2883 = vadd.xlane.f32.xlu0 %v2882_v52 }
 0xb82   : > { %v2881_v53 = vpop.xlane.xlu0 %2880 }
 0xb83   : > { %v2885_v37 = vmul.f32 0.015625, %v2881_v53 }
 0xb85   : > { %v2887_v54 = vadd.f32 1e-05, %v2885_v37 }
 0xb86   : > { %v2884_v55 = vpop.xlane.xlu0 %2883 }
 0xb87   : > { %6767 = vrsqrt.f32 %v2887_v54  ;;  %v2886_v26 = vmul.f32 0.015625, %v2884_v55 }
 0xb89   : > { %v2888_v42 = vadd.f32 1e-05, %v2886_v26 }
 0xb8b   : > { %6769 = vrsqrt.f32 %v2888_v42  ;;  %v5493_v42 = vld [vmem:[#allocation16] ss:$0 sm:$0xff] }
 0xb91   : > { %v6768_v56 = vpop.eup %6767 }
 0xb92   : > { %v2891_v44 = vmul.f32 %v6768_v56, %v2875_v43 }
 0xb94   : > { %v2899_v59 = vmul.f32 %v5491_v24, %v2891_v44 }
 0xb95   : > { %v6770_v41 = vpop.eup %6769 }
 0xb96   : > { %v2907_v27 = vadd.f32 %v5492_v34, %v2899_v59  ;;  %v2892_v50 = vmul.f32 %v6770_v41, %v2876_v45 }
 0xb98   : > { %v2909_v62 = vadd.f32 %v6851_v21, %v2907_v27  ;;  %v2900_v0 = vmul.f32 %v5491_v24, %v2892_v50  ;;  %v6685_v21 = vld [vmem:[%s9139_s12 + $0x10] sm:$0xff]  }
 0xb99   : > { %5876 = vmatpush3.bf16.msra.mxu0 %v6685_v21 }
 0xb9a   : > { %v2913_v2 = vsel %vm1331_vm0, %v2909_v62, 0.0  ;;  %v2908_v58 = vadd.f32 %v5492_v34, %v2900_v0  ;;  %5877 = vmatprep.subr.bf16.mxu0 %v7493_v12  ;;  %v5494_v34 = vld [vmem:[#allocation17] ss:$0 sm:$0xff] }
 0xb9b   : > { %2914 = vadd.xlane.f32.xlu1 %v2913_v2 }
 0xb9c   : > { %v2910_v6 = vadd.f32 %v6852_v18, %v2908_v58  ;;  %v5893_v18 = vpop.f32.mrb[20].mxu1 }
 0xb9d   : > { %5878 = vmatpush3.bf16.msra.mxu0 %v6686_v31  ;;  %v3136_v32 = vpop.f32.mrb[21].mxu1  ;;  %v3145_v40 = vadd.f32 %v5893_v18, %v5501_v3 }
 0xb9e   : > { %v2916_v7 = vsel %vm1331_vm0, %v2910_v6, 0.0  ;;  %v3137_v35 = vadd.f32 %v5501_v3, %v3136_v32  ;;  %v5894_v36 = vpop.f32.mrb[22].mxu1 }
 0xb9f   : > { %2917 = vadd.xlane.f32.xlu0 %v2916_v7  ;;  %v3139_v39 = vpop.f32.mrb[23].mxu1  ;;  %v3148_v43 = vadd.f32 %v5894_v36, %v5501_v3 }
 0xba0   : > { %v3140_v38 = vadd.f32 %v5501_v3, %v3139_v39 }
 0xba1   : > { %v8533_v48 = vpack.i.bf16 %v3148_v43, %v3145_v40  ;;  %v8549_v7 = vpack.c.bf16 %v3148_v43, %v3145_v40 }
 0xba2   : > { %v8524_v45 = vpack.c.bf16 %v3140_v38, %v3137_v35  ;;  %v8526_v46 = vpack.i.bf16 %v3140_v38, %v3137_v35 }
 0xba4   : > { %6141 = vmatprep.subr.msk.bf16.mxu0 %vm8145_vm2, %v8524_v45 }
 0xc28   : > { %v2915_v13 = vpop.xlane.xlu1 %2914 }
 0xc29   : > { %v2919_v17 = vmul.f32 0.015625, %v2915_v13 }
 0xc2b   : > { %v2921_v61 = vsub.f32 %v2909_v62, %v2919_v17 }
 0xc2c   : > { %v2918_v19 = vpop.xlane.xlu0 %2917 }
 0xc2d   : > { %v2920_v20 = vmul.f32 0.015625, %v2918_v19  ;;  %v2923_v22 = vmul.f32 %v2921_v61, %v2921_v61 }
 0xc2f   : > { %v2922_v29 = vsub.f32 %v2910_v6, %v2920_v20  ;;  %v2925_v16 = vsel %vm1331_vm0, %v2923_v22, 0.0 }
 0xc30   : > { %2926 = vadd.xlane.f32.xlu1 %v2925_v16 }
 0xc31   : > { %v2924_v23 = vmul.f32 %v2922_v29, %v2922_v29 }
 0xc33   : > { %v2928_v57 = vsel %vm1331_vm0, %v2924_v23, 0.0 }
 0xc34   : > { %2929 = vadd.xlane.f32.xlu0 %v2928_v57 }
 0xc41   : > { %2957 = vperm.xlu1 %6556, %v1268_v25  }
 0xc45   : > { %6559 = vrot.lane.b32.xlu1 %v8526_v46, %s7497_s23 }
 0xc49   : > { %6564 = vrot.lane.b32.xlu1 %v8533_v48, %s7497_s23 }
 0xc4a   : > { %2962 = vperm.xlu0 %6557, %v1269_v28  }
 0xcbd   : > { %v2927_v8 = vpop.xlane.xlu1 %2926 }
 0xcbe   : > { %v2931_v52 = vmul.f32 0.015625, %v2927_v8 }
 0xcc0   : > { %v2933_v53 = vadd.f32 1e-05, %v2931_v52 }
 0xcc1   : > { %v2930_v37 = vpop.xlane.xlu0 %2929  ;;  %v8537_v50 = vpop.permute.xlu1 %2957 }
 0xcc2   : > { %6771 = vrsqrt.f32 %v2933_v53  ;;  %v2932_v54 = vmul.f32 0.015625, %v2930_v37 }
 0xcc4   : > { %v2934_v55 = vadd.f32 1e-05, %v2932_v54 }
 0xcc5   : > { %v6560_v60 = vpop.permute.xlu1 %6559 }
 0xcc6   : > { %6773 = vrsqrt.f32 %v2934_v55  ;;  %v6562_v5 = vunpack.i.h.bf16 %v6560_v60  ;;  %v6561_v1 = vunpack.i.l.bf16 %v6560_v60 }
 0xcc8   : > { %v6151_v47 = vpack.c.bf16 %v6562_v5, %v6561_v1 }
 0xcc9   : > { %v8539_v62 = vpop.permute.xlu0 %2962  ;;  %v6565_v9 = vpop.permute.xlu1 %6564 }
 0xcca   : > { %v6567_v51 = vunpack.i.h.bf16 %v6565_v9  ;;  %v6566_v49 = vunpack.i.l.bf16 %v6565_v9 }
 0xccc   : > { %v6772_v26 = vpop.eup %6771  ;;  %v6157_v20 = vpack.c.bf16 %v6567_v51, %v6566_v49 }
 0xccd   : > { %v2937_v56 = vmul.f32 %v6772_v26, %v2921_v61 }
 0xccf   : > { %v2945_v24 = vmul.f32 %v5493_v42, %v2937_v56 }
 0xcd0   : > { %v6774_v44 = vpop.eup %6773 }
 0xcd1   : > { %v2938_v59 = vmul.f32 %v6774_v44, %v2922_v29  ;;  %v2953_v41 = vadd.f32 %v5494_v34, %v2945_v24 }
 0xcd3   : > { %v2946_v27 = vmul.f32 %v5493_v42, %v2938_v59  ;;  %v8542_v2 = vmul.f32 %v8537_v50, %v2953_v41 }
 0xcd5   : > { %v2954_v0 = vadd.f32 %v5494_v34, %v2946_v27 }
 0xcd7   : > { %v8545_v58 = vmul.f32 %v8539_v62, %v2954_v0 }
 0xcd9   : > { %v2971_v6 = vpack.c.bf16 %v8545_v58, %v8542_v2 }
 0xcdb   : > { %5880 = vmatmul.mubr.msk.bf16.vlgmr.msra.gmra.mrb[36].mxu0 %vm1331_vm0, %v2971_v6 }
 0xcdc   : > { %6144 = vmatpush3.bf16.xpose.msk.msra.mxu0 %vm8145_vm2, %v8524_v45 }
 0xcdd   : > { %6147 = vmatprep.subr.msk.bf16.mxu0 %vm8145_vm2, %v8549_v7 }
 0xce4   : > { %6150 = vmatpush3.bf16.xpose.msk.msra.mxu0 %vm8145_vm2, %v8549_v7 }
 0xce5   : > { %6153 = vmatprep.subr.msk.bf16.mxu0 %vm8145_vm2, %v6151_v47 }
 0xdae   : > { %v3048_v11 = vpop.f32.mrb[36].mxu0 }
 0xdaf   : > { %v8563_v63 = vadd.f32 %v5495_v10, %v3048_v11  ;;  %v5881_v13 = vpop.f32.mrb[37].mxu0 }
 0xdb0   : > { %v3051_v17 = vpop.f32.mrb[38].mxu0 }
 0xdb1   : > { %v8565_v61 = vadd.f32 %v5495_v10, %v3051_v17  ;;  %3343 = vrot.lane.b32.xlu1 %v8563_v63, %s7497_s23  ;;  %v5882_v19 = vpop.f32.mrb[39].mxu0  ;;  %5903 = vmatprep.mubr.msk.f32.mxu0 %vm1400_vm1, %v8563_v63 }
 0xdb3   : > { %5904 = vmatmul.mubr.msk.f32.vlgmr.msra.gmra.mrb[40].mxu0 %vm1400_vm1, %v8565_v61 }
 0xdb4   : > { %6156 = vmatpush3.bf16.xpose.msk.msra.mxu0 %vm8145_vm2, %v6151_v47 }
 0xdb5   : > { %3345 = vrot.lane.b32.xlu1 %v8565_v61, %s7497_s23  ;;  %6159 = vmatprep.subr.msk.bf16.mxu0 %vm8145_vm2, %v6157_v20  ;;  %s9141_s23 = scalar_lea.vmem [#allocation8], %s8056_s17 }
 0xdb6   : > { %v3151_v23 = vld [vmem:[%s9141_s23] sm:$0x1] }
 0xdb7   : > { %vm3152_vm12 = vcmp.ne.s32.totalorder %v3151_v23, 0 }
 0xdb8   : > { %v3153_v57 = vsel %vm3152_vm12, -1e+30, %v7493_v12 }
 0xdb9   : > { %3293 = vrot.lane.b32.xlu1 %v8524_v45, %s9140_s10  ;;  %v8594_v25 = vrot.slane %v3153_v57, %v1283_v15 }
 0xdbc   : > { %6162 = vmatpush3.bf16.xpose.msk.msra.mxu0 %vm8145_vm2, %v6157_v20 }
 0xdbd   : > { %5944 = vmatprep.subr.bf16.mxu0 %v7493_v12 }
 0xe23   : > { %v3344_v22 = vpop.permute.xlu1 %3343 }
 0xe24   : > { %5922 = vmatprep.mubr.msk.f32.mxu0 %vm1400_vm1, %v3344_v22 }
 0xe27   : > { %v3346_v29 = vpop.permute.xlu1 %3345 }
 0xe28   : > { %5923 = vmatmul.mubr.msk.f32.vlgmr.msra.gmra.mrb[42].mxu0 %vm1400_vm1, %v3346_v29 }
 0xe29   : > { %5948 = vmatprep.mubr.msk.bf16.mxu0 %vm7506_vm6, %v7493_v12 }
 0xe2b   : > { %v3294_v16 = vpop.permute.xlu1 %3293 }
 0xe2c   : > { %5907 = vmatpush3.bf16.msra.mxu1 %v3294_v16 }
 0xe2d   : > { %5908 = vmatprep.subr.bf16.mxu1 %v7493_v12 }
 0xe86   : > { %v5905_v4 = vpop.f32.mrb[40].mxu0 }
 0xe87   : > { %v3259_v28 = vmul.f32 0.35355338, %v5905_v4  ;;  %v3249_v30 = vpop.f32.mrb[41].mxu0 }
 0xe88   : > { %v3258_v21 = vmul.f32 0.35355338, %v3249_v30 }
 0xe89   : > { %v3267_v31 = vadd.f32 %v8594_v25, %v3259_v28 }
 0xe8a   : > { %v3266_v3 = vadd.f32 %v8594_v25, %v3258_v21 }
 0xe8b   : > { %v3271_v18 = vsel %vm2775_vm8, %v3267_v31, -inf }
 0xe8c   : > { %3272 = vmax.xlane.f32.xlu0 %v3271_v18  ;;  %v3268_v32 = vsel %vm2775_vm8, %v3266_v3, -inf }
 0xe8d   : > { %3269 = vmax.xlane.f32.xlu1 %v3268_v32 }
 0xefb   : > { %v5924_v35 = vpop.f32.mrb[42].mxu0 }
 0xefc   : > { %v3443_v36 = vmul.f32 0.35355338, %v5924_v35  ;;  %v3433_v39 = vpop.f32.mrb[43].mxu0 }
 0xefd   : > { %v3442_v14 = vmul.f32 0.35355338, %v3433_v39 }
 0xefe   : > { %v3445_v15 = vadd.f32 %v3443_v36, %v8594_v25 }
 0xeff   : > { %v3444_v40 = vadd.f32 %v3442_v14, %v8594_v25 }
 0xf00   : > { %v3449_v43 = vsel %vm2775_vm8, %v3445_v15, -inf }
 0xf01   : > { %3450 = vmax.xlane.f32.xlu1 %v3449_v43  ;;  %v3446_v38 = vsel %vm2775_vm8, %v3444_v40, -inf }
 0xf05   : > { %3447 = vmax.xlane.f32.xlu1 %v3446_v38 }
 0xf16   : > { %3469 = vrot.lane.b32.xlu1 %v8524_v45, %s9135_s29 }
 0xf19   : > { %v3273_v8 = vpop.xlane.xlu0 %3272 }
 0xf1a   : > { %v3275_v52 = vsub.f32 %v3267_v31, %v3273_v8  ;;  %v3270_v37 = vpop.xlane.xlu1 %3269 }
 0xf1b   : > { %v3274_v54 = vsub.f32 %v3266_v3, %v3270_v37 }
 0xf1c   : > { %v3278_v53 = vmul.f32 1.442695, %v3275_v52 }
 0xf1d   : > { %v3276_v26 = vmul.f32 1.442695, %v3274_v54 }
 0xf1e   : > { %6775 = vpow2.f32 %v3278_v53 }
 0xf1f   : > { %6777 = vpow2.f32 %v3276_v26 }
 0xf28   : > { %v6776_v55 = vpop.eup %6775 }
 0xf29   : > { %v3283_v42 = vsel %vm2775_vm8, %v6776_v55, 0.0  ;;  %v6778_v56 = vpop.eup %6777 }
 0xf2a   : > { %3284 = vadd.xlane.f32.xlu0 %v3283_v42  ;;  %v3280_v24 = vsel %vm2775_vm8, %v6778_v56, 0.0 }
 0xf3a   : > { %3281 = vadd.xlane.f32.xlu1 %v3280_v24 }
 0xf40   : > { %3295 = vrot.lane.b32.xlu0 %v8549_v7, %s9140_s10  ;;  %s1254_s10 = scalar_lea.vmem [#allocation29], %s8059_s2  ;;  %s7510_s2 = smov [#allocation29]  }
 0xf41   : > { %s5077_s23 = sshll.u32 %s1254_s10, 4  ;;  %s8955_s23 = int_to_ptr.vmem [resolvable:$true] %s5077_s23 }
 0xf42   : > { %s7337_s26 = scalar_lea.vmem %s8955_s23, 256 }
 0xf43   : > { %p7338_p8 = scmp.ne.s32.totalorder %s8955_s23, %s7337_s26 }
 0xf45   : > { %p7339_p13 = pnand %p7338_p8, %p9153_p4 }
 0xf47   : > { %p7340_p5 = pneg %p7339_p13 }
 0xf4b   : > { %3471 = vrot.lane.b32.xlu1 %v8549_v7, %s9135_s29 }
 0xf8e   : > { %v3451_v44 = vpop.xlane.xlu1 %3450 }
 0xf8f   : > { %v3453_v34 = vsub.f32 %v3445_v15, %v3451_v44 }
 0xf91   : > { %v3456_v59 = vmul.f32 1.442695, %v3453_v34 }
 0xf92   : > { %v3448_v41 = vpop.xlane.xlu1 %3447 }
 0xf93   : > { %6779 = vpow2.f32 %v3456_v59  ;;  %v3452_v27 = vsub.f32 %v3444_v40, %v3448_v41 }
 0xf95   : > { %v3454_v0 = vmul.f32 1.442695, %v3452_v27 }
 0xf96   : > { %v3470_v10 = vpop.permute.xlu1 %3469 }
 0xf97   : > { %6781 = vpow2.f32 %v3454_v0 }
 0xf9d   : > { %v6780_v6 = vpop.eup %6779 }
 0xf9e   : > { %v3461_v60 = vsel %vm2775_vm8, %v6780_v6, 0.0 }
 0xf9f   : > { %3462 = vadd.xlane.f32.xlu0 %v3461_v60 }
 0xfa1   : > { %v6782_v5 = vpop.eup %6781 }
 0xfa2   : > { %v3458_v1 = vsel %vm2775_vm8, %v6782_v5, 0.0 }
 0xfa3   : > { %3459 = vadd.xlane.f32.xlu1 %v3458_v1 }
 0xfb4   : > { %6574 = vrot.lane.b32.xlu1 %v8533_v48, %s7505_s13 }
 0xfb5   : > { %6569 = vrot.lane.b32.xlu0 %v8526_v46, %s7505_s13 }
 0xfb7   : > { %v3285_v47 = vpop.xlane.xlu0 %3284 }
 0xfb8   : > { %3521 = vrot.lane.b32.xlu1 %v8565_v61, %s7505_s13  ;;  %6783 = vrcp.f32 %v3285_v47 }
 0xfb9   : > { %3519 = vrot.lane.b32.xlu0 %v8563_v63, %s7505_s13  ;;  %s9145_s13 = smov 8  }
 0xfbb   : > { %v3296_v9 = vpop.permute.xlu0 %3295 }
 0xfbc   : > { %5909 = vmatpush3.bf16.msra.mxu1 %v3296_v9 }
 0xfbd   : > { %5925 = vmatprep.subr.bf16.mxu1 %v7493_v12 }
 0xfc2   : > { %v6784_v49 = vpop.eup %6783 }
 0xfc3   : > { %v3289_v13 = vmul.f32 %v6784_v49, %v6776_v55 }
 0xfc7   : > { %v3282_v51 = vpop.xlane.xlu1 %3281 }
 0xfc8   : > { %6785 = vrcp.f32 %v3282_v51 }
 0xfcb   : > { %v3472_v20 = vpop.permute.xlu1 %3471 }
 0xfd2   : > { %v6786_v11 = vpop.eup %6785 }
 0xfd3   : > { %v3288_v17 = vmul.f32 %v6786_v11, %v6778_v56 }
 0xfd5   : > { %v3290_v19 = vpack.c.bf16 %v3289_v13, %v3288_v17 }
 0xfd7   : > { %5911 = vmatmul.mubr.msk.bf16.vlgmr.msra.gmra.mrb[24].mxu1 %vm2775_vm8, %v3290_v19 }
 0xfd8   : > { %5926 = vmatpush3.bf16.msra.mxu1 %v3470_v10  ;;  %5929 = vmatprep.mubr.msk.bf16.mxu1 %vm7506_vm6, %v7493_v12 }
 0xfd9   : > { %5927 = vmatprep.subr.bf16.mxu1 %v7493_v12 }
 0xfdc   : > { %5928 = vmatpush3.bf16.msra.mxu1 %v3472_v20 }
0x102c   : > { %v3463_v22 = vpop.xlane.xlu0 %3462 }
0x102d   : > { %6787 = vrcp.f32 %v3463_v22 }
0x1030   : > { %v6570_v29 = vpop.permute.xlu0 %6569  ;;  %v3460_v16 = vpop.xlane.xlu1 %3459 }
0x1031   : > { %v6572_v23 = vunpack.i.h.bf16 %v6570_v29  ;;  %v6571_v57 = vunpack.i.l.bf16 %v6570_v29  ;;  %6789 = vrcp.f32 %v3460_v16 }
0x1033   : > { %v6163_v4 = vpack.c.bf16 %v6572_v23, %v6571_v57 }
0x1034   : > { %v6575_v30 = vpop.permute.xlu1 %6574  ;;  %v3520_v36 = vpop.permute.xlu0 %3519 }
0x1035   : > { %6165 = vmatprep.subr.msk.bf16.mxu1 %vm8145_vm2, %v6163_v4  ;;  %v6577_v18 = vunpack.i.h.bf16 %v6575_v30  ;;  %v6576_v32 = vunpack.i.l.bf16 %v6575_v30 }
0x1037   : > { %v6788_v28 = vpop.eup %6787  ;;  %v6169_v39 = vpack.c.bf16 %v6577_v18, %v6576_v32 }
0x1038   : > { %v3467_v31 = vmul.f32 %v6788_v28, %v6780_v6  ;;  %v3522_v14 = vpop.permute.xlu1 %3521 }
0x103b   : > { %v6790_v21 = vpop.eup %6789 }
0x103c   : > { %v3466_v3 = vmul.f32 %v6790_v21, %v6782_v5 }
0x103e   : > { %v3468_v35 = vpack.c.bf16 %v3467_v31, %v3466_v3 }
0x1040   : > { %5930 = vmatmul.mubr.msk.bf16.vlgmr.msra.gmra.mrb[28].mxu1 %vm2775_vm8, %v3468_v35 }
0x1041   : > { %6168 = vmatpush3.bf16.xpose.msk.msra.mxu1 %vm8145_vm2, %v6163_v4  ;;  %5941 = vmatprep.mubr.msk.f32.mxu1 %vm1400_vm1, %v3520_v36 }
0x1042   : > { %6171 = vmatprep.subr.msk.bf16.mxu1 %vm8145_vm2, %v6169_v39 }
0x1049   : > { %6174 = vmatpush3.bf16.xpose.msk.msra.mxu1 %vm8145_vm2, %v6169_v39 }
0x104a   : > { %5963 = vmatprep.subr.bf16.mxu1 %v7493_v12 }
0x1050   : > { %5942 = vmatmul.mubr.msk.f32.vlgmr.msra.gmra.mrb[32].mxu1 %vm1400_vm1, %v3522_v14 }
0x1051   : > { %5967 = vmatprep.mubr.msk.bf16.mxu1 %vm7506_vm6, %v7493_v12 }
0x10aa   : > { %v8641_v15 = vpop.f32.mrb[24].mxu1 }
0x10ab   : > { %v5912_v40 = vpop.f32.mrb[25].mxu1 }
0x10ac   : > { %v8643_v43 = vpop.f32.mrb[26].mxu1 }
0x10ad   : > { %v5913_v38 = vpop.f32.mrb[27].mxu1 }
0x1113   : > { %v8645_v8 = vpop.f32.mrb[28].mxu1 }
0x1114   : > { %v5931_v52 = vpop.f32.mrb[29].mxu1 }
0x1115   : > { %v8647_v53 = vpop.f32.mrb[30].mxu1 }
0x1116   : > { %v6628_v37 = vpack.i.bf16 %v8647_v53, %v8645_v8  ;;  %v5932_v54 = vpop.f32.mrb[31].mxu1 }
0x1123   : > { %v5943_v55 = vpop.f32.mrb[32].mxu1 }
0x1124   : > { %v3619_v26 = vmul.f32 0.35355338, %v5943_v55  ;;  %v3609_v42 = vpop.f32.mrb[33].mxu1 }
0x1125   : > { %v3618_v56 = vmul.f32 0.35355338, %v3609_v42 }
0x1126   : > { %v3621_v24 = vadd.f32 %v3619_v26, %v8594_v25 }
0x1127   : > { %v3620_v44 = vadd.f32 %v3618_v56, %v8594_v25 }
0x1128   : > { %v3625_v34 = vsel %vm2775_vm8, %v3621_v24, -inf }
0x1129   : > { %3626 = vmax.xlane.f32.xlu1 %v3625_v34  ;;  %v3622_v59 = vsel %vm2775_vm8, %v3620_v44, -inf }
0x112a   : > { %3623 = vmax.xlane.f32.xlu0 %v3622_v59 }
0x113a   : > { %3645 = vrot.lane.b32.xlu1 %v8524_v45, %s7496_s4 }
0x113e   : > { %6579 = vrot.lane.b32.xlu1 %v8526_v46, %s7498_s6 }
0x1142   : > { %6584 = vrot.lane.b32.xlu1 %v8533_v48, %s7498_s6 }
0x1146   : > { %3697 = vrot.lane.b32.xlu1 %v8565_v61, %s7498_s6 }
0x11b6   : > { %v3627_v41 = vpop.xlane.xlu1 %3626 }
0x11b7   : > { %v3629_v27 = vsub.f32 %v3621_v24, %v3627_v41  ;;  %v3624_v0 = vpop.xlane.xlu0 %3623 }
0x11b8   : > { %v3628_v6 = vsub.f32 %v3620_v44, %v3624_v0 }
0x11b9   : > { %v3632_v60 = vmul.f32 1.442695, %v3629_v27 }
0x11ba   : > { %v3630_v5 = vmul.f32 1.442695, %v3628_v6  ;;  %v3646_v1 = vpop.permute.xlu1 %3645 }
0x11bb   : > { %6791 = vpow2.f32 %v3632_v60  ;;  %5945 = vmatpush3.bf16.msra.mxu0 %v3646_v1 }
0x11bc   : > { %5946 = vmatprep.subr.bf16.mxu0 %v7493_v12  ;;  %6793 = vpow2.f32 %v3630_v5 }
0x11be   : > { %v6580_v11 = vpop.permute.xlu1 %6579 }
0x11bf   : > { %v6582_v13 = vunpack.i.h.bf16 %v6580_v11  ;;  %v6581_v17 = vunpack.i.l.bf16 %v6580_v11 }
0x11c1   : > { %v6175_v20 = vpack.c.bf16 %v6582_v13, %v6581_v17 }
0x11c2   : > { %v6585_v16 = vpop.permute.xlu1 %6584 }
0x11c3   : > { %v6587_v57 = vunpack.i.h.bf16 %v6585_v16  ;;  %v6586_v4 = vunpack.i.l.bf16 %v6585_v16 }
0x11c5   : > { %v6792_v47 = vpop.eup %6791  ;;  %v6181_v31 = vpack.c.bf16 %v6587_v57, %v6586_v4 }
0x11c6   : > { %v3637_v9 = vsel %vm2775_vm8, %v6792_v47, 0.0  ;;  %v6794_v10 = vpop.eup %6793  ;;  %v3698_v18 = vpop.permute.xlu1 %3697 }
0x11c7   : > { %3638 = vadd.xlane.f32.xlu0 %v3637_v9  ;;  %v3634_v51 = vsel %vm2775_vm8, %v6794_v10, 0.0 }
0x11cb   : > { %3635 = vadd.xlane.f32.xlu0 %v3634_v51 }
0x11e1   : > { %3647 = vrot.lane.b32.xlu0 %v8549_v7, %s7496_s4 }
0x11e5   : > { %3695 = vrot.lane.b32.xlu0 %v8563_v63, %s7498_s6  ;;  %s9142_s6 = smov 80  }
0x1254   : > { %v3639_v49 = vpop.xlane.xlu0 %3638 }
0x1255   : > { %6795 = vrcp.f32 %v3639_v49 }
0x1258   : > { %v3636_v19 = vpop.xlane.xlu0 %3635 }
0x1259   : > { %6797 = vrcp.f32 %v3636_v19 }
0x125c   : > { %v3648_v22 = vpop.permute.xlu0 %3647 }
0x125d   : > { %5947 = vmatpush3.bf16.msra.mxu0 %v3648_v22 }
0x125e   : > { %6177 = vmatprep.subr.msk.bf16.mxu0 %vm8145_vm2, %v6175_v20 }
0x125f   : > { %v6796_v29 = vpop.eup %6795 }
0x1260   : > { %v3643_v28 = vmul.f32 %v6796_v29, %v6792_v47  ;;  %v3696_v3 = vpop.permute.xlu0 %3695 }
0x1263   : > { %v6798_v23 = vpop.eup %6797 }
0x1264   : > { %v3642_v30 = vmul.f32 %v6798_v23, %v6794_v10 }
0x1266   : > { %v3644_v21 = vpack.c.bf16 %v3643_v28, %v3642_v30 }
0x1268   : > { %5949 = vmatmul.mubr.msk.bf16.vlgmr.msra.gmra.mrb[44].mxu0 %vm2775_vm8, %v3644_v21 }
0x1269   : > { %6180 = vmatpush3.bf16.xpose.msk.msra.mxu0 %vm8145_vm2, %v6175_v20  ;;  %5960 = vmatprep.mubr.msk.f32.mxu0 %vm1400_vm1, %v3696_v3 }
0x126a   : > { %6183 = vmatprep.subr.msk.bf16.mxu0 %vm8145_vm2, %v6181_v31 }
0x1271   : > { %6186 = vmatpush3.bf16.xpose.msk.msra.mxu0 %vm8145_vm2, %v6181_v31 }
0x1272   : > { %5982 = vmatprep.subr.bf16.mxu0 %v7493_v12 }
0x1278   : > { %5961 = vmatmul.mubr.msk.f32.vlgmr.msra.gmra.mrb[48].mxu0 %vm1400_vm1, %v3698_v18 }
0x1279   : > { %5986 = vmatprep.mubr.msk.bf16.mxu0 %vm7506_vm6, %v7493_v12 }
0x133b   : > { %v8684_v32 = vpop.f32.mrb[44].mxu0 }
0x133c   : > { %v5950_v35 = vpop.f32.mrb[45].mxu0 }
0x133d   : > { %v8686_v36 = vpop.f32.mrb[46].mxu0 }
0x133e   : > { %v6633_v39 = vpack.i.bf16 %v8686_v36, %v8684_v32  ;;  %v5951_v14 = vpop.f32.mrb[47].mxu0 }
0x134b   : > { %v5962_v40 = vpop.f32.mrb[48].mxu0 }
0x134c   : > { %v3795_v38 = vmul.f32 0.35355338, %v5962_v40  ;;  %v3785_v52 = vpop.f32.mrb[49].mxu0 }
0x134d   : > { %v3794_v54 = vmul.f32 0.35355338, %v3785_v52 }
0x134e   : > { %v3797_v55 = vadd.f32 %v3795_v38, %v8594_v25 }
0x134f   : > { %v3796_v26 = vadd.f32 %v3794_v54, %v8594_v25 }
0x1350   : > { %v3801_v42 = vsel %vm2775_vm8, %v3797_v55, -inf }
0x1351   : > { %3802 = vmax.xlane.f32.xlu1 %v3801_v42  ;;  %v3798_v56 = vsel %vm2775_vm8, %v3796_v26, -inf }
0x1352   : > { %3799 = vmax.xlane.f32.xlu0 %v3798_v56 }
0x1362   : > { %3821 = vrot.lane.b32.xlu1 %v8524_v45, %s7504_s7 }
0x1366   : > { %6589 = vrot.lane.b32.xlu1 %v8526_v46, %s7499_s24 }
0x136a   : > { %6594 = vrot.lane.b32.xlu1 %v8533_v48, %s7499_s24 }
0x136e   : > { %3873 = vrot.lane.b32.xlu1 %v8565_v61, %s7499_s24 }
0x13de   : > { %v3803_v24 = vpop.xlane.xlu1 %3802 }
0x13df   : > { %v3805_v44 = vsub.f32 %v3797_v55, %v3803_v24  ;;  %v3800_v34 = vpop.xlane.xlu0 %3799 }
0x13e0   : > { %v3804_v59 = vsub.f32 %v3796_v26, %v3800_v34 }
0x13e1   : > { %v3808_v41 = vmul.f32 1.442695, %v3805_v44 }
0x13e2   : > { %v3806_v27 = vmul.f32 1.442695, %v3804_v59  ;;  %v3822_v0 = vpop.permute.xlu1 %3821 }
0x13e3   : > { %6799 = vpow2.f32 %v3808_v41  ;;  %5964 = vmatpush3.bf16.msra.mxu1 %v3822_v0 }
0x13e4   : > { %5965 = vmatprep.subr.bf16.mxu1 %v7493_v12  ;;  %6801 = vpow2.f32 %v3806_v27 }
0x13e6   : > { %v6590_v9 = vpop.permute.xlu1 %6589 }
0x13e7   : > { %v6592_v10 = vunpack.i.h.bf16 %v6590_v9  ;;  %v6591_v51 = vunpack.i.l.bf16 %v6590_v9 }
0x13e9   : > { %v6187_v11 = vpack.c.bf16 %v6592_v10, %v6591_v51 }
0x13ea   : > { %v6595_v19 = vpop.permute.xlu1 %6594 }
0x13eb   : > { %v6597_v22 = vunpack.i.h.bf16 %v6595_v19  ;;  %v6596_v29 = vunpack.i.l.bf16 %v6595_v19 }
0x13ed   : > { %v6800_v6 = vpop.eup %6799  ;;  %v6193_v4 = vpack.c.bf16 %v6597_v22, %v6596_v29 }
0x13ee   : > { %v3813_v60 = vsel %vm2775_vm8, %v6800_v6, 0.0  ;;  %v6802_v5 = vpop.eup %6801  ;;  %v3874_v30 = vpop.permute.xlu1 %3873 }
0x13ef   : > { %3814 = vadd.xlane.f32.xlu0 %v3813_v60  ;;  %v3810_v1 = vsel %vm2775_vm8, %v6802_v5, 0.0 }
0x13f3   : > { %3811 = vadd.xlane.f32.xlu0 %v3810_v1 }
0x1409   : > { %3823 = vrot.lane.b32.xlu0 %v8549_v7, %s7504_s7 }
0x140d   : > { %3871 = vrot.lane.b32.xlu0 %v8563_v63, %s7499_s24  ;;  %s9143_s24 = smov 16  }
0x147c   : > { %v3815_v47 = vpop.xlane.xlu0 %3814 }
0x147d   : > { %6803 = vrcp.f32 %v3815_v47 }
0x1480   : > { %v3812_v49 = vpop.xlane.xlu0 %3811 }
0x1481   : > { %6805 = vrcp.f32 %v3812_v49 }
0x1484   : > { %v3824_v13 = vpop.permute.xlu0 %3823 }
0x1485   : > { %5966 = vmatpush3.bf16.msra.mxu1 %v3824_v13 }
0x1486   : > { %6189 = vmatprep.subr.msk.bf16.mxu1 %vm8145_vm2, %v6187_v11 }
0x1487   : > { %v6804_v17 = vpop.eup %6803 }
0x1488   : > { %v3819_v16 = vmul.f32 %v6804_v17, %v6800_v6  ;;  %v3872_v28 = vpop.permute.xlu0 %3871 }
0x148b   : > { %v6806_v20 = vpop.eup %6805 }
0x148c   : > { %v3818_v23 = vmul.f32 %v6806_v20, %v6802_v5 }
0x148e   : > { %v3820_v57 = vpack.c.bf16 %v3819_v16, %v3818_v23 }
0x1490   : > { %5968 = vmatmul.mubr.msk.bf16.vlgmr.msra.gmra.mrb[36].mxu1 %vm2775_vm8, %v3820_v57 }
0x1491   : > { %6192 = vmatpush3.bf16.xpose.msk.msra.mxu1 %vm8145_vm2, %v6187_v11  ;;  %5979 = vmatprep.mubr.msk.f32.mxu1 %vm1400_vm1, %v3872_v28 }
0x1492   : > { %6195 = vmatprep.subr.msk.bf16.mxu1 %vm8145_vm2, %v6193_v4 }
0x1499   : > { %6198 = vmatpush3.bf16.xpose.msk.msra.mxu1 %vm8145_vm2, %v6193_v4 }
0x149a   : > { %6001 = vmatprep.subr.bf16.mxu1 %v7493_v12 }
0x14a0   : > { %5980 = vmatmul.mubr.msk.f32.vlgmr.msra.gmra.mrb[34].mxu1 %vm1400_vm1, %v3874_v30 }
0x14a1   : > { %6005 = vmatprep.mubr.msk.bf16.mxu1 %vm7506_vm6, %v7493_v12 }
0x1563   : > { %v8723_v21 = vpop.f32.mrb[36].mxu1 }
0x1564   : > { %v5969_v31 = vpop.f32.mrb[37].mxu1 }
0x1565   : > { %v8725_v3 = vpop.f32.mrb[38].mxu1 }
0x1566   : > { %v6638_v18 = vpack.i.bf16 %v8725_v3, %v8723_v21  ;;  %v5970_v35 = vpop.f32.mrb[39].mxu1  ;;  %v6687_v21 = vld [vmem:[#allocation23] sm:$0xff]   ;;  %v6688_v3 = vld [vmem:[#allocation23 + $0x8] sm:$0xff]  }
0x1573   : > { %v5981_v14 = vpop.f32.mrb[34].mxu1 }
0x1574   : > { %v3971_v40 = vmul.f32 0.35355338, %v5981_v14  ;;  %v3961_v38 = vpop.f32.mrb[35].mxu1 }
0x1575   : > { %v3970_v52 = vmul.f32 0.35355338, %v3961_v38 }
0x1576   : > { %v3973_v54 = vadd.f32 %v3971_v40, %v8594_v25 }
0x1577   : > { %v3972_v55 = vadd.f32 %v3970_v52, %v8594_v25 }
0x1578   : > { %v3977_v26 = vsel %vm2775_vm8, %v3973_v54, -inf }
0x1579   : > { %3978 = vmax.xlane.f32.xlu1 %v3977_v26  ;;  %v3974_v42 = vsel %vm2775_vm8, %v3972_v55, -inf }
0x157a   : > { %3975 = vmax.xlane.f32.xlu0 %v3974_v42 }
0x158a   : > { %3997 = vrot.lane.b32.xlu1 %v8524_v45, %s7507_s9 }
0x158e   : > { %6599 = vrot.lane.b32.xlu1 %v8526_v46, %s7501_s28 }
0x1592   : > { %6604 = vrot.lane.b32.xlu1 %v8533_v48, %s7501_s28 }
0x1596   : > { %4049 = vrot.lane.b32.xlu1 %v8565_v61, %s7501_s28 }
0x1606   : > { %v3979_v56 = vpop.xlane.xlu1 %3978 }
0x1607   : > { %v3981_v24 = vsub.f32 %v3973_v54, %v3979_v56  ;;  %v3976_v44 = vpop.xlane.xlu0 %3975 }
0x1608   : > { %v3980_v34 = vsub.f32 %v3972_v55, %v3976_v44 }
0x1609   : > { %v3984_v59 = vmul.f32 1.442695, %v3981_v24 }
0x160a   : > { %v3982_v41 = vmul.f32 1.442695, %v3980_v34  ;;  %v3998_v27 = vpop.permute.xlu1 %3997 }
0x160b   : > { %6807 = vpow2.f32 %v3984_v59  ;;  %5983 = vmatpush3.bf16.msra.mxu0 %v3998_v27 }
0x160c   : > { %5984 = vmatprep.subr.bf16.mxu0 %v7493_v12  ;;  %6809 = vpow2.f32 %v3982_v41 }
0x160e   : > { %v6600_v47 = vpop.permute.xlu1 %6599 }
0x160f   : > { %v6602_v9 = vunpack.i.h.bf16 %v6600_v47  ;;  %v6601_v10 = vunpack.i.l.bf16 %v6600_v47 }
0x1611   : > { %v6199_v49 = vpack.c.bf16 %v6602_v9, %v6601_v10 }
0x1612   : > { %v6605_v17 = vpop.permute.xlu1 %6604 }
0x1613   : > { %v6607_v20 = vunpack.i.h.bf16 %v6605_v17  ;;  %v6606_v22 = vunpack.i.l.bf16 %v6605_v17 }
0x1615   : > { %v6808_v0 = vpop.eup %6807  ;;  %v6205_v57 = vpack.c.bf16 %v6607_v20, %v6606_v22 }
0x1616   : > { %v3989_v6 = vsel %vm2775_vm8, %v6808_v0, 0.0  ;;  %v6810_v60 = vpop.eup %6809  ;;  %v4050_v28 = vpop.permute.xlu1 %4049 }
0x1617   : > { %3990 = vadd.xlane.f32.xlu0 %v3989_v6  ;;  %v3986_v5 = vsel %vm2775_vm8, %v6810_v60, 0.0 }
0x161b   : > { %3987 = vadd.xlane.f32.xlu0 %v3986_v5 }
0x1631   : > { %3999 = vrot.lane.b32.xlu0 %v8549_v7, %s7507_s9 }
0x1635   : > { %4047 = vrot.lane.b32.xlu0 %v8563_v63, %s7501_s28  ;;  %s9144_s28 = smov 72  }
0x16a4   : > { %v3991_v1 = vpop.xlane.xlu0 %3990 }
0x16a5   : > { %6811 = vrcp.f32 %v3991_v1 }
0x16a8   : > { %v3988_v51 = vpop.xlane.xlu0 %3987 }
0x16a9   : > { %6813 = vrcp.f32 %v3988_v51 }
0x16ac   : > { %v4000_v11 = vpop.permute.xlu0 %3999 }
0x16ad   : > { %5985 = vmatpush3.bf16.msra.mxu0 %v4000_v11 }
0x16ae   : > { %6201 = vmatprep.subr.msk.bf16.mxu0 %vm8145_vm2, %v6199_v49 }
0x16af   : > { %v6812_v13 = vpop.eup %6811 }
0x16b0   : > { %v3995_v29 = vmul.f32 %v6812_v13, %v6808_v0  ;;  %v4048_v4 = vpop.permute.xlu0 %4047 }
0x16b3   : > { %v6814_v19 = vpop.eup %6813 }
0x16b4   : > { %v3994_v16 = vmul.f32 %v6814_v19, %v6810_v60 }
0x16b6   : > { %v3996_v23 = vpack.c.bf16 %v3995_v29, %v3994_v16 }
0x16b8   : > { %5987 = vmatmul.mubr.msk.bf16.vlgmr.msra.gmra.mrb[52].mxu0 %vm2775_vm8, %v3996_v23 }
0x16b9   : > { %6204 = vmatpush3.bf16.xpose.msk.msra.mxu0 %vm8145_vm2, %v6199_v49  ;;  %5998 = vmatprep.mubr.msk.f32.mxu0 %vm1400_vm1, %v4048_v4 }
0x16ba   : > { %6207 = vmatprep.subr.msk.bf16.mxu0 %vm8145_vm2, %v6205_v57 }
0x16c1   : > { %6210 = vmatpush3.bf16.xpose.msk.msra.mxu0 %vm8145_vm2, %v6205_v57 }
0x16c2   : > { %6020 = vmatprep.subr.bf16.mxu0 %v7493_v12 }
0x16c8   : > { %5999 = vmatmul.mubr.msk.f32.vlgmr.msra.gmra.mrb[50].mxu0 %vm1400_vm1, %v4050_v28 }
0x16c9   : > { %6024 = vmatprep.mubr.msk.bf16.mxu0 %vm7506_vm6, %v7493_v12 }
0x178b   : > { %v8762_v30 = vpop.f32.mrb[52].mxu0 }
0x178c   : > { %v5988_v31 = vpop.f32.mrb[53].mxu0 }
0x178d   : > { %v8764_v35 = vpop.f32.mrb[54].mxu0 }
0x178e   : > { %v6643_v14 = vpack.i.bf16 %v8764_v35, %v8762_v30  ;;  %v5989_v40 = vpop.f32.mrb[55].mxu0 }
0x179b   : > { %v6000_v38 = vpop.f32.mrb[50].mxu0 }
0x179c   : > { %v4147_v52 = vmul.f32 0.35355338, %v6000_v38  ;;  %v4137_v54 = vpop.f32.mrb[51].mxu0 }
0x179d   : > { %v4146_v55 = vmul.f32 0.35355338, %v4137_v54 }
0x179e   : > { %v4149_v26 = vadd.f32 %v4147_v52, %v8594_v25 }
0x179f   : > { %v4148_v42 = vadd.f32 %v4146_v55, %v8594_v25 }
0x17a0   : > { %v4153_v56 = vsel %vm2775_vm8, %v4149_v26, -inf }
0x17a1   : > { %4154 = vmax.xlane.f32.xlu1 %v4153_v56  ;;  %v4150_v24 = vsel %vm2775_vm8, %v4148_v42, -inf }
0x17a2   : > { %4151 = vmax.xlane.f32.xlu0 %v4150_v24 }
0x17b2   : > { %4173 = vrot.lane.b32.xlu1 %v8524_v45, %s7508_s3 }
0x17b6   : > { %6609 = vrot.lane.b32.xlu1 %v8526_v46, %s9142_s6 }
0x17ba   : > { %6614 = vrot.lane.b32.xlu1 %v8533_v48, %s9142_s6 }
0x17be   : > { %4225 = vrot.lane.b32.xlu1 %v8565_v61, %s9142_s6 }
0x182e   : > { %v4155_v44 = vpop.xlane.xlu1 %4154 }
0x182f   : > { %v4157_v34 = vsub.f32 %v4149_v26, %v4155_v44  ;;  %v4152_v59 = vpop.xlane.xlu0 %4151 }
0x1830   : > { %v4156_v41 = vsub.f32 %v4148_v42, %v4152_v59 }
0x1831   : > { %v4160_v27 = vmul.f32 1.442695, %v4157_v34 }
0x1832   : > { %v4158_v0 = vmul.f32 1.442695, %v4156_v41  ;;  %v4174_v6 = vpop.permute.xlu1 %4173 }
0x1833   : > { %6815 = vpow2.f32 %v4160_v27  ;;  %6002 = vmatpush3.bf16.msra.mxu1 %v4174_v6 }
0x1834   : > { %6003 = vmatprep.subr.bf16.mxu1 %v7493_v12  ;;  %6817 = vpow2.f32 %v4158_v0 }
0x1836   : > { %v6610_v10 = vpop.permute.xlu1 %6609 }
0x1837   : > { %v6612_v51 = vunpack.i.h.bf16 %v6610_v10  ;;  %v6611_v49 = vunpack.i.l.bf16 %v6610_v10 }
0x1839   : > { %v6211_v13 = vpack.c.bf16 %v6612_v51, %v6611_v49 }
0x183a   : > { %v6615_v20 = vpop.permute.xlu1 %6614 }
0x183b   : > { %v6617_v29 = vunpack.i.h.bf16 %v6615_v20  ;;  %v6616_v16 = vunpack.i.l.bf16 %v6615_v20 }
0x183d   : > { %v6816_v60 = vpop.eup %6815  ;;  %v6217_v28 = vpack.c.bf16 %v6617_v29, %v6616_v16 }
0x183e   : > { %v4165_v5 = vsel %vm2775_vm8, %v6816_v60, 0.0  ;;  %v6818_v1 = vpop.eup %6817  ;;  %v4226_v40 = vpop.permute.xlu1 %4225 }
0x183f   : > { %4166 = vadd.xlane.f32.xlu0 %v4165_v5  ;;  %v4162_v47 = vsel %vm2775_vm8, %v6818_v1, 0.0 }
0x1843   : > { %4163 = vadd.xlane.f32.xlu0 %v4162_v47 }
0x1859   : > { %4175 = vrot.lane.b32.xlu0 %v8549_v7, %s7508_s3 }
0x185d   : > { %4223 = vrot.lane.b32.xlu0 %v8563_v63, %s9142_s6  ;;  %s8951_s6 = scalar_lea.hbm %s9151_s0, %s5599_s11 }
0x18cc   : > { %v4167_v9 = vpop.xlane.xlu0 %4166 }
0x18cd   : > { %6819 = vrcp.f32 %v4167_v9 }
0x18d0   : > { %v4164_v11 = vpop.xlane.xlu0 %4163 }
0x18d1   : > { %6821 = vrcp.f32 %v4164_v11 }
0x18d4   : > { %v4176_v17 = vpop.permute.xlu0 %4175 }
0x18d5   : > { %6004 = vmatpush3.bf16.msra.mxu1 %v4176_v17 }
0x18d6   : > { %6213 = vmatprep.subr.msk.bf16.mxu1 %vm8145_vm2, %v6211_v13 }
0x18d7   : > { %v6820_v19 = vpop.eup %6819 }
0x18d8   : > { %v4171_v23 = vmul.f32 %v6820_v19, %v6816_v60  ;;  %v4224_v31 = vpop.permute.xlu0 %4223 }
0x18db   : > { %v6822_v22 = vpop.eup %6821 }
0x18dc   : > { %v4170_v57 = vmul.f32 %v6822_v22, %v6818_v1 }
0x18de   : > { %v4172_v4 = vpack.c.bf16 %v4171_v23, %v4170_v57 }
0x18e0   : > { %6006 = vmatmul.mubr.msk.bf16.vlgmr.msra.gmra.mrb[40].mxu1 %vm2775_vm8, %v4172_v4 }
0x18e1   : > { %6216 = vmatpush3.bf16.xpose.msk.msra.mxu1 %vm8145_vm2, %v6211_v13  ;;  %6017 = vmatprep.mubr.msk.f32.mxu1 %vm1400_vm1, %v4224_v31 }
0x18e2   : > { %6219 = vmatprep.subr.msk.bf16.mxu1 %vm8145_vm2, %v6217_v28 }
0x18e9   : > { %6222 = vmatpush3.bf16.xpose.msk.msra.mxu1 %vm8145_vm2, %v6217_v28 }
0x18ea   : > { %6039 = vmatprep.subr.bf16.mxu1 %v7493_v12 }
0x18f0   : > { %6018 = vmatmul.mubr.msk.f32.vlgmr.msra.gmra.mrb[44].mxu1 %vm1400_vm1, %v4226_v40 }
0x18f1   : > { %6043 = vmatprep.mubr.msk.bf16.mxu1 %vm7506_vm6, %v7493_v12 }
0x19b3   : > { %v8801_v38 = vpop.f32.mrb[40].mxu1 }
0x19b4   : > { %v6007_v52 = vpop.f32.mrb[41].mxu1 }
0x19b5   : > { %v8803_v54 = vpop.f32.mrb[42].mxu1 }
0x19b6   : > { %v6648_v55 = vpack.i.bf16 %v8803_v54, %v8801_v38  ;;  %v6008_v26 = vpop.f32.mrb[43].mxu1  ;;  %v6690_v38 = vld [vmem:[#allocation23 + $0x18] sm:$0xff]  }
0x19c3   : > { %v6019_v42 = vpop.f32.mrb[44].mxu1 }
0x19c4   : > { %v4323_v56 = vmul.f32 0.35355338, %v6019_v42  ;;  %v4313_v24 = vpop.f32.mrb[45].mxu1 }
0x19c5   : > { %v4322_v44 = vmul.f32 0.35355338, %v4313_v24 }
0x19c6   : > { %v4325_v34 = vadd.f32 %v4323_v56, %v8594_v25 }
0x19c7   : > { %v4324_v59 = vadd.f32 %v4322_v44, %v8594_v25 }
0x19c8   : > { %v4329_v41 = vsel %vm2775_vm8, %v4325_v34, -inf }
0x19c9   : > { %4330 = vmax.xlane.f32.xlu1 %v4329_v41  ;;  %v4326_v27 = vsel %vm2775_vm8, %v4324_v59, -inf }
0x19ca   : > { %4327 = vmax.xlane.f32.xlu0 %v4326_v27 }
0x19da   : > { %4349 = vrot.lane.b32.xlu1 %v8524_v45, %s9143_s24 }
0x19de   : > { %6619 = vrot.lane.b32.xlu1 %v8526_v46, %s9144_s28 }
0x19e2   : > { %6624 = vrot.lane.b32.xlu1 %v8533_v48, %s9144_s28 }
0x19e6   : > { %4401 = vrot.lane.b32.xlu1 %v8565_v61, %s9144_s28 }
0x1a56   : > { %v4331_v0 = vpop.xlane.xlu1 %4330 }
0x1a57   : > { %v4333_v6 = vsub.f32 %v4325_v34, %v4331_v0  ;;  %v4328_v60 = vpop.xlane.xlu0 %4327 }
0x1a58   : > { %v4332_v5 = vsub.f32 %v4324_v59, %v4328_v60 }
0x1a59   : > { %v4336_v1 = vmul.f32 1.442695, %v4333_v6 }
0x1a5a   : > { %v4334_v47 = vmul.f32 1.442695, %v4332_v5  ;;  %v4350_v9 = vpop.permute.xlu1 %4349 }
0x1a5b   : > { %6823 = vpow2.f32 %v4336_v1  ;;  %6021 = vmatpush3.bf16.msra.mxu0 %v4350_v9 }
0x1a5c   : > { %6022 = vmatprep.subr.bf16.mxu0 %v7493_v12  ;;  %6825 = vpow2.f32 %v4334_v47 }
0x1a5e   : > { %v6620_v49 = vpop.permute.xlu1 %6619 }
0x1a5f   : > { %v6622_v11 = vunpack.i.h.bf16 %v6620_v49  ;;  %v6621_v13 = vunpack.i.l.bf16 %v6620_v49 }
0x1a61   : > { %v6223_v19 = vpack.c.bf16 %v6622_v11, %v6621_v13 }
0x1a62   : > { %v6625_v29 = vpop.permute.xlu1 %6624 }
0x1a63   : > { %v6627_v23 = vunpack.i.h.bf16 %v6625_v29  ;;  %v6626_v57 = vunpack.i.l.bf16 %v6625_v29 }
0x1a65   : > { %v6824_v10 = vpop.eup %6823  ;;  %v6229_v31 = vpack.c.bf16 %v6627_v23, %v6626_v57 }
0x1a66   : > { %v4341_v46 = vsel %vm2775_vm8, %v6824_v10, 0.0  ;;  %v6826_v51 = vpop.eup %6825  ;;  %v4402_v52 = vpop.permute.xlu1 %4401 }
0x1a67   : > { %4342 = vadd.xlane.f32.xlu0 %v4341_v46  ;;  %v4338_v48 = vsel %vm2775_vm8, %v6826_v51, 0.0 }
0x1a6b   : > { %4339 = vadd.xlane.f32.xlu0 %v4338_v48 }
0x1a81   : > { %4351 = vrot.lane.b32.xlu0 %v8549_v7, %s9143_s24 }
0x1a85   : > { %4399 = vrot.lane.b32.xlu0 %v8563_v63, %s9144_s28  ;;  %s7341_s28 = sshll.u32 %s7510_s2, 4  ;;  %s7342_s28 = int_to_ptr.vmem [resolvable:$false] %s7341_s28 }
0x1a86   : > { %p7344_p12 = scmp.lt.s32.totalorder %s8955_s23, %s7342_s28 }
0x1af4   : > { %v4343_v61 = vpop.xlane.xlu0 %4342 }
0x1af5   : > { %6827 = vrcp.f32 %v4343_v61 }
0x1af8   : > { %v4340_v17 = vpop.xlane.xlu0 %4339 }
0x1af9   : > { %6829 = vrcp.f32 %v4340_v17 }
0x1afc   : > { %v4352_v20 = vpop.permute.xlu0 %4351 }
0x1afd   : > { %6023 = vmatpush3.bf16.msra.mxu0 %v4352_v20 }
0x1afe   : > { %6225 = vmatprep.subr.msk.bf16.mxu0 %vm8145_vm2, %v6223_v19 }
0x1aff   : > { %v6828_v22 = vpop.eup %6827 }
0x1b00   : > { %v4347_v4 = vmul.f32 %v6828_v22, %v6824_v10  ;;  %v4400_v40 = vpop.permute.xlu0 %4399 }
0x1b03   : > { %v6830_v16 = vpop.eup %6829 }
0x1b04   : > { %v4346_v63 = vmul.f32 %v6830_v16, %v6826_v51 }
0x1b06   : > { %v4348_v28 = vpack.c.bf16 %v4347_v4, %v4346_v63 }
0x1b08   : > { %6025 = vmatmul.mubr.msk.bf16.vlgmr.msra.gmra.mrb[56].mxu0 %vm2775_vm8, %v4348_v28 }
0x1b09   : > { %6228 = vmatpush3.bf16.xpose.msk.msra.mxu0 %vm8145_vm2, %v6223_v19  ;;  %6036 = vmatprep.mubr.msk.f32.mxu0 %vm1400_vm1, %v4400_v40 }
0x1b0a   : > { %6231 = vmatprep.subr.msk.bf16.mxu0 %vm8145_vm2, %v6229_v31 }
0x1b11   : > { %6234 = vmatpush3.bf16.xpose.msk.msra.mxu0 %vm8145_vm2, %v6229_v31 }
0x1b12   : > { %6059 = vmatprep.subr.bf16.mxu0 %v7493_v12 }
0x1b18   : > { %6037 = vmatmul.mubr.msk.f32.vlgmr.msra.gmra.mrb[60].mxu0 %vm1400_vm1, %v4402_v52 }
0x1b19   : > { %6067 = vmatprep.mubr.msk.bf16.mxu0 %vm7506_vm6, %v7493_v12 }
0x1bdb   : > { %v4392_v26 = vpop.f32.mrb[56].mxu0 }
0x1bdc   : > { %v6026_v42 = vpop.f32.mrb[57].mxu0 }
0x1bdd   : > { %v4395_v56 = vpop.f32.mrb[58].mxu0 }
0x1bde   : > { %v6653_v24 = vpack.i.bf16 %v4395_v56, %v4392_v26  ;;  %v6027_v44 = vpop.f32.mrb[59].mxu0 }
0x1beb   : > { %v6038_v34 = vpop.f32.mrb[60].mxu0 }
0x1bec   : > { %v4499_v59 = vmul.f32 0.35355338, %v6038_v34  ;;  %v4489_v41 = vpop.f32.mrb[61].mxu0 }
0x1bed   : > { %v4498_v27 = vmul.f32 0.35355338, %v4489_v41 }
0x1bee   : > { %v4501_v33 = vadd.f32 %v4499_v59, %v8594_v25 }
0x1bef   : > { %v4500_v0 = vadd.f32 %v4498_v27, %v8594_v25 }
0x1bf0   : > { %v4505_v6 = vsel %vm2775_vm8, %v4501_v33, -inf }
0x1bf1   : > { %4506 = vmax.xlane.f32.xlu1 %v4505_v6  ;;  %v4502_v60 = vsel %vm2775_vm8, %v4500_v0, -inf }
0x1bf2   : > { %4503 = vmax.xlane.f32.xlu0 %v4502_v60 }
0x1c02   : > { %4525 = vrot.lane.b32.xlu1 %v8524_v45, %s9145_s13 }
0x1c06   : > { %6629 = vrot.lane.b32.xlu1 %v6628_v37, %s9145_s13 }
0x1c0a   : > { %6634 = vrot.lane.b32.xlu1 %v6633_v39, %s9143_s24  ;;  %s5064_s24 = scalar_lea.sflag [#allocation4], %s8056_s17 }
0x1c0e   : > { %6644 = vrot.lane.b32.xlu1 %v6643_v14, %s7507_s9  ;;  %s9146_s9 = sld [smem:[#allocation62_spill]] }
0x1c12   : > { %6654 = vrot.lane.b32.xlu1 %v6653_v24, %s7496_s4  ;;  %s9149_s4 = sld [smem:[#allocation61_spill]] }
0x1c7e   : > { %v4507_v25 = vpop.xlane.xlu1 %4506 }
0x1c7f   : > { %v4509_v5 = vsub.f32 %v4501_v33, %v4507_v25  ;;  %v4504_v45 = vpop.xlane.xlu0 %4503 }
0x1c80   : > { %v4508_v1 = vsub.f32 %v4500_v0, %v4504_v45 }
0x1c81   : > { %v4512_v47 = vmul.f32 1.442695, %v4509_v5 }
0x1c82   : > { %v4510_v9 = vmul.f32 1.442695, %v4508_v1  ;;  %v4526_v8 = vpop.permute.xlu1 %4525 }
0x1c83   : > { %6831 = vpow2.f32 %v4512_v47  ;;  %6040 = vmatpush3.bf16.msra.mxu1 %v4526_v8 }
0x1c84   : > { %6041 = vmatprep.subr.bf16.mxu1 %v7493_v12  ;;  %6833 = vpow2.f32 %v4510_v9  ;;  %v5564_v9 = vld [vmem:[#allocation25] ss:$0 sm:$0xff] }
0x1c86   : > { %v6630_v11 = vpop.permute.xlu1 %6629 }
0x1c87   : > { %v6632_v19 = vunpack.i.h.bf16 %v6630_v11  ;;  %v6631_v20 = vunpack.i.l.bf16 %v6630_v11 }
0x1c89   : > { %v4632_v63 = vsel %vm1400_vm1, %v8643_v43, %v6632_v19  ;;  %v4631_v28 = vsel %vm1400_vm1, %v8641_v15, %v6631_v20 }
0x1c8a   : > { %v6635_v13 = vpop.permute.xlu1 %6634 }
0x1c8b   : > { %v6637_v22 = vunpack.i.h.bf16 %v6635_v13  ;;  %v6636_v29 = vunpack.i.l.bf16 %v6635_v13 }
0x1c8d   : > { %v6832_v53 = vpop.eup %6831  ;;  %v4633_v31 = vsel %vm1488_vm5, %v4631_v28, %v6636_v29  ;;  %v4634_v40 = vsel %vm1488_vm5, %v4632_v63, %v6637_v22  ;;  %v5570_v22 = vld [vmem:[#allocation26] ss:$0 sm:$0xff] }
0x1c8e   : > { %v4517_v37 = vsel %vm2775_vm8, %v6832_v53, 0.0  ;;  %v6834_v32 = vpop.eup %6833  ;;  %v6645_v16 = vpop.permute.xlu1 %6644 }
0x1c8f   : > { %4518 = vadd.xlane.f32.xlu0 %v4517_v37  ;;  %v4514_v36 = vsel %vm2775_vm8, %v6834_v32, 0.0  ;;  %v6647_v24 = vunpack.i.h.bf16 %v6645_v16  ;;  %v6646_v44 = vunpack.i.l.bf16 %v6645_v16 }
0x1c92   : > { %v6655_v34 = vpop.permute.xlu1 %6654 }
0x1c93   : > { %4515 = vadd.xlane.f32.xlu0 %v4514_v36  ;;  %v6657_v27 = vunpack.i.h.bf16 %v6655_v34  ;;  %v6656_v33 = vunpack.i.l.bf16 %v6655_v34 }
0x1ca9   : > { %4527 = vrot.lane.b32.xlu0 %v8549_v7, %s9145_s13 }
0x1cad   : > { %6639 = vrot.lane.b32.xlu0 %v6638_v18, %s7508_s3  ;;  %v6689_v18 = vld [vmem:[#allocation23 + $0x10] sm:$0xff]   ;;  %s9147_s3 = sld [smem:[#allocation64_spill]] }
0x1cb1   : > { %6649 = vrot.lane.b32.xlu0 %v6648_v55, %s7504_s7  ;;  %s9150_s7 = sld [smem:[#allocation63_spill]] }
0x1d1c   : > { %v4519_v39 = vpop.xlane.xlu0 %4518 }
0x1d1d   : > { %6835 = vrcp.f32 %v4519_v39 }
0x1d20   : > { %v4516_v30 = vpop.xlane.xlu0 %4515 }
0x1d21   : > { %6837 = vrcp.f32 %v4516_v30 }
0x1d24   : > { %v4528_v35 = vpop.permute.xlu0 %4527 }
0x1d25   : > { %6042 = vmatpush3.bf16.msra.mxu1 %v4528_v35 }
0x1d26   : > { %6047 = vmatprep.subr.bf16.mxu1 %v7493_v12 }
0x1d27   : > { %v6836_v14 = vpop.eup %6835 }
0x1d28   : > { %v4523_v10 = vmul.f32 %v6836_v14, %v6832_v53  ;;  %v6640_v17 = vpop.permute.xlu0 %6639 }
0x1d29   : > { %v6642_v23 = vunpack.i.h.bf16 %v6640_v17  ;;  %v6641_v57 = vunpack.i.l.bf16 %v6640_v17 }
0x1d2b   : > { %v6838_v7 = vpop.eup %6837  ;;  %v4636_v52 = vsel %vm2772_vm7, %v4634_v40, %v6642_v23  ;;  %v4635_v26 = vsel %vm2772_vm7, %v4633_v31, %v6641_v57  ;;  %v5571_v23 = vld [vmem:[#allocation28] ss:$0 sm:$0xff] }
0x1d2c   : > { %v4522_v46 = vmul.f32 %v6838_v7, %v6834_v32  ;;  %v6650_v4 = vpop.permute.xlu0 %6649  ;;  %v4637_v59 = vsel %vm2775_vm8, %v4635_v26, %v6646_v44  ;;  %v4638_v43 = vsel %vm2775_vm8, %v4636_v52, %v6647_v24 }
0x1d2d   : > { %v6652_v42 = vunpack.i.h.bf16 %v6650_v4  ;;  %v6651_v56 = vunpack.i.l.bf16 %v6650_v4 }
0x1d2e   : > { %v4524_v51 = vpack.c.bf16 %v4523_v10, %v4522_v46 }
0x1d2f   : > { %v4639_v41 = vsel %vm2778_vm9, %v4637_v59, %v6651_v56  ;;  %v4640_v15 = vsel %vm2778_vm9, %v4638_v43, %v6652_v42 }
0x1d30   : > { %6044 = vmatmul.mubr.msk.bf16.vlgmr.msra.gmra.mrb[48].mxu1 %vm2775_vm8, %v4524_v51  ;;  %v4641_v25 = vsel %vm2781_vm10, %v4639_v41, %v6656_v33  ;;  %v4642_v5 = vsel %vm2781_vm10, %v4640_v15, %v6657_v27  ;;  %v6691_v27 = vld [vmem:[%s9146_s9] sm:$0xff]   ;;  %v6692_v33 = vld [vmem:[%s9146_s9 + $0x8] sm:$0xff]  }
0x1d31   : > { %6055 = vmatprep.mubr.msk.bf16.mxu1 %vm7506_vm6, %v7493_v12  ;;  %6048 = vmatpush3.bf16.msra.mxu1 %v6687_v21 }
0x1d32   : > { %6049 = vmatprep.subr.bf16.mxu1 %v7493_v12  ;;  %6060 = vmatpush3.bf16.msra.mxu0 %v6691_v27 }
0x1d33   : > { %6061 = vmatprep.subr.bf16.mxu0 %v7493_v12 }
0x1d35   : > { %6050 = vmatpush3.bf16.msra.mxu1 %v6688_v3 }
0x1d36   : > { %6051 = vmatprep.subr.bf16.mxu1 %v7493_v12  ;;  %6062 = vmatpush3.bf16.msra.mxu0 %v6692_v33 }
0x1d37   : > { %6063 = vmatprep.subr.bf16.mxu0 %v7493_v12 }
0x1d39   : > { %6052 = vmatpush3.bf16.msra.mxu1 %v6689_v18 }
0x1d3a   : > { %6053 = vmatprep.subr.bf16.mxu1 %v7493_v12 }
0x1d3d   : > { %6054 = vmatpush3.bf16.msra.mxu1 %v6690_v38 }
0x1d3e   : > { %6071 = vmatprep.subr.bf16.mxu1 %v7493_v12 }
0x1e03   : > { %v4568_v54 = vpop.f32.mrb[48].mxu1 }
0x1e04   : > { %v6045_v55 = vpop.f32.mrb[49].mxu1 }
0x1e05   : > { %v4571_v48 = vpop.f32.mrb[50].mxu1 }
0x1e06   : > { %v6658_v61 = vpack.i.bf16 %v4571_v48, %v4568_v54  ;;  %v6046_v49 = vpop.f32.mrb[51].mxu1 }
0x1e08   : > { %6659 = vrot.lane.b32.xlu0 %v6658_v61, %s9135_s29  ;;  %s9148_s29 = sld [smem:[#allocation60_spill]] }
0x1e7a   : > { %v6660_v0 = vpop.permute.xlu0 %6659 }
0x1e7b   : > { %v6662_v6 = vunpack.i.h.bf16 %v6660_v0  ;;  %v6661_v60 = vunpack.i.l.bf16 %v6660_v0  ;;  %v6693_v0 = vld [vmem:[%s9146_s9 + $0x10] sm:$0xff]  }
0x1e7c   : > { %6064 = vmatpush3.bf16.msra.mxu0 %v6693_v0 }
0x1e7d   : > { %v4643_v45 = vsel %vm2784_vm11, %v4641_v25, %v6661_v60  ;;  %v4644_v1 = vsel %vm2784_vm11, %v4642_v5, %v6662_v6  ;;  %v6694_v6 = vld [vmem:[%s9146_s9 + $0x18] sm:$0xff]   ;;  %6065 = vmatprep.subr.bf16.mxu0 %v7493_v12  ;;  %v6695_v60 = vld [vmem:[%s9147_s3] sm:$0xff]   ;;  %v6696_v25 = vld [vmem:[%s9147_s3 + $0x8] sm:$0xff]  }
0x1e7e   : > { %v4645_v47 = vpack.c.bf16 %v4644_v1, %v4643_v45  ;;  %v6697_v5 = vld [vmem:[%s9147_s3 + $0x10] sm:$0xff]   ;;  %v6698_v45 = vld [vmem:[%s9147_s3 + $0x18] sm:$0xff]   ;;  %v6699_v1 = vld [vmem:[%s9147_s3 + $0x20] sm:$0xff]  }
0x1e80   : > { %6056 = vmatmul.mubr.msk.bf16.vlgmr.msra.gmra.mrb[52].mxu1 %vm1331_vm0, %v4645_v47  ;;  %6066 = vmatpush3.bf16.msra.mxu0 %v6694_v6  ;;  %v6700_v47 = vld [vmem:[%s9147_s3 + $0x28] sm:$0xff]  }
0x1e81   : > { %6087 = vmatprep.mubr.msk.bf16.mxu1 %vm7506_vm6, %v7493_v12  ;;  %6072 = vmatpush3.bf16.msra.mxu1 %v6695_v60 }
0x1e82   : > { %6073 = vmatprep.subr.bf16.mxu1 %v7493_v12 }
0x1e85   : > { %6074 = vmatpush3.bf16.msra.mxu1 %v6696_v25 }
0x1e86   : > { %6075 = vmatprep.subr.bf16.mxu1 %v7493_v12 }
0x1e89   : > { %6076 = vmatpush3.bf16.msra.mxu1 %v6697_v5 }
0x1e8a   : > { %6077 = vmatprep.subr.bf16.mxu1 %v7493_v12 }
0x1e8d   : > { %6078 = vmatpush3.bf16.msra.mxu1 %v6698_v45  ;;  %v5589_v45 = vld [vmem:[%s7660_s21] ss:$0 sm:$0xff] }
0x1e8e   : > { %6079 = vmatprep.subr.bf16.mxu1 %v7493_v12 }
0x1e91   : > { %6080 = vmatpush3.bf16.msra.mxu1 %v6699_v1 }
0x1e92   : > { %6081 = vmatprep.subr.bf16.mxu1 %v7493_v12 }
0x1e95   : > { %6082 = vmatpush3.bf16.msra.mxu1 %v6700_v47 }
0x1e96   : > { %6083 = vmatprep.subr.bf16.mxu1 %v7493_v12 }
0x1f53   : > { %v4713_v8 = vpop.f32.mrb[52].mxu1 }
0x1f54   : > { %v4714_v53 = vadd.f32 %v5564_v9, %v4713_v8  ;;  %v6057_v37 = vpop.f32.mrb[53].mxu1 }
0x1f55   : > { %v4716_v32 = vpop.f32.mrb[54].mxu1 }
0x1f56   : > { %v4720_v36 = vadd.f32 %v4714_v53, %v8542_v2  ;;  %v4717_v39 = vadd.f32 %v5564_v9, %v4716_v32  ;;  %v6058_v30 = vpop.f32.mrb[55].mxu1 }
0x1f57   : > { %v5572_v30 = vld [vmem:[%s9148_s29] ss:$0 sm:$0xff]  ;;  %s7343_s29 = scalar_lea.vmem %s7342_s28, 512 }
0x1f58   : > { %v4721_v35 = vadd.f32 %v4717_v39, %v8545_v58  ;;  %v4724_v14 = vsel %vm1331_vm0, %v4720_v36, 0.0  ;;  %p7345_p0 = scmp.lt.s32.totalorder %s7343_s29, %s7337_s26 }
0x1f59   : > { %4725 = vadd.xlane.f32.xlu1 %v4724_v14 }
0x1f5a   : > { %v4727_v7 = vsel %vm1331_vm0, %v4721_v35, 0.0  ;;  %p7346_p2 = por %p7345_p0, %p7344_p12 }
0x1f5b   : > { %4728 = vadd.xlane.f32.xlu0 %v4727_v7  ;;  %v5573_v7 = vld [vmem:[%s9149_s4] ss:$0 sm:$0xff] }
0x1f5c   : > { %p7347_p9 = pnand %p7346_p2, %p7340_p5 }
0x1fe6   : > { %v4726_v10 = vpop.xlane.xlu1 %4725 }
0x1fe7   : > { %v4730_v46 = vmul.f32 0.015625, %v4726_v10 }
0x1fe8   : > { %v4729_v51 = vpop.xlane.xlu0 %4728 }
0x1fe9   : > { %v4732_v21 = vsub.f32 %v4720_v36, %v4730_v46  ;;  %v4731_v3 = vmul.f32 0.015625, %v4729_v51 }
0x1feb   : > { %v4733_v18 = vsub.f32 %v4721_v35, %v4731_v3  ;;  %v4734_v38 = vmul.f32 %v4732_v21, %v4732_v21 }
0x1fed   : > { %v4736_v54 = vsel %vm1331_vm0, %v4734_v38, 0.0  ;;  %v4735_v55 = vmul.f32 %v4733_v18, %v4733_v18 }
0x1fee   : > { %4737 = vadd.xlane.f32.xlu0 %v4736_v54 }
0x1fef   : > { %v4739_v48 = vsel %vm1331_vm0, %v4735_v55, 0.0  ;;  %v6701_v55 = vld [vmem:[%s9147_s3 + $0x30] sm:$0xff]  }
0x1ff0   : > { %4740 = vadd.xlane.f32.xlu1 %v4739_v48  ;;  %6084 = vmatpush3.bf16.msra.mxu1 %v6701_v55  ;;  %v6702_v48 = vld [vmem:[%s9147_s3 + $0x38] sm:$0xff]  }
0x1ff1   : > { %6085 = vmatprep.subr.bf16.mxu1 %v7493_v12 }
0x1ff4   : > { %6086 = vmatpush3.bf16.msra.mxu1 %v6702_v48 }
0x207b   : > { %v4738_v61 = vpop.xlane.xlu0 %4737 }
0x207c   : > { %v4742_v49 = vmul.f32 0.015625, %v4738_v61  ;;  %v5574_v61 = vld [vmem:[%s9150_s7] ss:$0 sm:$0xff] }
0x207d   : > { %v4741_v11 = vpop.xlane.xlu1 %4740 }
0x207e   : > { %v4744_v13 = vadd.f32 1e-05, %v4742_v49  ;;  %v4743_v17 = vmul.f32 0.015625, %v4741_v11 }
0x2080   : > { %6839 = vrsqrt.f32 %v4744_v13  ;;  %v4745_v19 = vadd.f32 1e-05, %v4743_v17 }
0x2082   : > { %6841 = vrsqrt.f32 %v4745_v19 }
0x208a   : > { %v6840_v20 = vpop.eup %6839 }
0x208b   : > { %v4748_v29 = vmul.f32 %v6840_v20, %v4732_v21 }
0x208c   : > { %v6842_v16 = vpop.eup %6841 }
0x208d   : > { %v4756_v57 = vmul.f32 %v5570_v22, %v4748_v29  ;;  %v4749_v4 = vmul.f32 %v6842_v16, %v4733_v18 }
0x208f   : > { %v4764_v63 = vadd.f32 %v5571_v23, %v4756_v57  ;;  %v4757_v28 = vmul.f32 %v5570_v22, %v4749_v4 }
0x2091   : > { %v4766_v31 = vadd.f32 %v4764_v63, %v8542_v2  ;;  %v4765_v40 = vadd.f32 %v5571_v23, %v4757_v28  ;;  %v5580_v23 = vld [vmem:[%s7655_s25] ss:$0 sm:$0xff] }
0x2093   : > { %v4770_v52 = vsel %vm1331_vm0, %v4766_v31, 0.0  ;;  %v4767_v26 = vadd.f32 %v4765_v40, %v8545_v58 }
0x2094   : > { %4771 = vadd.xlane.f32.xlu0 %v4770_v52 }
0x2095   : > { %v4773_v42 = vsel %vm1331_vm0, %v4767_v26, 0.0 }
0x2096   : > { %4774 = vadd.xlane.f32.xlu1 %v4773_v42 }
0x2121   : > { %v4772_v56 = vpop.xlane.xlu0 %4771 }
0x2122   : > { %v4776_v24 = vmul.f32 0.015625, %v4772_v56 }
0x2123   : > { %v4775_v44 = vpop.xlane.xlu1 %4774 }
0x2124   : > { %v4778_v34 = vsub.f32 %v4766_v31, %v4776_v24  ;;  %v4777_v59 = vmul.f32 0.015625, %v4775_v44 }
0x2126   : > { %v4779_v43 = vsub.f32 %v4767_v26, %v4777_v59  ;;  %v4780_v2 = vmul.f32 %v4778_v34, %v4778_v34 }
0x2128   : > { %v4782_v41 = vsel %vm1331_vm0, %v4780_v2, 0.0  ;;  %v4781_v15 = vmul.f32 %v4779_v43, %v4779_v43 }
0x2129   : > { %4783 = vadd.xlane.f32.xlu0 %v4782_v41 }
0x212a   : > { %v4785_v58 = vsel %vm1331_vm0, %v4781_v15, 0.0 }
0x212b   : > { %4786 = vadd.xlane.f32.xlu1 %v4785_v58 }
0x21b6   : > { %v4784_v9 = vpop.xlane.xlu0 %4783 }
0x21b7   : > { %v4788_v8 = vmul.f32 0.015625, %v4784_v9  ;;  %v5590_v9 = vld [vmem:[%s7665_s5] ss:$0 sm:$0xff] }
0x21b8   : > { %v4787_v53 = vpop.xlane.xlu1 %4786 }
0x21b9   : > { %v4790_v37 = vadd.f32 1e-05, %v4788_v8  ;;  %v4789_v32 = vmul.f32 0.015625, %v4787_v53 }
0x21bb   : > { %6843 = vrsqrt.f32 %v4790_v37  ;;  %v4791_v36 = vadd.f32 1e-05, %v4789_v32 }
0x21bd   : > { %6845 = vrsqrt.f32 %v4791_v36 }
0x21c5   : > { %v6844_v39 = vpop.eup %6843 }
0x21c6   : > { %v4794_v35 = vmul.f32 %v6844_v39, %v4778_v34 }
0x21c7   : > { %v6846_v14 = vpop.eup %6845 }
0x21c8   : > { %v4802_v10 = vmul.f32 %v5572_v30, %v4794_v35  ;;  %v4795_v46 = vmul.f32 %v6846_v14, %v4779_v43 }
0x21ca   : > { %v4803_v51 = vmul.f32 %v5572_v30, %v4795_v46  ;;  %v4810_v21 = vadd.f32 %v5573_v7, %v4802_v10 }
0x21cc   : > { %v4811_v3 = vadd.f32 %v5573_v7, %v4803_v51  ;;  %v4812_v18 = vmul.f32 %v4810_v21, %v8537_v50 }
0x21ce   : > { %v4813_v38 = vmul.f32 %v4811_v3, %v8539_v62 }
0x21d0   : > { %v4814_v54 = vpack.c.bf16 %v4813_v38, %v4812_v18 }
0x21d2   : > { %6068 = vmatmul.mubr.msk.bf16.vlgmr.msra.gmra.mrb[64].mxu0 %vm1331_vm0, %v4814_v54 }
0x22a5   : > { %v4891_v49 = vpop.f32.mrb[64].mxu0 }
0x22a6   : > { %v4892_v11 = vadd.f32 %v5574_v61, %v4891_v49  ;;  %v6069_v13 = vpop.f32.mrb[65].mxu0 }
0x22a7   : > { %v4894_v17 = vpop.f32.mrb[66].mxu0 }
0x22a8   : > { %v4895_v19 = vadd.f32 %v5574_v61, %v4894_v17  ;;  %v6070_v20 = vpop.f32.mrb[67].mxu0  ;;  %v4898_v22 = vmax.f32 %v4892_v11, 0.0 }
0x22aa   : > { %v4899_v29 = vmax.f32 %v4895_v19, 0.0 }
0x22ac   : > { %v4900_v16 = vpack.c.bf16 %v4899_v29, %v4898_v22 }
0x22ae   : > { %6088 = vmatmul.mubr.bf16.vlgmr.msra.gmra.mrb[56].mxu1 %v4900_v16 }
0x2381   : > { %v5006_v57 = vpop.f32.mrb[56].mxu1 }
0x2382   : > { %v5007_v4 = vadd.f32 %v5580_v23, %v5006_v57  ;;  %v6089_v63 = vpop.f32.mrb[57].mxu1 }
0x2383   : > { %v5009_v28 = vpop.f32.mrb[58].mxu1 }
0x2384   : > { %v5013_v31 = vadd.f32 %v5007_v4, %v4812_v18  ;;  %v5010_v12 = vadd.f32 %v5580_v23, %v5009_v28  ;;  %v6090_v40 = vpop.f32.mrb[59].mxu1 }
0x2386   : > { %v5014_v52 = vadd.f32 %v5010_v12, %v4813_v38  ;;  %v5017_v26 = vsel %vm1331_vm0, %v5013_v31, 0.0 }
0x2387   : > { %5018 = vadd.xlane.f32.xlu0 %v5017_v26 }
0x2388   : > { %v5020_v42 = vsel %vm1331_vm0, %v5014_v52, 0.0 }
0x2389   : > { %5021 = vadd.xlane.f32.xlu1 %v5020_v42 }
0x2414   : > { %v5019_v56 = vpop.xlane.xlu0 %5018 }
0x2415   : > { %v5023_v24 = vmul.f32 0.015625, %v5019_v56 }
0x2416   : > { %v5022_v44 = vpop.xlane.xlu1 %5021 }
0x2417   : > { %v5025_v34 = vsub.f32 %v5013_v31, %v5023_v24  ;;  %v5024_v59 = vmul.f32 0.015625, %v5022_v44 }
0x2419   : > { %v5026_v43 = vsub.f32 %v5014_v52, %v5024_v59  ;;  %v5027_v2 = vmul.f32 %v5025_v34, %v5025_v34 }
0x241b   : > { %v5029_v41 = vsel %vm1331_vm0, %v5027_v2, 0.0  ;;  %v5028_v15 = vmul.f32 %v5026_v43, %v5026_v43 }
0x241c   : > { %5030 = vadd.xlane.f32.xlu0 %v5029_v41 }
0x241d   : > { %v5032_v58 = vsel %vm1331_vm0, %v5028_v15, 0.0 }
0x241e   : > { %5033 = vadd.xlane.f32.xlu1 %v5032_v58 }
0x24a9   : > { %v5031_v27 = vpop.xlane.xlu0 %5030 }
0x24aa   : > { %v5035_v33 = vmul.f32 0.015625, %v5031_v27 }
0x24ab   : > { %v5034_v0 = vpop.xlane.xlu1 %5033 }
0x24ac   : > { %v5037_v6 = vadd.f32 1e-05, %v5035_v33  ;;  %v5036_v60 = vmul.f32 0.015625, %v5034_v0 }
0x24ae   : > { %6847 = vrsqrt.f32 %v5037_v6  ;;  %v5038_v25 = vadd.f32 1e-05, %v5036_v60 }
0x24b0   : > { %6849 = vrsqrt.f32 %v5038_v25 }
0x24b8   : > { %v6848_v5 = vpop.eup %6847 }
0x24b9   : > { %v5041_v1 = vmul.f32 %v6848_v5, %v5025_v34 }
0x24ba   : > { %v6850_v47 = vpop.eup %6849 }
0x24bb   : > { %v5049_v8 = vmul.f32 %v5589_v45, %v5041_v1  ;;  %v5042_v53 = vmul.f32 %v6850_v47, %v5026_v43 }
0x24bd   : > { %v5057_v37 = vadd.f32 %v5590_v9, %v5049_v8  ;;  %v5050_v32 = vmul.f32 %v5589_v45, %v5042_v53 }
0x24bf   : > { %v5059_v36 = vmul.f32 %v5057_v37, %v8537_v50  ;;  %v5058_v39 = vadd.f32 %v5590_v9, %v5050_v32 }
0x24c1   : > { %v5060_v30 = vmul.f32 %v5058_v39, %v8539_v62  ;;  %5061 = vst.msk [vmem:[%s1254_s10] sm:$0xff] %vm1331_vm0, %v5059_v36 }
0x24c3   : > { %5062 = vst.msk [vmem:[%s1254_s10 + $0x8] sm:$0xff] %vm1331_vm0, %v5060_v30 }
0x24c4   : > { %7350 = shalt.err (!%p7347_p9)
}
0x24c5   : > { %s7351_s4 = scalar_lea.hbm %s8951_s6, 256  ;;  %s7355_s7 = scalar_lea.hbm %s9152_s22, 512 }
0x24c6   : > { %p7352_p7 = scmp.ne.s32.totalorder %s8951_s6, %s7351_s4  ;;  %p7356_p11 = scmp.lt.u32.totalorder %s8951_s6, %s9152_s22 }
0x24c7   : > { %p7357_p6 = scmp.lt.u32.totalorder %s7355_s7, %s7351_s4  ;;  %p7359_p8 = scmp.lt.u32.totalorder %s7351_s4, %s8951_s6 }
0x24c8   : > { %p7353_p1 = pnand %p7352_p7, %p9153_p4 }
0x24c9   : > { %p7358_p10 = por %p7357_p6, %p7356_p11 }
0x24ca   : > { %p7354_p3 = pneg %p7353_p1 }
0x24cb   : > { %p7360_p13 = por %p7359_p8, %p7358_p10 }
0x24cd   : > { %p7361_p5 = pnand %p7360_p13, %p7354_p3 }
0x24cf   : > { %7364 = shalt.err (!%p7361_p5)
}
0x24d0   : > { %s7511_s0 = smov 128  }
0x24d1   : > { %6296 = dma.vmem_to_hbm [thread:$0]  (%p9153_p4), %s8955_s23, 256, %s8951_s6, %s5064_s24, %s7511_s0, %s7511_s0, %s9145_s13  }
0x24d2 PF: > { %s9154_s11 = sld [smem:[#allocation69_spill]]  ;;  %s5092_s10 = sand.u32 1, %s7427_s15  }
0x24d3   : > { %p9156_p0 = scmp.ge.s32.totalorder %s7439_s18, 2  ;;  %s5093_s26 = scalar_lea.sflag [#allocation4], %s5092_s10 }
0x24d8   : > { %p9155_p12 = scmp.ne.s32.totalorder %s9154_s11, 0 }
0x24da   : > { %p6352_p2 = pnand %p9156_p0, %p9155_p12 }
0x24dc   : > { %7422 = dma.done.wait (!%p6352_p2), %s5093_s26, 256  }
0x24dd   : > { %7424 = vsyncadd (!%p6352_p2), %s5093_s26, 4294967040  ;;  %s9157_s18 = sld [smem:[#allocation67_spill]]  ;;  %s9158_s1 = sld [smem:[#allocation66_spill]] }
0x24de   : > { %s9159_s0 = sld [smem:[#allocation68_spill]]  ;;  %s9160_s15 = smov %s7431_s16 }
0x24e3   : > { %p86_p9 = scmp.ge.s32.totalorder %s9157_s18, 4   ;;  %s9161_s16 = smov %s9158_s1 }
0x24e5   :  { %88 = sbr.rel (!%p86_p9) target bundleno = 78 (0x4e), region = 310 }
0x24ec   :  { %5098 = vsyncpa [#allocation3], 1 }
0x24ed   :  { %5100 = vsyncpa [#allocation3 + $0x1], 1 }
0x24ee   :  { %5101 = vsyncpa [#allocation6], 1 }
0x24ef   :  { %5103 = vsyncpa [#allocation6 + $0x1], 1 }
0x24f0   :  { %5104 = vsyncpa [#allocation9], 1 }
0x24f1   :  { %5106 = vsyncpa [#allocation9 + $0x1], 1 }
0x24f2   :  { %5107 = vsyncpa [#allocation12], 1 }
0x24f3   :  { %5108 = vsyncpa [#allocation15], 1 }
0x24f4   :  { %5109 = vsyncpa [#allocation18], 1 }
0x24f5   :  { %5110 = vsyncpa [#allocation21], 1 }
0x24f6   :  { %5111 = vsyncpa [#allocation24], 1 }
0x24f7   :  { %5112 = vsyncpa [#allocation27], 1 }
0x24f8   :  { %5113 = vsyncpa [#allocation4], 1 }
0x24f9   :  { %5115 = vsyncpa [#allocation4 + $0x1], 1 }

</bundles_post_ra>
